<compile_context>
chip_gen: v5e
topology: v5e:2x2
jax: 0.10.0
libtpu: 0.0.40
codegen_flags: <defaults>
</compile_context>

<pallas_src>
import functools

import jax
import jax.numpy as jnp
from jax.experimental import pallas as pl
from jax.experimental.pallas import tpu as pltpu


# ----------------------------- config (small, synthetic) -----------------------------
VOCAB_SIZE = 50
PAD_IDX = 0
EMB_SIZE = 32
HIDDEN_SIZE = 32
NUM_LAYERS = 2
BATCH = 2
SEQ_LEN = 8


# ----------------------------- fused encoder kernel -----------------------------
def encoder_kernel(x_ref, mask_ref,
                   wi0_ref, wh0_ref, b0_ref,
                   wi1_ref, wh1_ref, b1_ref,
                   wlin_ref, blin_ref,
                   out_ref, hlast_ref,
                   act_ref):
    """Fused 2-layer GRU + Linear + ReLU.

    x_ref:    (T*B, E)   time-major flattened embeddings (row = t*B + b)
    mask_ref: (T*B, 1)   1.0 if t < length[b] else 0.0
    wiL_ref:  (3, in, H) gate-major input weights (r, z, n), pre-transposed
    whL_ref:  (3, H, H)  gate-major hidden weights (r, z, n), pre-transposed
    bL_ref:   (4, 1, H)  rows: [b_ih_r + b_hh_r, b_ih_z + b_hh_z, b_ih_n, b_hh_n]
    wlin_ref: (H, H)     linear weight, pre-transposed (in, out)
    blin_ref: (1, H)
    out_ref:  (T*B, H)   relu(linear(padded GRU output)) as a flat slab
    hlast_ref:(B, H)     final hidden state of the last layer
    act_ref:  (T*B, H)   VMEM scratch for inter-layer activations
    """
    B, H = hlast_ref.shape
    TB = x_ref.shape[0]
    T = TB // B

    mask = mask_ref[...]                      # (T*B, 1)

    def run_layer(x_flat, wi_ref, wh_ref, b_ref):
        wi = wi_ref[...]                      # (3, in, H)
        wh = wh_ref[...]                      # (3, H, H)
        b = b_ref[...]                        # (4, 1, H)

        # Hoisted, whole-sequence input projections (one matmul per gate).
        gi_r = jnp.dot(x_flat, wi[0], preferred_element_type=jnp.float32) + b[0]
        gi_z = jnp.dot(x_flat, wi[1], preferred_element_type=jnp.float32) + b[1]
        gi_n = jnp.dot(x_flat, wi[2], preferred_element_type=jnp.float32) + b[2]
        b_hn = b[3]                           # (1, H)

        h = jnp.zeros((B, H), jnp.float32)
        # Sequential recurrence, statically unrolled (T is small).
        for t in range(T):
            sl = slice(t * B, (t + 1) * B)
            m = mask[sl]                      # (B, 1)
            gh_r = jnp.dot(h, wh[0], preferred_element_type=jnp.float32)
            gh_z = jnp.dot(h, wh[1], preferred_element_type=jnp.float32)
            gh_n = jnp.dot(h, wh[2], preferred_element_type=jnp.float32) + b_hn
            r = jax.nn.sigmoid(gi_r[sl] + gh_r)
            z = jax.nn.sigmoid(gi_z[sl] + gh_z)
            n = jnp.tanh(gi_n[sl] + r * gh_n)
            h_new = (1.0 - z) * n + z * h
            h = m * h_new + (1.0 - m) * h     # freeze hidden past sequence length
            act_ref[sl, :] = m * h            # zero padded positions (pad_packed)
        return h

    # Layer 0: input = embeddings.
    x0 = x_ref[...]                           # (T*B, E)
    run_layer(x0, wi0_ref, wh0_ref, b0_ref)

    # Layer 1: input = layer-0 activations (read before overwriting the scratch).
    x1 = act_ref[...]                         # (T*B, H)
    h1 = run_layer(x1, wi1_ref, wh1_ref, b1_ref)

    # Linear + ReLU on every (padded) output position, fused into the same call.
    y = jnp.dot(act_ref[...], wlin_ref[...],
                preferred_element_type=jnp.float32) + blin_ref[...]
    out_ref[...] = jnp.maximum(y, 0.0)
    hlast_ref[...] = h1


def _full_spec(shape):
    nd = len(shape)
    return pl.BlockSpec(shape, lambda i, _nd=nd: (0,) * _nd)


def encoder_pallas(x_flat, mask_flat, gru_params, lin_w, lin_b):
    """x_flat: (T*B, E), mask_flat: (T*B, 1). Returns (y (T*B,H), h_last (B,H))."""
    TB = x_flat.shape[0]
    B = BATCH
    H = HIDDEN_SIZE
    (wi0, wh0, b0), (wi1, wh1, b1) = gru_params

    inputs = (x_flat, mask_flat, wi0, wh0, b0, wi1, wh1, b1, lin_w, lin_b)
    in_specs = [_full_spec(a.shape) for a in inputs]

    return pl.pallas_call(
        encoder_kernel,
        out_shape=(jax.ShapeDtypeStruct((TB, H), jnp.float32),
                   jax.ShapeDtypeStruct((B, H), jnp.float32)),
        grid_spec=pltpu.PrefetchScalarGridSpec(
            num_scalar_prefetch=0,
            grid=(1,),
            in_specs=in_specs,
            out_specs=(pl.BlockSpec((TB, H), lambda i: (0, 0)),
                       pl.BlockSpec((B, H), lambda i: (0, 0))),
            scratch_shapes=[pltpu.VMEM((TB, H), jnp.float32)],
        ),
        compiler_params=pltpu.CompilerParams(
            dimension_semantics=("arbitrary",)),
    )(*inputs)


# ----------------------------- parameters -----------------------------
def _pack_gru_layer(w_ih, w_hh, b_ih, b_hh, H):
    """PyTorch layout (3H, in)/(3H, H)/(3H,) with gate order r,z,n ->
    gate-major, pre-transposed, bias-folded layout for the kernel."""
    wir, wiz, win = w_ih[:H], w_ih[H:2 * H], w_ih[2 * H:]
    whr, whz, whn = w_hh[:H], w_hh[H:2 * H], w_hh[2 * H:]
    bir, biz, bin_ = b_ih[:H], b_ih[H:2 * H], b_ih[2 * H:]
    bhr, bhz, bhn = b_hh[:H], b_hh[H:2 * H], b_hh[2 * H:]
    wi = jnp.stack([wir.T, wiz.T, win.T], axis=0)          # (3, in, H)
    wh = jnp.stack([whr.T, whz.T, whn.T], axis=0)          # (3, H, H)
    b = jnp.stack([(bir + bhr)[None, :], (biz + bhz)[None, :],
                   bin_[None, :], bhn[None, :]], axis=0)   # (4, 1, H)
    return wi, wh, b


def init_params(key):
    keys = jax.random.split(key, 3 + 4 * NUM_LAYERS)
    params = {}

    # Embedding (padding_idx row zeroed, as nn.Embedding does)
    emb = jax.random.normal(keys[0], (VOCAB_SIZE, EMB_SIZE), jnp.float32)
    emb = emb.at[PAD_IDX].set(0.0)
    params["embedding"] = emb

    # GRU layers (PyTorch init: U(-1/sqrt(H), 1/sqrt(H)); gate order r, z, n)
    k = 1.0 / jnp.sqrt(HIDDEN_SIZE)
    gru = []
    for layer in range(NUM_LAYERS):
        in_dim = EMB_SIZE if layer == 0 else HIDDEN_SIZE
        kk = keys[3 + 4 * layer: 3 + 4 * (layer + 1)]
        w_ih = jax.random.uniform(kk[0], (3 * HIDDEN_SIZE, in_dim), jnp.float32, -k, k)
        w_hh = jax.random.uniform(kk[1], (3 * HIDDEN_SIZE, HIDDEN_SIZE), jnp.float32, -k, k)
        b_ih = jax.random.uniform(kk[2], (3 * HIDDEN_SIZE,), jnp.float32, -k, k)
        b_hh = jax.random.uniform(kk[3], (3 * HIDDEN_SIZE,), jnp.float32, -k, k)
        gru.append(_pack_gru_layer(w_ih, w_hh, b_ih, b_hh, HIDDEN_SIZE))
    params["gru"] = tuple(gru)

    # Linear(hidden, hidden)
    kl = 1.0 / jnp.sqrt(HIDDEN_SIZE)
    lin_w = jax.random.uniform(keys[1], (HIDDEN_SIZE, HIDDEN_SIZE), jnp.float32, -kl, kl)
    lin_b = jax.random.uniform(keys[2], (HIDDEN_SIZE,), jnp.float32, -kl, kl)
    params["linear_w"] = lin_w.T            # (in, out)
    params["linear_b"] = lin_b[None, :]     # (1, out)
    return params


# ----------------------------- forward -----------------------------
@jax.jit
def encoder_forward(params, enc_input, text_lengths):
    """enc_input: (B, T) int32 token ids; text_lengths: (B,) int32.

    Returns (output (B, T, H), hidden_last (B, H)) matching the PyTorch forward
    (output = relu(linear(padded GRU outputs)), hidden_last = hidden[-1]).
    """
    B, T = enc_input.shape

    # Embedding lookup (glue gather) + dropout (eval -> identity)
    emb = params["embedding"][enc_input]                       # (B, T, E)
    x = jnp.transpose(emb, (1, 0, 2)).astype(jnp.float32)      # (T, B, E) time-major
    x_flat = x.reshape(T * B, EMB_SIZE)

    # validity mask, mimicking pack_padded_sequence(enforce_sorted=False)
    mask = (jnp.arange(T)[:, None] < text_lengths[None, :]).astype(jnp.float32)  # (T, B)
    mask_flat = mask.reshape(T * B, 1)

    y_flat, h_last = encoder_pallas(x_flat, mask_flat, params["gru"],
                                    params["linear_w"], params["linear_b"])

    output = jnp.transpose(y_flat.reshape(T, B, HIDDEN_SIZE), (1, 0, 2))  # (B, T, H)
    # NOTE: pad_packed_sequence truncates to max(text_lengths); here T == max length,
    # otherwise trailing columns are consistent zero-padding -> relu(bias) rows.
    return output, h_last


# ----------------------------- main -----------------------------
if __name__ == "__main__":
    key = jax.random.PRNGKey(0)
    pkey, dkey = jax.random.split(key)
    params = init_params(pkey)

    # deterministic example inputs
    enc_input = jax.random.randint(dkey, (BATCH, SEQ_LEN), 1, VOCAB_SIZE, dtype=jnp.int32)
    text_lengths = jnp.array([SEQ_LEN, 5], dtype=jnp.int32)  # max length == T
    # zero-pad token positions past each length (as a padded batch would be)
    pos = jnp.arange(SEQ_LEN)[None, :]
    enc_input = jnp.where(pos < text_lengths[:, None], enc_input, PAD_IDX)

    output, hidden_last = encoder_forward(params, enc_input, text_lengths)
    jax.block_until_ready((output, hidden_last))

    assert output.shape == (BATCH, SEQ_LEN, HIDDEN_SIZE)
    assert hidden_last.shape == (BATCH, HIDDEN_SIZE)
    print("KERNEL_OK")
</pallas_src>

<mosaic_0001>
module attributes {stable_mosaic.version = 11 : i64} {
  func.func @encoder_kernel(%arg0: i32, %arg1: memref<16x32xf32, #tpu.memory_space<vmem>>, %arg2: memref<16x1xf32, #tpu.memory_space<vmem>>, %arg3: memref<3x32x32xf32, #tpu.memory_space<vmem>>, %arg4: memref<3x32x32xf32, #tpu.memory_space<vmem>>, %arg5: memref<4x1x32xf32, #tpu.memory_space<vmem>>, %arg6: memref<3x32x32xf32, #tpu.memory_space<vmem>>, %arg7: memref<3x32x32xf32, #tpu.memory_space<vmem>>, %arg8: memref<4x1x32xf32, #tpu.memory_space<vmem>>, %arg9: memref<32x32xf32, #tpu.memory_space<vmem>>, %arg10: memref<1x32xf32, #tpu.memory_space<vmem>>, %arg11: memref<16x32xf32, #tpu.memory_space<vmem>>, %arg12: memref<2x32xf32, #tpu.memory_space<vmem>>, %arg13: memref<16x32xf32, #tpu.memory_space<vmem>>) attributes {dimension_semantics = [#tpu.dimension_semantics<arbitrary>], iteration_bounds = array<i64: 1>, scalar_prefetch = 0 : i64, scratch_operands = 1 : i64, tpu.core_type = #tpu.core_type<tc>, window_params = [{pipeline_mode = #tpu.pipeline_mode<synchronous>, transform_indices = @transform_0, window_bounds = array<i64: 16, 32>}, {pipeline_mode = #tpu.pipeline_mode<synchronous>, transform_indices = @transform_1, window_bounds = array<i64: 16, 1>}, {pipeline_mode = #tpu.pipeline_mode<synchronous>, transform_indices = @transform_2, window_bounds = array<i64: 3, 32, 32>}, {pipeline_mode = #tpu.pipeline_mode<synchronous>, transform_indices = @transform_3, window_bounds = array<i64: 3, 32, 32>}, {pipeline_mode = #tpu.pipeline_mode<synchronous>, transform_indices = @transform_4, window_bounds = array<i64: 4, 1, 32>}, {pipeline_mode = #tpu.pipeline_mode<synchronous>, transform_indices = @transform_5, window_bounds = array<i64: 3, 32, 32>}, {pipeline_mode = #tpu.pipeline_mode<synchronous>, transform_indices = @transform_6, window_bounds = array<i64: 3, 32, 32>}, {pipeline_mode = #tpu.pipeline_mode<synchronous>, transform_indices = @transform_7, window_bounds = array<i64: 4, 1, 32>}, {pipeline_mode = #tpu.pipeline_mode<synchronous>, transform_indices = @transform_8, window_bounds = array<i64: 32, 32>}, {pipeline_mode = #tpu.pipeline_mode<synchronous>, transform_indices = @transform_9, window_bounds = array<i64: 1, 32>}, {pipeline_mode = #tpu.pipeline_mode<synchronous>, transform_indices = @transform_10, window_bounds = array<i64: 16, 32>}, {pipeline_mode = #tpu.pipeline_mode<synchronous>, transform_indices = @transform_11, window_bounds = array<i64: 2, 32>}]} {
    %c0 = arith.constant 0 : index
    %c0_0 = arith.constant 0 : index
    %0 = vector.load %arg2[%c0, %c0_0] : memref<16x1xf32, #tpu.memory_space<vmem>>, vector<16x1xf32>
    %c0_1 = arith.constant 0 : index
    %c0_2 = arith.constant 0 : index
    %1 = vector.load %arg1[%c0_1, %c0_2] : memref<16x32xf32, #tpu.memory_space<vmem>>, vector<16x32xf32>
    %c0_3 = arith.constant 0 : index
    %c0_4 = arith.constant 0 : index
    %c0_5 = arith.constant 0 : index
    %2 = vector.load %arg3[%c0_3, %c0_4, %c0_5] : memref<3x32x32xf32, #tpu.memory_space<vmem>>, vector<3x32x32xf32>
    %c0_6 = arith.constant 0 : index
    %c0_7 = arith.constant 0 : index
    %c0_8 = arith.constant 0 : index
    %3 = vector.load %arg4[%c0_6, %c0_7, %c0_8] : memref<3x32x32xf32, #tpu.memory_space<vmem>>, vector<3x32x32xf32>
    %c0_9 = arith.constant 0 : index
    %c0_10 = arith.constant 0 : index
    %c0_11 = arith.constant 0 : index
    %4 = vector.load %arg5[%c0_9, %c0_10, %c0_11] : memref<4x1x32xf32, #tpu.memory_space<vmem>>, vector<4x1x32xf32>
    %5 = vector.extract_strided_slice %2 {offsets = [0, 0, 0], sizes = [1, 32, 32], strides = [1, 1, 1]} : vector<3x32x32xf32> to vector<1x32x32xf32>
    %6 = vector.shape_cast %5 : vector<1x32x32xf32> to vector<32x32xf32>
    %cst = arith.constant dense<0.000000e+00> : vector<16x32xf32>
    %7 = tpu.matmul %1, %6, %cst {dimension_numbers = #tpu.dot_dimension_numbers<[1], [0], [0], [1], [0, 0, 1, 1], [], []>} : vector<16x32xf32>, vector<32x32xf32>, vector<16x32xf32> -> vector<16x32xf32>
    %8 = vector.extract_strided_slice %4 {offsets = [0, 0, 0], sizes = [1, 1, 32], strides = [1, 1, 1]} : vector<4x1x32xf32> to vector<1x1x32xf32>
    %9 = vector.shape_cast %8 : vector<1x1x32xf32> to vector<1x32xf32>
    %10 = vector.broadcast %9 : vector<1x32xf32> to vector<16x32xf32>
    %11 = arith.addf %7, %10 : vector<16x32xf32>
    %12 = vector.extract_strided_slice %2 {offsets = [1, 0, 0], sizes = [1, 32, 32], strides = [1, 1, 1]} : vector<3x32x32xf32> to vector<1x32x32xf32>
    %13 = vector.shape_cast %12 : vector<1x32x32xf32> to vector<32x32xf32>
    %cst_12 = arith.constant dense<0.000000e+00> : vector<16x32xf32>
    %14 = tpu.matmul %1, %13, %cst_12 {dimension_numbers = #tpu.dot_dimension_numbers<[1], [0], [0], [1], [0, 0, 1, 1], [], []>} : vector<16x32xf32>, vector<32x32xf32>, vector<16x32xf32> -> vector<16x32xf32>
    %15 = vector.extract_strided_slice %4 {offsets = [1, 0, 0], sizes = [1, 1, 32], strides = [1, 1, 1]} : vector<4x1x32xf32> to vector<1x1x32xf32>
    %16 = vector.shape_cast %15 : vector<1x1x32xf32> to vector<1x32xf32>
    %17 = vector.broadcast %16 : vector<1x32xf32> to vector<16x32xf32>
    %18 = arith.addf %14, %17 : vector<16x32xf32>
    %19 = vector.extract_strided_slice %2 {offsets = [2, 0, 0], sizes = [1, 32, 32], strides = [1, 1, 1]} : vector<3x32x32xf32> to vector<1x32x32xf32>
    %20 = vector.shape_cast %19 : vector<1x32x32xf32> to vector<32x32xf32>
    %cst_13 = arith.constant dense<0.000000e+00> : vector<16x32xf32>
    %21 = tpu.matmul %1, %20, %cst_13 {dimension_numbers = #tpu.dot_dimension_numbers<[1], [0], [0], [1], [0, 0, 1, 1], [], []>} : vector<16x32xf32>, vector<32x32xf32>, vector<16x32xf32> -> vector<16x32xf32>
    %22 = vector.extract_strided_slice %4 {offsets = [2, 0, 0], sizes = [1, 1, 32], strides = [1, 1, 1]} : vector<4x1x32xf32> to vector<1x1x32xf32>
    %23 = vector.shape_cast %22 : vector<1x1x32xf32> to vector<1x32xf32>
    %24 = vector.broadcast %23 : vector<1x32xf32> to vector<16x32xf32>
    %25 = arith.addf %21, %24 : vector<16x32xf32>
    %26 = vector.extract_strided_slice %4 {offsets = [3, 0, 0], sizes = [1, 1, 32], strides = [1, 1, 1]} : vector<4x1x32xf32> to vector<1x1x32xf32>
    %27 = vector.shape_cast %26 : vector<1x1x32xf32> to vector<1x32xf32>
    %cst_14 = arith.constant 0.000000e+00 : f32
    %28 = vector.broadcast %cst_14 : f32 to vector<2x32xf32>
    %29 = vector.extract_strided_slice %0 {offsets = [0, 0], sizes = [2, 1], strides = [1, 1]} : vector<16x1xf32> to vector<2x1xf32>
    %30 = vector.extract_strided_slice %3 {offsets = [0, 0, 0], sizes = [1, 32, 32], strides = [1, 1, 1]} : vector<3x32x32xf32> to vector<1x32x32xf32>
    %31 = vector.shape_cast %30 : vector<1x32x32xf32> to vector<32x32xf32>
    %cst_15 = arith.constant dense<0.000000e+00> : vector<2x32xf32>
    %32 = tpu.matmul %28, %31, %cst_15 {dimension_numbers = #tpu.dot_dimension_numbers<[1], [0], [0], [1], [0, 0, 1, 1], [], []>} : vector<2x32xf32>, vector<32x32xf32>, vector<2x32xf32> -> vector<2x32xf32>
    %33 = vector.extract_strided_slice %3 {offsets = [1, 0, 0], sizes = [1, 32, 32], strides = [1, 1, 1]} : vector<3x32x32xf32> to vector<1x32x32xf32>
    %34 = vector.shape_cast %33 : vector<1x32x32xf32> to vector<32x32xf32>
    %cst_16 = arith.constant dense<0.000000e+00> : vector<2x32xf32>
    %35 = tpu.matmul %28, %34, %cst_16 {dimension_numbers = #tpu.dot_dimension_numbers<[1], [0], [0], [1], [0, 0, 1, 1], [], []>} : vector<2x32xf32>, vector<32x32xf32>, vector<2x32xf32> -> vector<2x32xf32>
    %36 = vector.extract_strided_slice %3 {offsets = [2, 0, 0], sizes = [1, 32, 32], strides = [1, 1, 1]} : vector<3x32x32xf32> to vector<1x32x32xf32>
    %37 = vector.shape_cast %36 : vector<1x32x32xf32> to vector<32x32xf32>
    %cst_17 = arith.constant dense<0.000000e+00> : vector<2x32xf32>
    %38 = tpu.matmul %28, %37, %cst_17 {dimension_numbers = #tpu.dot_dimension_numbers<[1], [0], [0], [1], [0, 0, 1, 1], [], []>} : vector<2x32xf32>, vector<32x32xf32>, vector<2x32xf32> -> vector<2x32xf32>
    %39 = vector.broadcast %27 : vector<1x32xf32> to vector<2x32xf32>
    %40 = arith.addf %38, %39 : vector<2x32xf32>
    %41 = vector.extract_strided_slice %11 {offsets = [0, 0], sizes = [2, 32], strides = [1, 1]} : vector<16x32xf32> to vector<2x32xf32>
    %42 = arith.addf %41, %32 : vector<2x32xf32>
    %43 = arith.negf %42 : vector<2x32xf32>
    %44 = math.exp %43 : vector<2x32xf32>
    %cst_18 = arith.constant 1.000000e+00 : f32
    %45 = vector.broadcast %cst_18 : f32 to vector<2x32xf32>
    %46 = arith.addf %45, %44 : vector<2x32xf32>
    %47 = arith.divf %45, %46 : vector<2x32xf32>
    %48 = vector.extract_strided_slice %18 {offsets = [0, 0], sizes = [2, 32], strides = [1, 1]} : vector<16x32xf32> to vector<2x32xf32>
    %49 = arith.addf %48, %35 : vector<2x32xf32>
    %50 = arith.negf %49 : vector<2x32xf32>
    %51 = math.exp %50 : vector<2x32xf32>
    %cst_19 = arith.constant 1.000000e+00 : f32
    %52 = vector.broadcast %cst_19 : f32 to vector<2x32xf32>
    %53 = arith.addf %52, %51 : vector<2x32xf32>
    %54 = arith.divf %52, %53 : vector<2x32xf32>
    %55 = vector.extract_strided_slice %25 {offsets = [0, 0], sizes = [2, 32], strides = [1, 1]} : vector<16x32xf32> to vector<2x32xf32>
    %56 = arith.mulf %47, %40 : vector<2x32xf32>
    %57 = arith.addf %55, %56 : vector<2x32xf32>
    %58 = math.tanh %57 : vector<2x32xf32>
    %cst_20 = arith.constant 1.000000e+00 : f32
    %59 = vector.broadcast %cst_20 : f32 to vector<2x32xf32>
    %60 = arith.subf %59, %54 : vector<2x32xf32>
    %61 = arith.mulf %60, %58 : vector<2x32xf32>
    %62 = arith.mulf %54, %28 : vector<2x32xf32>
    %63 = arith.addf %61, %62 : vector<2x32xf32>
    %64 = vector.broadcast %29 : vector<2x1xf32> to vector<2x32xf32>
    %65 = arith.mulf %64, %63 : vector<2x32xf32>
    %cst_21 = arith.constant 1.000000e+00 : f32
    %66 = vector.broadcast %cst_21 : f32 to vector<2x1xf32>
    %67 = arith.subf %66, %29 : vector<2x1xf32>
    %68 = vector.broadcast %67 : vector<2x1xf32> to vector<2x32xf32>
    %69 = arith.mulf %68, %28 : vector<2x32xf32>
    %70 = arith.addf %65, %69 : vector<2x32xf32>
    %71 = vector.broadcast %29 : vector<2x1xf32> to vector<2x32xf32>
    %72 = arith.mulf %71, %70 : vector<2x32xf32>
    %c0_22 = arith.constant 0 : index
    %c0_23 = arith.constant 0 : index
    %73 = vector.load %arg13[%c0_22, %c0_23] : memref<16x32xf32, #tpu.memory_space<vmem>>, vector<2x32xf32>
    tpu.vector_store %arg13[%c0_22, %c0_23], %72 {strides = array<i32>} : memref<16x32xf32, #tpu.memory_space<vmem>>, vector<2x32xf32>,
    %74 = vector.extract_strided_slice %0 {offsets = [2, 0], sizes = [2, 1], strides = [1, 1]} : vector<16x1xf32> to vector<2x1xf32>
    %75 = vector.extract_strided_slice %3 {offsets = [0, 0, 0], sizes = [1, 32, 32], strides = [1, 1, 1]} : vector<3x32x32xf32> to vector<1x32x32xf32>
    %76 = vector.shape_cast %75 : vector<1x32x32xf32> to vector<32x32xf32>
    %cst_24 = arith.constant dense<0.000000e+00> : vector<2x32xf32>
    %77 = tpu.matmul %70, %76, %cst_24 {dimension_numbers = #tpu.dot_dimension_numbers<[1], [0], [0], [1], [0, 0, 1, 1], [], []>} : vector<2x32xf32>, vector<32x32xf32>, vector<2x32xf32> -> vector<2x32xf32>
    %78 = vector.extract_strided_slice %3 {offsets = [1, 0, 0], sizes = [1, 32, 32], strides = [1, 1, 1]} : vector<3x32x32xf32> to vector<1x32x32xf32>
    %79 = vector.shape_cast %78 : vector<1x32x32xf32> to vector<32x32xf32>
    %cst_25 = arith.constant dense<0.000000e+00> : vector<2x32xf32>
    %80 = tpu.matmul %70, %79, %cst_25 {dimension_numbers = #tpu.dot_dimension_numbers<[1], [0], [0], [1], [0, 0, 1, 1], [], []>} : vector<2x32xf32>, vector<32x32xf32>, vector<2x32xf32> -> vector<2x32xf32>
    %81 = vector.extract_strided_slice %3 {offsets = [2, 0, 0], sizes = [1, 32, 32], strides = [1, 1, 1]} : vector<3x32x32xf32> to vector<1x32x32xf32>
    %82 = vector.shape_cast %81 : vector<1x32x32xf32> to vector<32x32xf32>
    %cst_26 = arith.constant dense<0.000000e+00> : vector<2x32xf32>
    %83 = tpu.matmul %70, %82, %cst_26 {dimension_numbers = #tpu.dot_dimension_numbers<[1], [0], [0], [1], [0, 0, 1, 1], [], []>} : vector<2x32xf32>, vector<32x32xf32>, vector<2x32xf32> -> vector<2x32xf32>
    %84 = vector.broadcast %27 : vector<1x32xf32> to vector<2x32xf32>
    %85 = arith.addf %83, %84 : vector<2x32xf32>
    %86 = vector.extract_strided_slice %11 {offsets = [2, 0], sizes = [2, 32], strides = [1, 1]} : vector<16x32xf32> to vector<2x32xf32>
    %87 = arith.addf %86, %77 : vector<2x32xf32>
    %88 = arith.negf %87 : vector<2x32xf32>
    %89 = math.exp %88 : vector<2x32xf32>
    %cst_27 = arith.constant 1.000000e+00 : f32
    %90 = vector.broadcast %cst_27 : f32 to vector<2x32xf32>
    %91 = arith.addf %90, %89 : vector<2x32xf32>
    %92 = arith.divf %90, %91 : vector<2x32xf32>
    %93 = vector.extract_strided_slice %18 {offsets = [2, 0], sizes = [2, 32], strides = [1, 1]} : vector<16x32xf32> to vector<2x32xf32>
    %94 = arith.addf %93, %80 : vector<2x32xf32>
    %95 = arith.negf %94 : vector<2x32xf32>
    %96 = math.exp %95 : vector<2x32xf32>
    %cst_28 = arith.constant 1.000000e+00 : f32
    %97 = vector.broadcast %cst_28 : f32 to vector<2x32xf32>
    %98 = arith.addf %97, %96 : vector<2x32xf32>
    %99 = arith.divf %97, %98 : vector<2x32xf32>
    %100 = vector.extract_strided_slice %25 {offsets = [2, 0], sizes = [2, 32], strides = [1, 1]} : vector<16x32xf32> to vector<2x32xf32>
    %101 = arith.mulf %92, %85 : vector<2x32xf32>
    %102 = arith.addf %100, %101 : vector<2x32xf32>
    %103 = math.tanh %102 : vector<2x32xf32>
    %cst_29 = arith.constant 1.000000e+00 : f32
    %104 = vector.broadcast %cst_29 : f32 to vector<2x32xf32>
    %105 = arith.subf %104, %99 : vector<2x32xf32>
    %106 = arith.mulf %105, %103 : vector<2x32xf32>
    %107 = arith.mulf %99, %70 : vector<2x32xf32>
    %108 = arith.addf %106, %107 : vector<2x32xf32>
    %109 = vector.broadcast %74 : vector<2x1xf32> to vector<2x32xf32>
    %110 = arith.mulf %109, %108 : vector<2x32xf32>
    %cst_30 = arith.constant 1.000000e+00 : f32
    %111 = vector.broadcast %cst_30 : f32 to vector<2x1xf32>
    %112 = arith.subf %111, %74 : vector<2x1xf32>
    %113 = vector.broadcast %112 : vector<2x1xf32> to vector<2x32xf32>
    %114 = arith.mulf %113, %70 : vector<2x32xf32>
    %115 = arith.addf %110, %114 : vector<2x32xf32>
    %116 = vector.broadcast %74 : vector<2x1xf32> to vector<2x32xf32>
    %117 = arith.mulf %116, %115 : vector<2x32xf32>
    %c2 = arith.constant 2 : index
    %c0_31 = arith.constant 0 : index
    %118 = vector.load %arg13[%c2, %c0_31] : memref<16x32xf32, #tpu.memory_space<vmem>>, vector<2x32xf32>
    tpu.vector_store %arg13[%c2, %c0_31], %117 {strides = array<i32>} : memref<16x32xf32, #tpu.memory_space<vmem>>, vector<2x32xf32>,
    %119 = vector.extract_strided_slice %0 {offsets = [4, 0], sizes = [2, 1], strides = [1, 1]} : vector<16x1xf32> to vector<2x1xf32>
    %120 = vector.extract_strided_slice %3 {offsets = [0, 0, 0], sizes = [1, 32, 32], strides = [1, 1, 1]} : vector<3x32x32xf32> to vector<1x32x32xf32>
    %121 = vector.shape_cast %120 : vector<1x32x32xf32> to vector<32x32xf32>
    %cst_32 = arith.constant dense<0.000000e+00> : vector<2x32xf32>
    %122 = tpu.matmul %115, %121, %cst_32 {dimension_numbers = #tpu.dot_dimension_numbers<[1], [0], [0], [1], [0, 0, 1, 1], [], []>} : vector<2x32xf32>, vector<32x32xf32>, vector<2x32xf32> -> vector<2x32xf32>
    %123 = vector.extract_strided_slice %3 {offsets = [1, 0, 0], sizes = [1, 32, 32], strides = [1, 1, 1]} : vector<3x32x32xf32> to vector<1x32x32xf32>
    %124 = vector.shape_cast %123 : vector<1x32x32xf32> to vector<32x32xf32>
    %cst_33 = arith.constant dense<0.000000e+00> : vector<2x32xf32>
    %125 = tpu.matmul %115, %124, %cst_33 {dimension_numbers = #tpu.dot_dimension_numbers<[1], [0], [0], [1], [0, 0, 1, 1], [], []>} : vector<2x32xf32>, vector<32x32xf32>, vector<2x32xf32> -> vector<2x32xf32>
    %126 = vector.extract_strided_slice %3 {offsets = [2, 0, 0], sizes = [1, 32, 32], strides = [1, 1, 1]} : vector<3x32x32xf32> to vector<1x32x32xf32>
    %127 = vector.shape_cast %126 : vector<1x32x32xf32> to vector<32x32xf32>
    %cst_34 = arith.constant dense<0.000000e+00> : vector<2x32xf32>
    %128 = tpu.matmul %115, %127, %cst_34 {dimension_numbers = #tpu.dot_dimension_numbers<[1], [0], [0], [1], [0, 0, 1, 1], [], []>} : vector<2x32xf32>, vector<32x32xf32>, vector<2x32xf32> -> vector<2x32xf32>
    %129 = vector.broadcast %27 : vector<1x32xf32> to vector<2x32xf32>
    %130 = arith.addf %128, %129 : vector<2x32xf32>
    %131 = vector.extract_strided_slice %11 {offsets = [4, 0], sizes = [2, 32], strides = [1, 1]} : vector<16x32xf32> to vector<2x32xf32>
    %132 = arith.addf %131, %122 : vector<2x32xf32>
    %133 = arith.negf %132 : vector<2x32xf32>
    %134 = math.exp %133 : vector<2x32xf32>
    %cst_35 = arith.constant 1.000000e+00 : f32
    %135 = vector.broadcast %cst_35 : f32 to vector<2x32xf32>
    %136 = arith.addf %135, %134 : vector<2x32xf32>
    %137 = arith.divf %135, %136 : vector<2x32xf32>
    %138 = vector.extract_strided_slice %18 {offsets = [4, 0], sizes = [2, 32], strides = [1, 1]} : vector<16x32xf32> to vector<2x32xf32>
    %139 = arith.addf %138, %125 : vector<2x32xf32>
    %140 = arith.negf %139 : vector<2x32xf32>
    %141 = math.exp %140 : vector<2x32xf32>
    %cst_36 = arith.constant 1.000000e+00 : f32
    %142 = vector.broadcast %cst_36 : f32 to vector<2x32xf32>
    %143 = arith.addf %142, %141 : vector<2x32xf32>
    %144 = arith.divf %142, %143 : vector<2x32xf32>
    %145 = vector.extract_strided_slice %25 {offsets = [4, 0], sizes = [2, 32], strides = [1, 1]} : vector<16x32xf32> to vector<2x32xf32>
    %146 = arith.mulf %137, %130 : vector<2x32xf32>
    %147 = arith.addf %145, %146 : vector<2x32xf32>
    %148 = math.tanh %147 : vector<2x32xf32>
    %cst_37 = arith.constant 1.000000e+00 : f32
    %149 = vector.broadcast %cst_37 : f32 to vector<2x32xf32>
    %150 = arith.subf %149, %144 : vector<2x32xf32>
    %151 = arith.mulf %150, %148 : vector<2x32xf32>
    %152 = arith.mulf %144, %115 : vector<2x32xf32>
    %153 = arith.addf %151, %152 : vector<2x32xf32>
    %154 = vector.broadcast %119 : vector<2x1xf32> to vector<2x32xf32>
    %155 = arith.mulf %154, %153 : vector<2x32xf32>
    %cst_38 = arith.constant 1.000000e+00 : f32
    %156 = vector.broadcast %cst_38 : f32 to vector<2x1xf32>
    %157 = arith.subf %156, %119 : vector<2x1xf32>
    %158 = vector.broadcast %157 : vector<2x1xf32> to vector<2x32xf32>
    %159 = arith.mulf %158, %115 : vector<2x32xf32>
    %160 = arith.addf %155, %159 : vector<2x32xf32>
    %161 = vector.broadcast %119 : vector<2x1xf32> to vector<2x32xf32>
    %162 = arith.mulf %161, %160 : vector<2x32xf32>
    %c4 = arith.constant 4 : index
    %c0_39 = arith.constant 0 : index
    %163 = vector.load %arg13[%c4, %c0_39] : memref<16x32xf32, #tpu.memory_space<vmem>>, vector<2x32xf32>
    tpu.vector_store %arg13[%c4, %c0_39], %162 {strides = array<i32>} : memref<16x32xf32, #tpu.memory_space<vmem>>, vector<2x32xf32>,
    %164 = vector.extract_strided_slice %0 {offsets = [6, 0], sizes = [2, 1], strides = [1, 1]} : vector<16x1xf32> to vector<2x1xf32>
    %165 = vector.extract_strided_slice %3 {offsets = [0, 0, 0], sizes = [1, 32, 32], strides = [1, 1, 1]} : vector<3x32x32xf32> to vector<1x32x32xf32>
    %166 = vector.shape_cast %165 : vector<1x32x32xf32> to vector<32x32xf32>
    %cst_40 = arith.constant dense<0.000000e+00> : vector<2x32xf32>
    %167 = tpu.matmul %160, %166, %cst_40 {dimension_numbers = #tpu.dot_dimension_numbers<[1], [0], [0], [1], [0, 0, 1, 1], [], []>} : vector<2x32xf32>, vector<32x32xf32>, vector<2x32xf32> -> vector<2x32xf32>
    %168 = vector.extract_strided_slice %3 {offsets = [1, 0, 0], sizes = [1, 32, 32], strides = [1, 1, 1]} : vector<3x32x32xf32> to vector<1x32x32xf32>
    %169 = vector.shape_cast %168 : vector<1x32x32xf32> to vector<32x32xf32>
    %cst_41 = arith.constant dense<0.000000e+00> : vector<2x32xf32>
    %170 = tpu.matmul %160, %169, %cst_41 {dimension_numbers = #tpu.dot_dimension_numbers<[1], [0], [0], [1], [0, 0, 1, 1], [], []>} : vector<2x32xf32>, vector<32x32xf32>, vector<2x32xf32> -> vector<2x32xf32>
    %171 = vector.extract_strided_slice %3 {offsets = [2, 0, 0], sizes = [1, 32, 32], strides = [1, 1, 1]} : vector<3x32x32xf32> to vector<1x32x32xf32>
    %172 = vector.shape_cast %171 : vector<1x32x32xf32> to vector<32x32xf32>
    %cst_42 = arith.constant dense<0.000000e+00> : vector<2x32xf32>
    %173 = tpu.matmul %160, %172, %cst_42 {dimension_numbers = #tpu.dot_dimension_numbers<[1], [0], [0], [1], [0, 0, 1, 1], [], []>} : vector<2x32xf32>, vector<32x32xf32>, vector<2x32xf32> -> vector<2x32xf32>
    %174 = vector.broadcast %27 : vector<1x32xf32> to vector<2x32xf32>
    %175 = arith.addf %173, %174 : vector<2x32xf32>
    %176 = vector.extract_strided_slice %11 {offsets = [6, 0], sizes = [2, 32], strides = [1, 1]} : vector<16x32xf32> to vector<2x32xf32>
    %177 = arith.addf %176, %167 : vector<2x32xf32>
    %178 = arith.negf %177 : vector<2x32xf32>
    %179 = math.exp %178 : vector<2x32xf32>
    %cst_43 = arith.constant 1.000000e+00 : f32
    %180 = vector.broadcast %cst_43 : f32 to vector<2x32xf32>
    %181 = arith.addf %180, %179 : vector<2x32xf32>
    %182 = arith.divf %180, %181 : vector<2x32xf32>
    %183 = vector.extract_strided_slice %18 {offsets = [6, 0], sizes = [2, 32], strides = [1, 1]} : vector<16x32xf32> to vector<2x32xf32>
    %184 = arith.addf %183, %170 : vector<2x32xf32>
    %185 = arith.negf %184 : vector<2x32xf32>
    %186 = math.exp %185 : vector<2x32xf32>
    %cst_44 = arith.constant 1.000000e+00 : f32
    %187 = vector.broadcast %cst_44 : f32 to vector<2x32xf32>
    %188 = arith.addf %187, %186 : vector<2x32xf32>
    %189 = arith.divf %187, %188 : vector<2x32xf32>
    %190 = vector.extract_strided_slice %25 {offsets = [6, 0], sizes = [2, 32], strides = [1, 1]} : vector<16x32xf32> to vector<2x32xf32>
    %191 = arith.mulf %182, %175 : vector<2x32xf32>
    %192 = arith.addf %190, %191 : vector<2x32xf32>
    %193 = math.tanh %192 : vector<2x32xf32>
    %cst_45 = arith.constant 1.000000e+00 : f32
    %194 = vector.broadcast %cst_45 : f32 to vector<2x32xf32>
    %195 = arith.subf %194, %189 : vector<2x32xf32>
    %196 = arith.mulf %195, %193 : vector<2x32xf32>
    %197 = arith.mulf %189, %160 : vector<2x32xf32>
    %198 = arith.addf %196, %197 : vector<2x32xf32>
    %199 = vector.broadcast %164 : vector<2x1xf32> to vector<2x32xf32>
    %200 = arith.mulf %199, %198 : vector<2x32xf32>
    %cst_46 = arith.constant 1.000000e+00 : f32
    %201 = vector.broadcast %cst_46 : f32 to vector<2x1xf32>
    %202 = arith.subf %201, %164 : vector<2x1xf32>
    %203 = vector.broadcast %202 : vector<2x1xf32> to vector<2x32xf32>
    %204 = arith.mulf %203, %160 : vector<2x32xf32>
    %205 = arith.addf %200, %204 : vector<2x32xf32>
    %206 = vector.broadcast %164 : vector<2x1xf32> to vector<2x32xf32>
    %207 = arith.mulf %206, %205 : vector<2x32xf32>
    %c6 = arith.constant 6 : index
    %c0_47 = arith.constant 0 : index
    %208 = vector.load %arg13[%c6, %c0_47] : memref<16x32xf32, #tpu.memory_space<vmem>>, vector<2x32xf32>
    tpu.vector_store %arg13[%c6, %c0_47], %207 {strides = array<i32>} : memref<16x32xf32, #tpu.memory_space<vmem>>, vector<2x32xf32>,
    %209 = vector.extract_strided_slice %0 {offsets = [8, 0], sizes = [2, 1], strides = [1, 1]} : vector<16x1xf32> to vector<2x1xf32>
    %210 = vector.extract_strided_slice %3 {offsets = [0, 0, 0], sizes = [1, 32, 32], strides = [1, 1, 1]} : vector<3x32x32xf32> to vector<1x32x32xf32>
    %211 = vector.shape_cast %210 : vector<1x32x32xf32> to vector<32x32xf32>
    %cst_48 = arith.constant dense<0.000000e+00> : vector<2x32xf32>
    %212 = tpu.matmul %205, %211, %cst_48 {dimension_numbers = #tpu.dot_dimension_numbers<[1], [0], [0], [1], [0, 0, 1, 1], [], []>} : vector<2x32xf32>, vector<32x32xf32>, vector<2x32xf32> -> vector<2x32xf32>
    %213 = vector.extract_strided_slice %3 {offsets = [1, 0, 0], sizes = [1, 32, 32], strides = [1, 1, 1]} : vector<3x32x32xf32> to vector<1x32x32xf32>
    %214 = vector.shape_cast %213 : vector<1x32x32xf32> to vector<32x32xf32>
    %cst_49 = arith.constant dense<0.000000e+00> : vector<2x32xf32>
    %215 = tpu.matmul %205, %214, %cst_49 {dimension_numbers = #tpu.dot_dimension_numbers<[1], [0], [0], [1], [0, 0, 1, 1], [], []>} : vector<2x32xf32>, vector<32x32xf32>, vector<2x32xf32> -> vector<2x32xf32>
    %216 = vector.extract_strided_slice %3 {offsets = [2, 0, 0], sizes = [1, 32, 32], strides = [1, 1, 1]} : vector<3x32x32xf32> to vector<1x32x32xf32>
    %217 = vector.shape_cast %216 : vector<1x32x32xf32> to vector<32x32xf32>
    %cst_50 = arith.constant dense<0.000000e+00> : vector<2x32xf32>
    %218 = tpu.matmul %205, %217, %cst_50 {dimension_numbers = #tpu.dot_dimension_numbers<[1], [0], [0], [1], [0, 0, 1, 1], [], []>} : vector<2x32xf32>, vector<32x32xf32>, vector<2x32xf32> -> vector<2x32xf32>
    %219 = vector.broadcast %27 : vector<1x32xf32> to vector<2x32xf32>
    %220 = arith.addf %218, %219 : vector<2x32xf32>
    %221 = vector.extract_strided_slice %11 {offsets = [8, 0], sizes = [2, 32], strides = [1, 1]} : vector<16x32xf32> to vector<2x32xf32>
    %222 = arith.addf %221, %212 : vector<2x32xf32>
    %223 = arith.negf %222 : vector<2x32xf32>
    %224 = math.exp %223 : vector<2x32xf32>
    %cst_51 = arith.constant 1.000000e+00 : f32
    %225 = vector.broadcast %cst_51 : f32 to vector<2x32xf32>
    %226 = arith.addf %225, %224 : vector<2x32xf32>
    %227 = arith.divf %225, %226 : vector<2x32xf32>
    %228 = vector.extract_strided_slice %18 {offsets = [8, 0], sizes = [2, 32], strides = [1, 1]} : vector<16x32xf32> to vector<2x32xf32>
    %229 = arith.addf %228, %215 : vector<2x32xf32>
    %230 = arith.negf %229 : vector<2x32xf32>
    %231 = math.exp %230 : vector<2x32xf32>
    %cst_52 = arith.constant 1.000000e+00 : f32
    %232 = vector.broadcast %cst_52 : f32 to vector<2x32xf32>
    %233 = arith.addf %232, %231 : vector<2x32xf32>
    %234 = arith.divf %232, %233 : vector<2x32xf32>
    %235 = vector.extract_strided_slice %25 {offsets = [8, 0], sizes = [2, 32], strides = [1, 1]} : vector<16x32xf32> to vector<2x32xf32>
    %236 = arith.mulf %227, %220 : vector<2x32xf32>
    %237 = arith.addf %235, %236 : vector<2x32xf32>
    %238 = math.tanh %237 : vector<2x32xf32>
    %cst_53 = arith.constant 1.000000e+00 : f32
    %239 = vector.broadcast %cst_53 : f32 to vector<2x32xf32>
    %240 = arith.subf %239, %234 : vector<2x32xf32>
    %241 = arith.mulf %240, %238 : vector<2x32xf32>
    %242 = arith.mulf %234, %205 : vector<2x32xf32>
    %243 = arith.addf %241, %242 : vector<2x32xf32>
    %244 = vector.broadcast %209 : vector<2x1xf32> to vector<2x32xf32>
    %245 = arith.mulf %244, %243 : vector<2x32xf32>
    %cst_54 = arith.constant 1.000000e+00 : f32
    %246 = vector.broadcast %cst_54 : f32 to vector<2x1xf32>
    %247 = arith.subf %246, %209 : vector<2x1xf32>
    %248 = vector.broadcast %247 : vector<2x1xf32> to vector<2x32xf32>
    %249 = arith.mulf %248, %205 : vector<2x32xf32>
    %250 = arith.addf %245, %249 : vector<2x32xf32>
    %251 = vector.broadcast %209 : vector<2x1xf32> to vector<2x32xf32>
    %252 = arith.mulf %251, %250 : vector<2x32xf32>
    %c8 = arith.constant 8 : index
    %c0_55 = arith.constant 0 : index
    %253 = vector.load %arg13[%c8, %c0_55] : memref<16x32xf32, #tpu.memory_space<vmem>>, vector<2x32xf32>
    tpu.vector_store %arg13[%c8, %c0_55], %252 {strides = array<i32>} : memref<16x32xf32, #tpu.memory_space<vmem>>, vector<2x32xf32>,
    %254 = vector.extract_strided_slice %0 {offsets = [10, 0], sizes = [2, 1], strides = [1, 1]} : vector<16x1xf32> to vector<2x1xf32>
    %255 = vector.extract_strided_slice %3 {offsets = [0, 0, 0], sizes = [1, 32, 32], strides = [1, 1, 1]} : vector<3x32x32xf32> to vector<1x32x32xf32>
    %256 = vector.shape_cast %255 : vector<1x32x32xf32> to vector<32x32xf32>
    %cst_56 = arith.constant dense<0.000000e+00> : vector<2x32xf32>
    %257 = tpu.matmul %250, %256, %cst_56 {dimension_numbers = #tpu.dot_dimension_numbers<[1], [0], [0], [1], [0, 0, 1, 1], [], []>} : vector<2x32xf32>, vector<32x32xf32>, vector<2x32xf32> -> vector<2x32xf32>
    %258 = vector.extract_strided_slice %3 {offsets = [1, 0, 0], sizes = [1, 32, 32], strides = [1, 1, 1]} : vector<3x32x32xf32> to vector<1x32x32xf32>
    %259 = vector.shape_cast %258 : vector<1x32x32xf32> to vector<32x32xf32>
    %cst_57 = arith.constant dense<0.000000e+00> : vector<2x32xf32>
    %260 = tpu.matmul %250, %259, %cst_57 {dimension_numbers = #tpu.dot_dimension_numbers<[1], [0], [0], [1], [0, 0, 1, 1], [], []>} : vector<2x32xf32>, vector<32x32xf32>, vector<2x32xf32> -> vector<2x32xf32>
    %261 = vector.extract_strided_slice %3 {offsets = [2, 0, 0], sizes = [1, 32, 32], strides = [1, 1, 1]} : vector<3x32x32xf32> to vector<1x32x32xf32>
    %262 = vector.shape_cast %261 : vector<1x32x32xf32> to vector<32x32xf32>
    %cst_58 = arith.constant dense<0.000000e+00> : vector<2x32xf32>
    %263 = tpu.matmul %250, %262, %cst_58 {dimension_numbers = #tpu.dot_dimension_numbers<[1], [0], [0], [1], [0, 0, 1, 1], [], []>} : vector<2x32xf32>, vector<32x32xf32>, vector<2x32xf32> -> vector<2x32xf32>
    %264 = vector.broadcast %27 : vector<1x32xf32> to vector<2x32xf32>
    %265 = arith.addf %263, %264 : vector<2x32xf32>
    %266 = vector.extract_strided_slice %11 {offsets = [10, 0], sizes = [2, 32], strides = [1, 1]} : vector<16x32xf32> to vector<2x32xf32>
    %267 = arith.addf %266, %257 : vector<2x32xf32>
    %268 = arith.negf %267 : vector<2x32xf32>
    %269 = math.exp %268 : vector<2x32xf32>
    %cst_59 = arith.constant 1.000000e+00 : f32
    %270 = vector.broadcast %cst_59 : f32 to vector<2x32xf32>
    %271 = arith.addf %270, %269 : vector<2x32xf32>
    %272 = arith.divf %270, %271 : vector<2x32xf32>
    %273 = vector.extract_strided_slice %18 {offsets = [10, 0], sizes = [2, 32], strides = [1, 1]} : vector<16x32xf32> to vector<2x32xf32>
    %274 = arith.addf %273, %260 : vector<2x32xf32>
    %275 = arith.negf %274 : vector<2x32xf32>
    %276 = math.exp %275 : vector<2x32xf32>
    %cst_60 = arith.constant 1.000000e+00 : f32
    %277 = vector.broadcast %cst_60 : f32 to vector<2x32xf32>
    %278 = arith.addf %277, %276 : vector<2x32xf32>
    %279 = arith.divf %277, %278 : vector<2x32xf32>
    %280 = vector.extract_strided_slice %25 {offsets = [10, 0], sizes = [2, 32], strides = [1, 1]} : vector<16x32xf32> to vector<2x32xf32>
    %281 = arith.mulf %272, %265 : vector<2x32xf32>
    %282 = arith.addf %280, %281 : vector<2x32xf32>
    %283 = math.tanh %282 : vector<2x32xf32>
    %cst_61 = arith.constant 1.000000e+00 : f32
    %284 = vector.broadcast %cst_61 : f32 to vector<2x32xf32>
    %285 = arith.subf %284, %279 : vector<2x32xf32>
    %286 = arith.mulf %285, %283 : vector<2x32xf32>
    %287 = arith.mulf %279, %250 : vector<2x32xf32>
    %288 = arith.addf %286, %287 : vector<2x32xf32>
    %289 = vector.broadcast %254 : vector<2x1xf32> to vector<2x32xf32>
    %290 = arith.mulf %289, %288 : vector<2x32xf32>
    %cst_62 = arith.constant 1.000000e+00 : f32
    %291 = vector.broadcast %cst_62 : f32 to vector<2x1xf32>
    %292 = arith.subf %291, %254 : vector<2x1xf32>
    %293 = vector.broadcast %292 : vector<2x1xf32> to vector<2x32xf32>
    %294 = arith.mulf %293, %250 : vector<2x32xf32>
    %295 = arith.addf %290, %294 : vector<2x32xf32>
    %296 = vector.broadcast %254 : vector<2x1xf32> to vector<2x32xf32>
    %297 = arith.mulf %296, %295 : vector<2x32xf32>
    %c10 = arith.constant 10 : index
    %c0_63 = arith.constant 0 : index
    %298 = vector.load %arg13[%c10, %c0_63] : memref<16x32xf32, #tpu.memory_space<vmem>>, vector<2x32xf32>
    tpu.vector_store %arg13[%c10, %c0_63], %297 {strides = array<i32>} : memref<16x32xf32, #tpu.memory_space<vmem>>, vector<2x32xf32>,
    %299 = vector.extract_strided_slice %0 {offsets = [12, 0], sizes = [2, 1], strides = [1, 1]} : vector<16x1xf32> to vector<2x1xf32>
    %300 = vector.extract_strided_slice %3 {offsets = [0, 0, 0], sizes = [1, 32, 32], strides = [1, 1, 1]} : vector<3x32x32xf32> to vector<1x32x32xf32>
    %301 = vector.shape_cast %300 : vector<1x32x32xf32> to vector<32x32xf32>
    %cst_64 = arith.constant dense<0.000000e+00> : vector<2x32xf32>
    %302 = tpu.matmul %295, %301, %cst_64 {dimension_numbers = #tpu.dot_dimension_numbers<[1], [0], [0], [1], [0, 0, 1, 1], [], []>} : vector<2x32xf32>, vector<32x32xf32>, vector<2x32xf32> -> vector<2x32xf32>
    %303 = vector.extract_strided_slice %3 {offsets = [1, 0, 0], sizes = [1, 32, 32], strides = [1, 1, 1]} : vector<3x32x32xf32> to vector<1x32x32xf32>
    %304 = vector.shape_cast %303 : vector<1x32x32xf32> to vector<32x32xf32>
    %cst_65 = arith.constant dense<0.000000e+00> : vector<2x32xf32>
    %305 = tpu.matmul %295, %304, %cst_65 {dimension_numbers = #tpu.dot_dimension_numbers<[1], [0], [0], [1], [0, 0, 1, 1], [], []>} : vector<2x32xf32>, vector<32x32xf32>, vector<2x32xf32> -> vector<2x32xf32>
    %306 = vector.extract_strided_slice %3 {offsets = [2, 0, 0], sizes = [1, 32, 32], strides = [1, 1, 1]} : vector<3x32x32xf32> to vector<1x32x32xf32>
    %307 = vector.shape_cast %306 : vector<1x32x32xf32> to vector<32x32xf32>
    %cst_66 = arith.constant dense<0.000000e+00> : vector<2x32xf32>
    %308 = tpu.matmul %295, %307, %cst_66 {dimension_numbers = #tpu.dot_dimension_numbers<[1], [0], [0], [1], [0, 0, 1, 1], [], []>} : vector<2x32xf32>, vector<32x32xf32>, vector<2x32xf32> -> vector<2x32xf32>
    %309 = vector.broadcast %27 : vector<1x32xf32> to vector<2x32xf32>
    %310 = arith.addf %308, %309 : vector<2x32xf32>
    %311 = vector.extract_strided_slice %11 {offsets = [12, 0], sizes = [2, 32], strides = [1, 1]} : vector<16x32xf32> to vector<2x32xf32>
    %312 = arith.addf %311, %302 : vector<2x32xf32>
    %313 = arith.negf %312 : vector<2x32xf32>
    %314 = math.exp %313 : vector<2x32xf32>
    %cst_67 = arith.constant 1.000000e+00 : f32
    %315 = vector.broadcast %cst_67 : f32 to vector<2x32xf32>
    %316 = arith.addf %315, %314 : vector<2x32xf32>
    %317 = arith.divf %315, %316 : vector<2x32xf32>
    %318 = vector.extract_strided_slice %18 {offsets = [12, 0], sizes = [2, 32], strides = [1, 1]} : vector<16x32xf32> to vector<2x32xf32>
    %319 = arith.addf %318, %305 : vector<2x32xf32>
    %320 = arith.negf %319 : vector<2x32xf32>
    %321 = math.exp %320 : vector<2x32xf32>
    %cst_68 = arith.constant 1.000000e+00 : f32
    %322 = vector.broadcast %cst_68 : f32 to vector<2x32xf32>
    %323 = arith.addf %322, %321 : vector<2x32xf32>
    %324 = arith.divf %322, %323 : vector<2x32xf32>
    %325 = vector.extract_strided_slice %25 {offsets = [12, 0], sizes = [2, 32], strides = [1, 1]} : vector<16x32xf32> to vector<2x32xf32>
    %326 = arith.mulf %317, %310 : vector<2x32xf32>
    %327 = arith.addf %325, %326 : vector<2x32xf32>
    %328 = math.tanh %327 : vector<2x32xf32>
    %cst_69 = arith.constant 1.000000e+00 : f32
    %329 = vector.broadcast %cst_69 : f32 to vector<2x32xf32>
    %330 = arith.subf %329, %324 : vector<2x32xf32>
    %331 = arith.mulf %330, %328 : vector<2x32xf32>
    %332 = arith.mulf %324, %295 : vector<2x32xf32>
    %333 = arith.addf %331, %332 : vector<2x32xf32>
    %334 = vector.broadcast %299 : vector<2x1xf32> to vector<2x32xf32>
    %335 = arith.mulf %334, %333 : vector<2x32xf32>
    %cst_70 = arith.constant 1.000000e+00 : f32
    %336 = vector.broadcast %cst_70 : f32 to vector<2x1xf32>
    %337 = arith.subf %336, %299 : vector<2x1xf32>
    %338 = vector.broadcast %337 : vector<2x1xf32> to vector<2x32xf32>
    %339 = arith.mulf %338, %295 : vector<2x32xf32>
    %340 = arith.addf %335, %339 : vector<2x32xf32>
    %341 = vector.broadcast %299 : vector<2x1xf32> to vector<2x32xf32>
    %342 = arith.mulf %341, %340 : vector<2x32xf32>
    %c12 = arith.constant 12 : index
    %c0_71 = arith.constant 0 : index
    %343 = vector.load %arg13[%c12, %c0_71] : memref<16x32xf32, #tpu.memory_space<vmem>>, vector<2x32xf32>
    tpu.vector_store %arg13[%c12, %c0_71], %342 {strides = array<i32>} : memref<16x32xf32, #tpu.memory_space<vmem>>, vector<2x32xf32>,
    %344 = vector.extract_strided_slice %0 {offsets = [14, 0], sizes = [2, 1], strides = [1, 1]} : vector<16x1xf32> to vector<2x1xf32>
    %345 = vector.extract_strided_slice %3 {offsets = [0, 0, 0], sizes = [1, 32, 32], strides = [1, 1, 1]} : vector<3x32x32xf32> to vector<1x32x32xf32>
    %346 = vector.shape_cast %345 : vector<1x32x32xf32> to vector<32x32xf32>
    %cst_72 = arith.constant dense<0.000000e+00> : vector<2x32xf32>
    %347 = tpu.matmul %340, %346, %cst_72 {dimension_numbers = #tpu.dot_dimension_numbers<[1], [0], [0], [1], [0, 0, 1, 1], [], []>} : vector<2x32xf32>, vector<32x32xf32>, vector<2x32xf32> -> vector<2x32xf32>
    %348 = vector.extract_strided_slice %3 {offsets = [1, 0, 0], sizes = [1, 32, 32], strides = [1, 1, 1]} : vector<3x32x32xf32> to vector<1x32x32xf32>
    %349 = vector.shape_cast %348 : vector<1x32x32xf32> to vector<32x32xf32>
    %cst_73 = arith.constant dense<0.000000e+00> : vector<2x32xf32>
    %350 = tpu.matmul %340, %349, %cst_73 {dimension_numbers = #tpu.dot_dimension_numbers<[1], [0], [0], [1], [0, 0, 1, 1], [], []>} : vector<2x32xf32>, vector<32x32xf32>, vector<2x32xf32> -> vector<2x32xf32>
    %351 = vector.extract_strided_slice %3 {offsets = [2, 0, 0], sizes = [1, 32, 32], strides = [1, 1, 1]} : vector<3x32x32xf32> to vector<1x32x32xf32>
    %352 = vector.shape_cast %351 : vector<1x32x32xf32> to vector<32x32xf32>
    %cst_74 = arith.constant dense<0.000000e+00> : vector<2x32xf32>
    %353 = tpu.matmul %340, %352, %cst_74 {dimension_numbers = #tpu.dot_dimension_numbers<[1], [0], [0], [1], [0, 0, 1, 1], [], []>} : vector<2x32xf32>, vector<32x32xf32>, vector<2x32xf32> -> vector<2x32xf32>
    %354 = vector.broadcast %27 : vector<1x32xf32> to vector<2x32xf32>
    %355 = arith.addf %353, %354 : vector<2x32xf32>
    %356 = vector.extract_strided_slice %11 {offsets = [14, 0], sizes = [2, 32], strides = [1, 1]} : vector<16x32xf32> to vector<2x32xf32>
    %357 = arith.addf %356, %347 : vector<2x32xf32>
    %358 = arith.negf %357 : vector<2x32xf32>
    %359 = math.exp %358 : vector<2x32xf32>
    %cst_75 = arith.constant 1.000000e+00 : f32
    %360 = vector.broadcast %cst_75 : f32 to vector<2x32xf32>
    %361 = arith.addf %360, %359 : vector<2x32xf32>
    %362 = arith.divf %360, %361 : vector<2x32xf32>
    %363 = vector.extract_strided_slice %18 {offsets = [14, 0], sizes = [2, 32], strides = [1, 1]} : vector<16x32xf32> to vector<2x32xf32>
    %364 = arith.addf %363, %350 : vector<2x32xf32>
    %365 = arith.negf %364 : vector<2x32xf32>
    %366 = math.exp %365 : vector<2x32xf32>
    %cst_76 = arith.constant 1.000000e+00 : f32
    %367 = vector.broadcast %cst_76 : f32 to vector<2x32xf32>
    %368 = arith.addf %367, %366 : vector<2x32xf32>
    %369 = arith.divf %367, %368 : vector<2x32xf32>
    %370 = vector.extract_strided_slice %25 {offsets = [14, 0], sizes = [2, 32], strides = [1, 1]} : vector<16x32xf32> to vector<2x32xf32>
    %371 = arith.mulf %362, %355 : vector<2x32xf32>
    %372 = arith.addf %370, %371 : vector<2x32xf32>
    %373 = math.tanh %372 : vector<2x32xf32>
    %cst_77 = arith.constant 1.000000e+00 : f32
    %374 = vector.broadcast %cst_77 : f32 to vector<2x32xf32>
    %375 = arith.subf %374, %369 : vector<2x32xf32>
    %376 = arith.mulf %375, %373 : vector<2x32xf32>
    %377 = arith.mulf %369, %340 : vector<2x32xf32>
    %378 = arith.addf %376, %377 : vector<2x32xf32>
    %379 = vector.broadcast %344 : vector<2x1xf32> to vector<2x32xf32>
    %380 = arith.mulf %379, %378 : vector<2x32xf32>
    %cst_78 = arith.constant 1.000000e+00 : f32
    %381 = vector.broadcast %cst_78 : f32 to vector<2x1xf32>
    %382 = arith.subf %381, %344 : vector<2x1xf32>
    %383 = vector.broadcast %382 : vector<2x1xf32> to vector<2x32xf32>
    %384 = arith.mulf %383, %340 : vector<2x32xf32>
    %385 = arith.addf %380, %384 : vector<2x32xf32>
    %386 = vector.broadcast %344 : vector<2x1xf32> to vector<2x32xf32>
    %387 = arith.mulf %386, %385 : vector<2x32xf32>
    %c14 = arith.constant 14 : index
    %c0_79 = arith.constant 0 : index
    %388 = vector.load %arg13[%c14, %c0_79] : memref<16x32xf32, #tpu.memory_space<vmem>>, vector<2x32xf32>
    tpu.vector_store %arg13[%c14, %c0_79], %387 {strides = array<i32>} : memref<16x32xf32, #tpu.memory_space<vmem>>, vector<2x32xf32>,
    %c0_80 = arith.constant 0 : index
    %c0_81 = arith.constant 0 : index
    %389 = vector.load %arg13[%c0_80, %c0_81] : memref<16x32xf32, #tpu.memory_space<vmem>>, vector<16x32xf32>
    %c0_82 = arith.constant 0 : index
    %c0_83 = arith.constant 0 : index
    %c0_84 = arith.constant 0 : index
    %390 = vector.load %arg6[%c0_82, %c0_83, %c0_84] : memref<3x32x32xf32, #tpu.memory_space<vmem>>, vector<3x32x32xf32>
    %c0_85 = arith.constant 0 : index
    %c0_86 = arith.constant 0 : index
    %c0_87 = arith.constant 0 : index
    %391 = vector.load %arg7[%c0_85, %c0_86, %c0_87] : memref<3x32x32xf32, #tpu.memory_space<vmem>>, vector<3x32x32xf32>
    %c0_88 = arith.constant 0 : index
    %c0_89 = arith.constant 0 : index
    %c0_90 = arith.constant 0 : index
    %392 = vector.load %arg8[%c0_88, %c0_89, %c0_90] : memref<4x1x32xf32, #tpu.memory_space<vmem>>, vector<4x1x32xf32>
    %393 = vector.extract_strided_slice %390 {offsets = [0, 0, 0], sizes = [1, 32, 32], strides = [1, 1, 1]} : vector<3x32x32xf32> to vector<1x32x32xf32>
    %394 = vector.shape_cast %393 : vector<1x32x32xf32> to vector<32x32xf32>
    %cst_91 = arith.constant dense<0.000000e+00> : vector<16x32xf32>
    %395 = tpu.matmul %389, %394, %cst_91 {dimension_numbers = #tpu.dot_dimension_numbers<[1], [0], [0], [1], [0, 0, 1, 1], [], []>} : vector<16x32xf32>, vector<32x32xf32>, vector<16x32xf32> -> vector<16x32xf32>
    %396 = vector.extract_strided_slice %392 {offsets = [0, 0, 0], sizes = [1, 1, 32], strides = [1, 1, 1]} : vector<4x1x32xf32> to vector<1x1x32xf32>
    %397 = vector.shape_cast %396 : vector<1x1x32xf32> to vector<1x32xf32>
    %398 = vector.broadcast %397 : vector<1x32xf32> to vector<16x32xf32>
    %399 = arith.addf %395, %398 : vector<16x32xf32>
    %400 = vector.extract_strided_slice %390 {offsets = [1, 0, 0], sizes = [1, 32, 32], strides = [1, 1, 1]} : vector<3x32x32xf32> to vector<1x32x32xf32>
    %401 = vector.shape_cast %400 : vector<1x32x32xf32> to vector<32x32xf32>
    %cst_92 = arith.constant dense<0.000000e+00> : vector<16x32xf32>
    %402 = tpu.matmul %389, %401, %cst_92 {dimension_numbers = #tpu.dot_dimension_numbers<[1], [0], [0], [1], [0, 0, 1, 1], [], []>} : vector<16x32xf32>, vector<32x32xf32>, vector<16x32xf32> -> vector<16x32xf32>
    %403 = vector.extract_strided_slice %392 {offsets = [1, 0, 0], sizes = [1, 1, 32], strides = [1, 1, 1]} : vector<4x1x32xf32> to vector<1x1x32xf32>
    %404 = vector.shape_cast %403 : vector<1x1x32xf32> to vector<1x32xf32>
    %405 = vector.broadcast %404 : vector<1x32xf32> to vector<16x32xf32>
    %406 = arith.addf %402, %405 : vector<16x32xf32>
    %407 = vector.extract_strided_slice %390 {offsets = [2, 0, 0], sizes = [1, 32, 32], strides = [1, 1, 1]} : vector<3x32x32xf32> to vector<1x32x32xf32>
    %408 = vector.shape_cast %407 : vector<1x32x32xf32> to vector<32x32xf32>
    %cst_93 = arith.constant dense<0.000000e+00> : vector<16x32xf32>
    %409 = tpu.matmul %389, %408, %cst_93 {dimension_numbers = #tpu.dot_dimension_numbers<[1], [0], [0], [1], [0, 0, 1, 1], [], []>} : vector<16x32xf32>, vector<32x32xf32>, vector<16x32xf32> -> vector<16x32xf32>
    %410 = vector.extract_strided_slice %392 {offsets = [2, 0, 0], sizes = [1, 1, 32], strides = [1, 1, 1]} : vector<4x1x32xf32> to vector<1x1x32xf32>
    %411 = vector.shape_cast %410 : vector<1x1x32xf32> to vector<1x32xf32>
    %412 = vector.broadcast %411 : vector<1x32xf32> to vector<16x32xf32>
    %413 = arith.addf %409, %412 : vector<16x32xf32>
    %414 = vector.extract_strided_slice %392 {offsets = [3, 0, 0], sizes = [1, 1, 32], strides = [1, 1, 1]} : vector<4x1x32xf32> to vector<1x1x32xf32>
    %415 = vector.shape_cast %414 : vector<1x1x32xf32> to vector<1x32xf32>
    %cst_94 = arith.constant 0.000000e+00 : f32
    %416 = vector.broadcast %cst_94 : f32 to vector<2x32xf32>
    %417 = vector.extract_strided_slice %0 {offsets = [0, 0], sizes = [2, 1], strides = [1, 1]} : vector<16x1xf32> to vector<2x1xf32>
    %418 = vector.extract_strided_slice %391 {offsets = [0, 0, 0], sizes = [1, 32, 32], strides = [1, 1, 1]} : vector<3x32x32xf32> to vector<1x32x32xf32>
    %419 = vector.shape_cast %418 : vector<1x32x32xf32> to vector<32x32xf32>
    %cst_95 = arith.constant dense<0.000000e+00> : vector<2x32xf32>
    %420 = tpu.matmul %416, %419, %cst_95 {dimension_numbers = #tpu.dot_dimension_numbers<[1], [0], [0], [1], [0, 0, 1, 1], [], []>} : vector<2x32xf32>, vector<32x32xf32>, vector<2x32xf32> -> vector<2x32xf32>
    %421 = vector.extract_strided_slice %391 {offsets = [1, 0, 0], sizes = [1, 32, 32], strides = [1, 1, 1]} : vector<3x32x32xf32> to vector<1x32x32xf32>
    %422 = vector.shape_cast %421 : vector<1x32x32xf32> to vector<32x32xf32>
    %cst_96 = arith.constant dense<0.000000e+00> : vector<2x32xf32>
    %423 = tpu.matmul %416, %422, %cst_96 {dimension_numbers = #tpu.dot_dimension_numbers<[1], [0], [0], [1], [0, 0, 1, 1], [], []>} : vector<2x32xf32>, vector<32x32xf32>, vector<2x32xf32> -> vector<2x32xf32>
    %424 = vector.extract_strided_slice %391 {offsets = [2, 0, 0], sizes = [1, 32, 32], strides = [1, 1, 1]} : vector<3x32x32xf32> to vector<1x32x32xf32>
    %425 = vector.shape_cast %424 : vector<1x32x32xf32> to vector<32x32xf32>
    %cst_97 = arith.constant dense<0.000000e+00> : vector<2x32xf32>
    %426 = tpu.matmul %416, %425, %cst_97 {dimension_numbers = #tpu.dot_dimension_numbers<[1], [0], [0], [1], [0, 0, 1, 1], [], []>} : vector<2x32xf32>, vector<32x32xf32>, vector<2x32xf32> -> vector<2x32xf32>
    %427 = vector.broadcast %415 : vector<1x32xf32> to vector<2x32xf32>
    %428 = arith.addf %426, %427 : vector<2x32xf32>
    %429 = vector.extract_strided_slice %399 {offsets = [0, 0], sizes = [2, 32], strides = [1, 1]} : vector<16x32xf32> to vector<2x32xf32>
    %430 = arith.addf %429, %420 : vector<2x32xf32>
    %431 = arith.negf %430 : vector<2x32xf32>
    %432 = math.exp %431 : vector<2x32xf32>
    %cst_98 = arith.constant 1.000000e+00 : f32
    %433 = vector.broadcast %cst_98 : f32 to vector<2x32xf32>
    %434 = arith.addf %433, %432 : vector<2x32xf32>
    %435 = arith.divf %433, %434 : vector<2x32xf32>
    %436 = vector.extract_strided_slice %406 {offsets = [0, 0], sizes = [2, 32], strides = [1, 1]} : vector<16x32xf32> to vector<2x32xf32>
    %437 = arith.addf %436, %423 : vector<2x32xf32>
    %438 = arith.negf %437 : vector<2x32xf32>
    %439 = math.exp %438 : vector<2x32xf32>
    %cst_99 = arith.constant 1.000000e+00 : f32
    %440 = vector.broadcast %cst_99 : f32 to vector<2x32xf32>
    %441 = arith.addf %440, %439 : vector<2x32xf32>
    %442 = arith.divf %440, %441 : vector<2x32xf32>
    %443 = vector.extract_strided_slice %413 {offsets = [0, 0], sizes = [2, 32], strides = [1, 1]} : vector<16x32xf32> to vector<2x32xf32>
    %444 = arith.mulf %435, %428 : vector<2x32xf32>
    %445 = arith.addf %443, %444 : vector<2x32xf32>
    %446 = math.tanh %445 : vector<2x32xf32>
    %cst_100 = arith.constant 1.000000e+00 : f32
    %447 = vector.broadcast %cst_100 : f32 to vector<2x32xf32>
    %448 = arith.subf %447, %442 : vector<2x32xf32>
    %449 = arith.mulf %448, %446 : vector<2x32xf32>
    %450 = arith.mulf %442, %416 : vector<2x32xf32>
    %451 = arith.addf %449, %450 : vector<2x32xf32>
    %452 = vector.broadcast %417 : vector<2x1xf32> to vector<2x32xf32>
    %453 = arith.mulf %452, %451 : vector<2x32xf32>
    %cst_101 = arith.constant 1.000000e+00 : f32
    %454 = vector.broadcast %cst_101 : f32 to vector<2x1xf32>
    %455 = arith.subf %454, %417 : vector<2x1xf32>
    %456 = vector.broadcast %455 : vector<2x1xf32> to vector<2x32xf32>
    %457 = arith.mulf %456, %416 : vector<2x32xf32>
    %458 = arith.addf %453, %457 : vector<2x32xf32>
    %459 = vector.broadcast %417 : vector<2x1xf32> to vector<2x32xf32>
    %460 = arith.mulf %459, %458 : vector<2x32xf32>
    %c0_102 = arith.constant 0 : index
    %c0_103 = arith.constant 0 : index
    %461 = vector.load %arg13[%c0_102, %c0_103] : memref<16x32xf32, #tpu.memory_space<vmem>>, vector<2x32xf32>
    tpu.vector_store %arg13[%c0_102, %c0_103], %460 {strides = array<i32>} : memref<16x32xf32, #tpu.memory_space<vmem>>, vector<2x32xf32>,
    %462 = vector.extract_strided_slice %0 {offsets = [2, 0], sizes = [2, 1], strides = [1, 1]} : vector<16x1xf32> to vector<2x1xf32>
    %463 = vector.extract_strided_slice %391 {offsets = [0, 0, 0], sizes = [1, 32, 32], strides = [1, 1, 1]} : vector<3x32x32xf32> to vector<1x32x32xf32>
    %464 = vector.shape_cast %463 : vector<1x32x32xf32> to vector<32x32xf32>
    %cst_104 = arith.constant dense<0.000000e+00> : vector<2x32xf32>
    %465 = tpu.matmul %458, %464, %cst_104 {dimension_numbers = #tpu.dot_dimension_numbers<[1], [0], [0], [1], [0, 0, 1, 1], [], []>} : vector<2x32xf32>, vector<32x32xf32>, vector<2x32xf32> -> vector<2x32xf32>
    %466 = vector.extract_strided_slice %391 {offsets = [1, 0, 0], sizes = [1, 32, 32], strides = [1, 1, 1]} : vector<3x32x32xf32> to vector<1x32x32xf32>
    %467 = vector.shape_cast %466 : vector<1x32x32xf32> to vector<32x32xf32>
    %cst_105 = arith.constant dense<0.000000e+00> : vector<2x32xf32>
    %468 = tpu.matmul %458, %467, %cst_105 {dimension_numbers = #tpu.dot_dimension_numbers<[1], [0], [0], [1], [0, 0, 1, 1], [], []>} : vector<2x32xf32>, vector<32x32xf32>, vector<2x32xf32> -> vector<2x32xf32>
    %469 = vector.extract_strided_slice %391 {offsets = [2, 0, 0], sizes = [1, 32, 32], strides = [1, 1, 1]} : vector<3x32x32xf32> to vector<1x32x32xf32>
    %470 = vector.shape_cast %469 : vector<1x32x32xf32> to vector<32x32xf32>
    %cst_106 = arith.constant dense<0.000000e+00> : vector<2x32xf32>
    %471 = tpu.matmul %458, %470, %cst_106 {dimension_numbers = #tpu.dot_dimension_numbers<[1], [0], [0], [1], [0, 0, 1, 1], [], []>} : vector<2x32xf32>, vector<32x32xf32>, vector<2x32xf32> -> vector<2x32xf32>
    %472 = vector.broadcast %415 : vector<1x32xf32> to vector<2x32xf32>
    %473 = arith.addf %471, %472 : vector<2x32xf32>
    %474 = vector.extract_strided_slice %399 {offsets = [2, 0], sizes = [2, 32], strides = [1, 1]} : vector<16x32xf32> to vector<2x32xf32>
    %475 = arith.addf %474, %465 : vector<2x32xf32>
    %476 = arith.negf %475 : vector<2x32xf32>
    %477 = math.exp %476 : vector<2x32xf32>
    %cst_107 = arith.constant 1.000000e+00 : f32
    %478 = vector.broadcast %cst_107 : f32 to vector<2x32xf32>
    %479 = arith.addf %478, %477 : vector<2x32xf32>
    %480 = arith.divf %478, %479 : vector<2x32xf32>
    %481 = vector.extract_strided_slice %406 {offsets = [2, 0], sizes = [2, 32], strides = [1, 1]} : vector<16x32xf32> to vector<2x32xf32>
    %482 = arith.addf %481, %468 : vector<2x32xf32>
    %483 = arith.negf %482 : vector<2x32xf32>
    %484 = math.exp %483 : vector<2x32xf32>
    %cst_108 = arith.constant 1.000000e+00 : f32
    %485 = vector.broadcast %cst_108 : f32 to vector<2x32xf32>
    %486 = arith.addf %485, %484 : vector<2x32xf32>
    %487 = arith.divf %485, %486 : vector<2x32xf32>
    %488 = vector.extract_strided_slice %413 {offsets = [2, 0], sizes = [2, 32], strides = [1, 1]} : vector<16x32xf32> to vector<2x32xf32>
    %489 = arith.mulf %480, %473 : vector<2x32xf32>
    %490 = arith.addf %488, %489 : vector<2x32xf32>
    %491 = math.tanh %490 : vector<2x32xf32>
    %cst_109 = arith.constant 1.000000e+00 : f32
    %492 = vector.broadcast %cst_109 : f32 to vector<2x32xf32>
    %493 = arith.subf %492, %487 : vector<2x32xf32>
    %494 = arith.mulf %493, %491 : vector<2x32xf32>
    %495 = arith.mulf %487, %458 : vector<2x32xf32>
    %496 = arith.addf %494, %495 : vector<2x32xf32>
    %497 = vector.broadcast %462 : vector<2x1xf32> to vector<2x32xf32>
    %498 = arith.mulf %497, %496 : vector<2x32xf32>
    %cst_110 = arith.constant 1.000000e+00 : f32
    %499 = vector.broadcast %cst_110 : f32 to vector<2x1xf32>
    %500 = arith.subf %499, %462 : vector<2x1xf32>
    %501 = vector.broadcast %500 : vector<2x1xf32> to vector<2x32xf32>
    %502 = arith.mulf %501, %458 : vector<2x32xf32>
    %503 = arith.addf %498, %502 : vector<2x32xf32>
    %504 = vector.broadcast %462 : vector<2x1xf32> to vector<2x32xf32>
    %505 = arith.mulf %504, %503 : vector<2x32xf32>
    %c2_111 = arith.constant 2 : index
    %c0_112 = arith.constant 0 : index
    %506 = vector.load %arg13[%c2_111, %c0_112] : memref<16x32xf32, #tpu.memory_space<vmem>>, vector<2x32xf32>
    tpu.vector_store %arg13[%c2_111, %c0_112], %505 {strides = array<i32>} : memref<16x32xf32, #tpu.memory_space<vmem>>, vector<2x32xf32>,
    %507 = vector.extract_strided_slice %0 {offsets = [4, 0], sizes = [2, 1], strides = [1, 1]} : vector<16x1xf32> to vector<2x1xf32>
    %508 = vector.extract_strided_slice %391 {offsets = [0, 0, 0], sizes = [1, 32, 32], strides = [1, 1, 1]} : vector<3x32x32xf32> to vector<1x32x32xf32>
    %509 = vector.shape_cast %508 : vector<1x32x32xf32> to vector<32x32xf32>
    %cst_113 = arith.constant dense<0.000000e+00> : vector<2x32xf32>
    %510 = tpu.matmul %503, %509, %cst_113 {dimension_numbers = #tpu.dot_dimension_numbers<[1], [0], [0], [1], [0, 0, 1, 1], [], []>} : vector<2x32xf32>, vector<32x32xf32>, vector<2x32xf32> -> vector<2x32xf32>
    %511 = vector.extract_strided_slice %391 {offsets = [1, 0, 0], sizes = [1, 32, 32], strides = [1, 1, 1]} : vector<3x32x32xf32> to vector<1x32x32xf32>
    %512 = vector.shape_cast %511 : vector<1x32x32xf32> to vector<32x32xf32>
    %cst_114 = arith.constant dense<0.000000e+00> : vector<2x32xf32>
    %513 = tpu.matmul %503, %512, %cst_114 {dimension_numbers = #tpu.dot_dimension_numbers<[1], [0], [0], [1], [0, 0, 1, 1], [], []>} : vector<2x32xf32>, vector<32x32xf32>, vector<2x32xf32> -> vector<2x32xf32>
    %514 = vector.extract_strided_slice %391 {offsets = [2, 0, 0], sizes = [1, 32, 32], strides = [1, 1, 1]} : vector<3x32x32xf32> to vector<1x32x32xf32>
    %515 = vector.shape_cast %514 : vector<1x32x32xf32> to vector<32x32xf32>
    %cst_115 = arith.constant dense<0.000000e+00> : vector<2x32xf32>
    %516 = tpu.matmul %503, %515, %cst_115 {dimension_numbers = #tpu.dot_dimension_numbers<[1], [0], [0], [1], [0, 0, 1, 1], [], []>} : vector<2x32xf32>, vector<32x32xf32>, vector<2x32xf32> -> vector<2x32xf32>
    %517 = vector.broadcast %415 : vector<1x32xf32> to vector<2x32xf32>
    %518 = arith.addf %516, %517 : vector<2x32xf32>
    %519 = vector.extract_strided_slice %399 {offsets = [4, 0], sizes = [2, 32], strides = [1, 1]} : vector<16x32xf32> to vector<2x32xf32>
    %520 = arith.addf %519, %510 : vector<2x32xf32>
    %521 = arith.negf %520 : vector<2x32xf32>
    %522 = math.exp %521 : vector<2x32xf32>
    %cst_116 = arith.constant 1.000000e+00 : f32
    %523 = vector.broadcast %cst_116 : f32 to vector<2x32xf32>
    %524 = arith.addf %523, %522 : vector<2x32xf32>
    %525 = arith.divf %523, %524 : vector<2x32xf32>
    %526 = vector.extract_strided_slice %406 {offsets = [4, 0], sizes = [2, 32], strides = [1, 1]} : vector<16x32xf32> to vector<2x32xf32>
    %527 = arith.addf %526, %513 : vector<2x32xf32>
    %528 = arith.negf %527 : vector<2x32xf32>
    %529 = math.exp %528 : vector<2x32xf32>
    %cst_117 = arith.constant 1.000000e+00 : f32
    %530 = vector.broadcast %cst_117 : f32 to vector<2x32xf32>
    %531 = arith.addf %530, %529 : vector<2x32xf32>
    %532 = arith.divf %530, %531 : vector<2x32xf32>
    %533 = vector.extract_strided_slice %413 {offsets = [4, 0], sizes = [2, 32], strides = [1, 1]} : vector<16x32xf32> to vector<2x32xf32>
    %534 = arith.mulf %525, %518 : vector<2x32xf32>
    %535 = arith.addf %533, %534 : vector<2x32xf32>
    %536 = math.tanh %535 : vector<2x32xf32>
    %cst_118 = arith.constant 1.000000e+00 : f32
    %537 = vector.broadcast %cst_118 : f32 to vector<2x32xf32>
    %538 = arith.subf %537, %532 : vector<2x32xf32>
    %539 = arith.mulf %538, %536 : vector<2x32xf32>
    %540 = arith.mulf %532, %503 : vector<2x32xf32>
    %541 = arith.addf %539, %540 : vector<2x32xf32>
    %542 = vector.broadcast %507 : vector<2x1xf32> to vector<2x32xf32>
    %543 = arith.mulf %542, %541 : vector<2x32xf32>
    %cst_119 = arith.constant 1.000000e+00 : f32
    %544 = vector.broadcast %cst_119 : f32 to vector<2x1xf32>
    %545 = arith.subf %544, %507 : vector<2x1xf32>
    %546 = vector.broadcast %545 : vector<2x1xf32> to vector<2x32xf32>
    %547 = arith.mulf %546, %503 : vector<2x32xf32>
    %548 = arith.addf %543, %547 : vector<2x32xf32>
    %549 = vector.broadcast %507 : vector<2x1xf32> to vector<2x32xf32>
    %550 = arith.mulf %549, %548 : vector<2x32xf32>
    %c4_120 = arith.constant 4 : index
    %c0_121 = arith.constant 0 : index
    %551 = vector.load %arg13[%c4_120, %c0_121] : memref<16x32xf32, #tpu.memory_space<vmem>>, vector<2x32xf32>
    tpu.vector_store %arg13[%c4_120, %c0_121], %550 {strides = array<i32>} : memref<16x32xf32, #tpu.memory_space<vmem>>, vector<2x32xf32>,
    %552 = vector.extract_strided_slice %0 {offsets = [6, 0], sizes = [2, 1], strides = [1, 1]} : vector<16x1xf32> to vector<2x1xf32>
    %553 = vector.extract_strided_slice %391 {offsets = [0, 0, 0], sizes = [1, 32, 32], strides = [1, 1, 1]} : vector<3x32x32xf32> to vector<1x32x32xf32>
    %554 = vector.shape_cast %553 : vector<1x32x32xf32> to vector<32x32xf32>
    %cst_122 = arith.constant dense<0.000000e+00> : vector<2x32xf32>
    %555 = tpu.matmul %548, %554, %cst_122 {dimension_numbers = #tpu.dot_dimension_numbers<[1], [0], [0], [1], [0, 0, 1, 1], [], []>} : vector<2x32xf32>, vector<32x32xf32>, vector<2x32xf32> -> vector<2x32xf32>
    %556 = vector.extract_strided_slice %391 {offsets = [1, 0, 0], sizes = [1, 32, 32], strides = [1, 1, 1]} : vector<3x32x32xf32> to vector<1x32x32xf32>
    %557 = vector.shape_cast %556 : vector<1x32x32xf32> to vector<32x32xf32>
    %cst_123 = arith.constant dense<0.000000e+00> : vector<2x32xf32>
    %558 = tpu.matmul %548, %557, %cst_123 {dimension_numbers = #tpu.dot_dimension_numbers<[1], [0], [0], [1], [0, 0, 1, 1], [], []>} : vector<2x32xf32>, vector<32x32xf32>, vector<2x32xf32> -> vector<2x32xf32>
    %559 = vector.extract_strided_slice %391 {offsets = [2, 0, 0], sizes = [1, 32, 32], strides = [1, 1, 1]} : vector<3x32x32xf32> to vector<1x32x32xf32>
    %560 = vector.shape_cast %559 : vector<1x32x32xf32> to vector<32x32xf32>
    %cst_124 = arith.constant dense<0.000000e+00> : vector<2x32xf32>
    %561 = tpu.matmul %548, %560, %cst_124 {dimension_numbers = #tpu.dot_dimension_numbers<[1], [0], [0], [1], [0, 0, 1, 1], [], []>} : vector<2x32xf32>, vector<32x32xf32>, vector<2x32xf32> -> vector<2x32xf32>
    %562 = vector.broadcast %415 : vector<1x32xf32> to vector<2x32xf32>
    %563 = arith.addf %561, %562 : vector<2x32xf32>
    %564 = vector.extract_strided_slice %399 {offsets = [6, 0], sizes = [2, 32], strides = [1, 1]} : vector<16x32xf32> to vector<2x32xf32>
    %565 = arith.addf %564, %555 : vector<2x32xf32>
    %566 = arith.negf %565 : vector<2x32xf32>
    %567 = math.exp %566 : vector<2x32xf32>
    %cst_125 = arith.constant 1.000000e+00 : f32
    %568 = vector.broadcast %cst_125 : f32 to vector<2x32xf32>
    %569 = arith.addf %568, %567 : vector<2x32xf32>
    %570 = arith.divf %568, %569 : vector<2x32xf32>
    %571 = vector.extract_strided_slice %406 {offsets = [6, 0], sizes = [2, 32], strides = [1, 1]} : vector<16x32xf32> to vector<2x32xf32>
    %572 = arith.addf %571, %558 : vector<2x32xf32>
    %573 = arith.negf %572 : vector<2x32xf32>
    %574 = math.exp %573 : vector<2x32xf32>
    %cst_126 = arith.constant 1.000000e+00 : f32
    %575 = vector.broadcast %cst_126 : f32 to vector<2x32xf32>
    %576 = arith.addf %575, %574 : vector<2x32xf32>
    %577 = arith.divf %575, %576 : vector<2x32xf32>
    %578 = vector.extract_strided_slice %413 {offsets = [6, 0], sizes = [2, 32], strides = [1, 1]} : vector<16x32xf32> to vector<2x32xf32>
    %579 = arith.mulf %570, %563 : vector<2x32xf32>
    %580 = arith.addf %578, %579 : vector<2x32xf32>
    %581 = math.tanh %580 : vector<2x32xf32>
    %cst_127 = arith.constant 1.000000e+00 : f32
    %582 = vector.broadcast %cst_127 : f32 to vector<2x32xf32>
    %583 = arith.subf %582, %577 : vector<2x32xf32>
    %584 = arith.mulf %583, %581 : vector<2x32xf32>
    %585 = arith.mulf %577, %548 : vector<2x32xf32>
    %586 = arith.addf %584, %585 : vector<2x32xf32>
    %587 = vector.broadcast %552 : vector<2x1xf32> to vector<2x32xf32>
    %588 = arith.mulf %587, %586 : vector<2x32xf32>
    %cst_128 = arith.constant 1.000000e+00 : f32
    %589 = vector.broadcast %cst_128 : f32 to vector<2x1xf32>
    %590 = arith.subf %589, %552 : vector<2x1xf32>
    %591 = vector.broadcast %590 : vector<2x1xf32> to vector<2x32xf32>
    %592 = arith.mulf %591, %548 : vector<2x32xf32>
    %593 = arith.addf %588, %592 : vector<2x32xf32>
    %594 = vector.broadcast %552 : vector<2x1xf32> to vector<2x32xf32>
    %595 = arith.mulf %594, %593 : vector<2x32xf32>
    %c6_129 = arith.constant 6 : index
    %c0_130 = arith.constant 0 : index
    %596 = vector.load %arg13[%c6_129, %c0_130] : memref<16x32xf32, #tpu.memory_space<vmem>>, vector<2x32xf32>
    tpu.vector_store %arg13[%c6_129, %c0_130], %595 {strides = array<i32>} : memref<16x32xf32, #tpu.memory_space<vmem>>, vector<2x32xf32>,
    %597 = vector.extract_strided_slice %0 {offsets = [8, 0], sizes = [2, 1], strides = [1, 1]} : vector<16x1xf32> to vector<2x1xf32>
    %598 = vector.extract_strided_slice %391 {offsets = [0, 0, 0], sizes = [1, 32, 32], strides = [1, 1, 1]} : vector<3x32x32xf32> to vector<1x32x32xf32>
    %599 = vector.shape_cast %598 : vector<1x32x32xf32> to vector<32x32xf32>
    %cst_131 = arith.constant dense<0.000000e+00> : vector<2x32xf32>
    %600 = tpu.matmul %593, %599, %cst_131 {dimension_numbers = #tpu.dot_dimension_numbers<[1], [0], [0], [1], [0, 0, 1, 1], [], []>} : vector<2x32xf32>, vector<32x32xf32>, vector<2x32xf32> -> vector<2x32xf32>
    %601 = vector.extract_strided_slice %391 {offsets = [1, 0, 0], sizes = [1, 32, 32], strides = [1, 1, 1]} : vector<3x32x32xf32> to vector<1x32x32xf32>
    %602 = vector.shape_cast %601 : vector<1x32x32xf32> to vector<32x32xf32>
    %cst_132 = arith.constant dense<0.000000e+00> : vector<2x32xf32>
    %603 = tpu.matmul %593, %602, %cst_132 {dimension_numbers = #tpu.dot_dimension_numbers<[1], [0], [0], [1], [0, 0, 1, 1], [], []>} : vector<2x32xf32>, vector<32x32xf32>, vector<2x32xf32> -> vector<2x32xf32>
    %604 = vector.extract_strided_slice %391 {offsets = [2, 0, 0], sizes = [1, 32, 32], strides = [1, 1, 1]} : vector<3x32x32xf32> to vector<1x32x32xf32>
    %605 = vector.shape_cast %604 : vector<1x32x32xf32> to vector<32x32xf32>
    %cst_133 = arith.constant dense<0.000000e+00> : vector<2x32xf32>
    %606 = tpu.matmul %593, %605, %cst_133 {dimension_numbers = #tpu.dot_dimension_numbers<[1], [0], [0], [1], [0, 0, 1, 1], [], []>} : vector<2x32xf32>, vector<32x32xf32>, vector<2x32xf32> -> vector<2x32xf32>
    %607 = vector.broadcast %415 : vector<1x32xf32> to vector<2x32xf32>
    %608 = arith.addf %606, %607 : vector<2x32xf32>
    %609 = vector.extract_strided_slice %399 {offsets = [8, 0], sizes = [2, 32], strides = [1, 1]} : vector<16x32xf32> to vector<2x32xf32>
    %610 = arith.addf %609, %600 : vector<2x32xf32>
    %611 = arith.negf %610 : vector<2x32xf32>
    %612 = math.exp %611 : vector<2x32xf32>
    %cst_134 = arith.constant 1.000000e+00 : f32
    %613 = vector.broadcast %cst_134 : f32 to vector<2x32xf32>
    %614 = arith.addf %613, %612 : vector<2x32xf32>
    %615 = arith.divf %613, %614 : vector<2x32xf32>
    %616 = vector.extract_strided_slice %406 {offsets = [8, 0], sizes = [2, 32], strides = [1, 1]} : vector<16x32xf32> to vector<2x32xf32>
    %617 = arith.addf %616, %603 : vector<2x32xf32>
    %618 = arith.negf %617 : vector<2x32xf32>
    %619 = math.exp %618 : vector<2x32xf32>
    %cst_135 = arith.constant 1.000000e+00 : f32
    %620 = vector.broadcast %cst_135 : f32 to vector<2x32xf32>
    %621 = arith.addf %620, %619 : vector<2x32xf32>
    %622 = arith.divf %620, %621 : vector<2x32xf32>
    %623 = vector.extract_strided_slice %413 {offsets = [8, 0], sizes = [2, 32], strides = [1, 1]} : vector<16x32xf32> to vector<2x32xf32>
    %624 = arith.mulf %615, %608 : vector<2x32xf32>
    %625 = arith.addf %623, %624 : vector<2x32xf32>
    %626 = math.tanh %625 : vector<2x32xf32>
    %cst_136 = arith.constant 1.000000e+00 : f32
    %627 = vector.broadcast %cst_136 : f32 to vector<2x32xf32>
    %628 = arith.subf %627, %622 : vector<2x32xf32>
    %629 = arith.mulf %628, %626 : vector<2x32xf32>
    %630 = arith.mulf %622, %593 : vector<2x32xf32>
    %631 = arith.addf %629, %630 : vector<2x32xf32>
    %632 = vector.broadcast %597 : vector<2x1xf32> to vector<2x32xf32>
    %633 = arith.mulf %632, %631 : vector<2x32xf32>
    %cst_137 = arith.constant 1.000000e+00 : f32
    %634 = vector.broadcast %cst_137 : f32 to vector<2x1xf32>
    %635 = arith.subf %634, %597 : vector<2x1xf32>
    %636 = vector.broadcast %635 : vector<2x1xf32> to vector<2x32xf32>
    %637 = arith.mulf %636, %593 : vector<2x32xf32>
    %638 = arith.addf %633, %637 : vector<2x32xf32>
    %639 = vector.broadcast %597 : vector<2x1xf32> to vector<2x32xf32>
    %640 = arith.mulf %639, %638 : vector<2x32xf32>
    %c8_138 = arith.constant 8 : index
    %c0_139 = arith.constant 0 : index
    %641 = vector.load %arg13[%c8_138, %c0_139] : memref<16x32xf32, #tpu.memory_space<vmem>>, vector<2x32xf32>
    tpu.vector_store %arg13[%c8_138, %c0_139], %640 {strides = array<i32>} : memref<16x32xf32, #tpu.memory_space<vmem>>, vector<2x32xf32>,
    %642 = vector.extract_strided_slice %0 {offsets = [10, 0], sizes = [2, 1], strides = [1, 1]} : vector<16x1xf32> to vector<2x1xf32>
    %643 = vector.extract_strided_slice %391 {offsets = [0, 0, 0], sizes = [1, 32, 32], strides = [1, 1, 1]} : vector<3x32x32xf32> to vector<1x32x32xf32>
    %644 = vector.shape_cast %643 : vector<1x32x32xf32> to vector<32x32xf32>
    %cst_140 = arith.constant dense<0.000000e+00> : vector<2x32xf32>
    %645 = tpu.matmul %638, %644, %cst_140 {dimension_numbers = #tpu.dot_dimension_numbers<[1], [0], [0], [1], [0, 0, 1, 1], [], []>} : vector<2x32xf32>, vector<32x32xf32>, vector<2x32xf32> -> vector<2x32xf32>
    %646 = vector.extract_strided_slice %391 {offsets = [1, 0, 0], sizes = [1, 32, 32], strides = [1, 1, 1]} : vector<3x32x32xf32> to vector<1x32x32xf32>
    %647 = vector.shape_cast %646 : vector<1x32x32xf32> to vector<32x32xf32>
    %cst_141 = arith.constant dense<0.000000e+00> : vector<2x32xf32>
    %648 = tpu.matmul %638, %647, %cst_141 {dimension_numbers = #tpu.dot_dimension_numbers<[1], [0], [0], [1], [0, 0, 1, 1], [], []>} : vector<2x32xf32>, vector<32x32xf32>, vector<2x32xf32> -> vector<2x32xf32>
    %649 = vector.extract_strided_slice %391 {offsets = [2, 0, 0], sizes = [1, 32, 32], strides = [1, 1, 1]} : vector<3x32x32xf32> to vector<1x32x32xf32>
    %650 = vector.shape_cast %649 : vector<1x32x32xf32> to vector<32x32xf32>
    %cst_142 = arith.constant dense<0.000000e+00> : vector<2x32xf32>
    %651 = tpu.matmul %638, %650, %cst_142 {dimension_numbers = #tpu.dot_dimension_numbers<[1], [0], [0], [1], [0, 0, 1, 1], [], []>} : vector<2x32xf32>, vector<32x32xf32>, vector<2x32xf32> -> vector<2x32xf32>
    %652 = vector.broadcast %415 : vector<1x32xf32> to vector<2x32xf32>
    %653 = arith.addf %651, %652 : vector<2x32xf32>
    %654 = vector.extract_strided_slice %399 {offsets = [10, 0], sizes = [2, 32], strides = [1, 1]} : vector<16x32xf32> to vector<2x32xf32>
    %655 = arith.addf %654, %645 : vector<2x32xf32>
    %656 = arith.negf %655 : vector<2x32xf32>
    %657 = math.exp %656 : vector<2x32xf32>
    %cst_143 = arith.constant 1.000000e+00 : f32
    %658 = vector.broadcast %cst_143 : f32 to vector<2x32xf32>
    %659 = arith.addf %658, %657 : vector<2x32xf32>
    %660 = arith.divf %658, %659 : vector<2x32xf32>
    %661 = vector.extract_strided_slice %406 {offsets = [10, 0], sizes = [2, 32], strides = [1, 1]} : vector<16x32xf32> to vector<2x32xf32>
    %662 = arith.addf %661, %648 : vector<2x32xf32>
    %663 = arith.negf %662 : vector<2x32xf32>
    %664 = math.exp %663 : vector<2x32xf32>
    %cst_144 = arith.constant 1.000000e+00 : f32
    %665 = vector.broadcast %cst_144 : f32 to vector<2x32xf32>
    %666 = arith.addf %665, %664 : vector<2x32xf32>
    %667 = arith.divf %665, %666 : vector<2x32xf32>
    %668 = vector.extract_strided_slice %413 {offsets = [10, 0], sizes = [2, 32], strides = [1, 1]} : vector<16x32xf32> to vector<2x32xf32>
    %669 = arith.mulf %660, %653 : vector<2x32xf32>
    %670 = arith.addf %668, %669 : vector<2x32xf32>
    %671 = math.tanh %670 : vector<2x32xf32>
    %cst_145 = arith.constant 1.000000e+00 : f32
    %672 = vector.broadcast %cst_145 : f32 to vector<2x32xf32>
    %673 = arith.subf %672, %667 : vector<2x32xf32>
    %674 = arith.mulf %673, %671 : vector<2x32xf32>
    %675 = arith.mulf %667, %638 : vector<2x32xf32>
    %676 = arith.addf %674, %675 : vector<2x32xf32>
    %677 = vector.broadcast %642 : vector<2x1xf32> to vector<2x32xf32>
    %678 = arith.mulf %677, %676 : vector<2x32xf32>
    %cst_146 = arith.constant 1.000000e+00 : f32
    %679 = vector.broadcast %cst_146 : f32 to vector<2x1xf32>
    %680 = arith.subf %679, %642 : vector<2x1xf32>
    %681 = vector.broadcast %680 : vector<2x1xf32> to vector<2x32xf32>
    %682 = arith.mulf %681, %638 : vector<2x32xf32>
    %683 = arith.addf %678, %682 : vector<2x32xf32>
    %684 = vector.broadcast %642 : vector<2x1xf32> to vector<2x32xf32>
    %685 = arith.mulf %684, %683 : vector<2x32xf32>
    %c10_147 = arith.constant 10 : index
    %c0_148 = arith.constant 0 : index
    %686 = vector.load %arg13[%c10_147, %c0_148] : memref<16x32xf32, #tpu.memory_space<vmem>>, vector<2x32xf32>
    tpu.vector_store %arg13[%c10_147, %c0_148], %685 {strides = array<i32>} : memref<16x32xf32, #tpu.memory_space<vmem>>, vector<2x32xf32>,
    %687 = vector.extract_strided_slice %0 {offsets = [12, 0], sizes = [2, 1], strides = [1, 1]} : vector<16x1xf32> to vector<2x1xf32>
    %688 = vector.extract_strided_slice %391 {offsets = [0, 0, 0], sizes = [1, 32, 32], strides = [1, 1, 1]} : vector<3x32x32xf32> to vector<1x32x32xf32>
    %689 = vector.shape_cast %688 : vector<1x32x32xf32> to vector<32x32xf32>
    %cst_149 = arith.constant dense<0.000000e+00> : vector<2x32xf32>
    %690 = tpu.matmul %683, %689, %cst_149 {dimension_numbers = #tpu.dot_dimension_numbers<[1], [0], [0], [1], [0, 0, 1, 1], [], []>} : vector<2x32xf32>, vector<32x32xf32>, vector<2x32xf32> -> vector<2x32xf32>
    %691 = vector.extract_strided_slice %391 {offsets = [1, 0, 0], sizes = [1, 32, 32], strides = [1, 1, 1]} : vector<3x32x32xf32> to vector<1x32x32xf32>
    %692 = vector.shape_cast %691 : vector<1x32x32xf32> to vector<32x32xf32>
    %cst_150 = arith.constant dense<0.000000e+00> : vector<2x32xf32>
    %693 = tpu.matmul %683, %692, %cst_150 {dimension_numbers = #tpu.dot_dimension_numbers<[1], [0], [0], [1], [0, 0, 1, 1], [], []>} : vector<2x32xf32>, vector<32x32xf32>, vector<2x32xf32> -> vector<2x32xf32>
    %694 = vector.extract_strided_slice %391 {offsets = [2, 0, 0], sizes = [1, 32, 32], strides = [1, 1, 1]} : vector<3x32x32xf32> to vector<1x32x32xf32>
    %695 = vector.shape_cast %694 : vector<1x32x32xf32> to vector<32x32xf32>
    %cst_151 = arith.constant dense<0.000000e+00> : vector<2x32xf32>
    %696 = tpu.matmul %683, %695, %cst_151 {dimension_numbers = #tpu.dot_dimension_numbers<[1], [0], [0], [1], [0, 0, 1, 1], [], []>} : vector<2x32xf32>, vector<32x32xf32>, vector<2x32xf32> -> vector<2x32xf32>
    %697 = vector.broadcast %415 : vector<1x32xf32> to vector<2x32xf32>
    %698 = arith.addf %696, %697 : vector<2x32xf32>
    %699 = vector.extract_strided_slice %399 {offsets = [12, 0], sizes = [2, 32], strides = [1, 1]} : vector<16x32xf32> to vector<2x32xf32>
    %700 = arith.addf %699, %690 : vector<2x32xf32>
    %701 = arith.negf %700 : vector<2x32xf32>
    %702 = math.exp %701 : vector<2x32xf32>
    %cst_152 = arith.constant 1.000000e+00 : f32
    %703 = vector.broadcast %cst_152 : f32 to vector<2x32xf32>
    %704 = arith.addf %703, %702 : vector<2x32xf32>
    %705 = arith.divf %703, %704 : vector<2x32xf32>
    %706 = vector.extract_strided_slice %406 {offsets = [12, 0], sizes = [2, 32], strides = [1, 1]} : vector<16x32xf32> to vector<2x32xf32>
    %707 = arith.addf %706, %693 : vector<2x32xf32>
    %708 = arith.negf %707 : vector<2x32xf32>
    %709 = math.exp %708 : vector<2x32xf32>
    %cst_153 = arith.constant 1.000000e+00 : f32
    %710 = vector.broadcast %cst_153 : f32 to vector<2x32xf32>
    %711 = arith.addf %710, %709 : vector<2x32xf32>
    %712 = arith.divf %710, %711 : vector<2x32xf32>
    %713 = vector.extract_strided_slice %413 {offsets = [12, 0], sizes = [2, 32], strides = [1, 1]} : vector<16x32xf32> to vector<2x32xf32>
    %714 = arith.mulf %705, %698 : vector<2x32xf32>
    %715 = arith.addf %713, %714 : vector<2x32xf32>
    %716 = math.tanh %715 : vector<2x32xf32>
    %cst_154 = arith.constant 1.000000e+00 : f32
    %717 = vector.broadcast %cst_154 : f32 to vector<2x32xf32>
    %718 = arith.subf %717, %712 : vector<2x32xf32>
    %719 = arith.mulf %718, %716 : vector<2x32xf32>
    %720 = arith.mulf %712, %683 : vector<2x32xf32>
    %721 = arith.addf %719, %720 : vector<2x32xf32>
    %722 = vector.broadcast %687 : vector<2x1xf32> to vector<2x32xf32>
    %723 = arith.mulf %722, %721 : vector<2x32xf32>
    %cst_155 = arith.constant 1.000000e+00 : f32
    %724 = vector.broadcast %cst_155 : f32 to vector<2x1xf32>
    %725 = arith.subf %724, %687 : vector<2x1xf32>
    %726 = vector.broadcast %725 : vector<2x1xf32> to vector<2x32xf32>
    %727 = arith.mulf %726, %683 : vector<2x32xf32>
    %728 = arith.addf %723, %727 : vector<2x32xf32>
    %729 = vector.broadcast %687 : vector<2x1xf32> to vector<2x32xf32>
    %730 = arith.mulf %729, %728 : vector<2x32xf32>
    %c12_156 = arith.constant 12 : index
    %c0_157 = arith.constant 0 : index
    %731 = vector.load %arg13[%c12_156, %c0_157] : memref<16x32xf32, #tpu.memory_space<vmem>>, vector<2x32xf32>
    tpu.vector_store %arg13[%c12_156, %c0_157], %730 {strides = array<i32>} : memref<16x32xf32, #tpu.memory_space<vmem>>, vector<2x32xf32>,
    %732 = vector.extract_strided_slice %0 {offsets = [14, 0], sizes = [2, 1], strides = [1, 1]} : vector<16x1xf32> to vector<2x1xf32>
    %733 = vector.extract_strided_slice %391 {offsets = [0, 0, 0], sizes = [1, 32, 32], strides = [1, 1, 1]} : vector<3x32x32xf32> to vector<1x32x32xf32>
    %734 = vector.shape_cast %733 : vector<1x32x32xf32> to vector<32x32xf32>
    %cst_158 = arith.constant dense<0.000000e+00> : vector<2x32xf32>
    %735 = tpu.matmul %728, %734, %cst_158 {dimension_numbers = #tpu.dot_dimension_numbers<[1], [0], [0], [1], [0, 0, 1, 1], [], []>} : vector<2x32xf32>, vector<32x32xf32>, vector<2x32xf32> -> vector<2x32xf32>
    %736 = vector.extract_strided_slice %391 {offsets = [1, 0, 0], sizes = [1, 32, 32], strides = [1, 1, 1]} : vector<3x32x32xf32> to vector<1x32x32xf32>
    %737 = vector.shape_cast %736 : vector<1x32x32xf32> to vector<32x32xf32>
    %cst_159 = arith.constant dense<0.000000e+00> : vector<2x32xf32>
    %738 = tpu.matmul %728, %737, %cst_159 {dimension_numbers = #tpu.dot_dimension_numbers<[1], [0], [0], [1], [0, 0, 1, 1], [], []>} : vector<2x32xf32>, vector<32x32xf32>, vector<2x32xf32> -> vector<2x32xf32>
    %739 = vector.extract_strided_slice %391 {offsets = [2, 0, 0], sizes = [1, 32, 32], strides = [1, 1, 1]} : vector<3x32x32xf32> to vector<1x32x32xf32>
    %740 = vector.shape_cast %739 : vector<1x32x32xf32> to vector<32x32xf32>
    %cst_160 = arith.constant dense<0.000000e+00> : vector<2x32xf32>
    %741 = tpu.matmul %728, %740, %cst_160 {dimension_numbers = #tpu.dot_dimension_numbers<[1], [0], [0], [1], [0, 0, 1, 1], [], []>} : vector<2x32xf32>, vector<32x32xf32>, vector<2x32xf32> -> vector<2x32xf32>
    %742 = vector.broadcast %415 : vector<1x32xf32> to vector<2x32xf32>
    %743 = arith.addf %741, %742 : vector<2x32xf32>
    %744 = vector.extract_strided_slice %399 {offsets = [14, 0], sizes = [2, 32], strides = [1, 1]} : vector<16x32xf32> to vector<2x32xf32>
    %745 = arith.addf %744, %735 : vector<2x32xf32>
    %746 = arith.negf %745 : vector<2x32xf32>
    %747 = math.exp %746 : vector<2x32xf32>
    %cst_161 = arith.constant 1.000000e+00 : f32
    %748 = vector.broadcast %cst_161 : f32 to vector<2x32xf32>
    %749 = arith.addf %748, %747 : vector<2x32xf32>
    %750 = arith.divf %748, %749 : vector<2x32xf32>
    %751 = vector.extract_strided_slice %406 {offsets = [14, 0], sizes = [2, 32], strides = [1, 1]} : vector<16x32xf32> to vector<2x32xf32>
    %752 = arith.addf %751, %738 : vector<2x32xf32>
    %753 = arith.negf %752 : vector<2x32xf32>
    %754 = math.exp %753 : vector<2x32xf32>
    %cst_162 = arith.constant 1.000000e+00 : f32
    %755 = vector.broadcast %cst_162 : f32 to vector<2x32xf32>
    %756 = arith.addf %755, %754 : vector<2x32xf32>
    %757 = arith.divf %755, %756 : vector<2x32xf32>
    %758 = vector.extract_strided_slice %413 {offsets = [14, 0], sizes = [2, 32], strides = [1, 1]} : vector<16x32xf32> to vector<2x32xf32>
    %759 = arith.mulf %750, %743 : vector<2x32xf32>
    %760 = arith.addf %758, %759 : vector<2x32xf32>
    %761 = math.tanh %760 : vector<2x32xf32>
    %cst_163 = arith.constant 1.000000e+00 : f32
    %762 = vector.broadcast %cst_163 : f32 to vector<2x32xf32>
    %763 = arith.subf %762, %757 : vector<2x32xf32>
    %764 = arith.mulf %763, %761 : vector<2x32xf32>
    %765 = arith.mulf %757, %728 : vector<2x32xf32>
    %766 = arith.addf %764, %765 : vector<2x32xf32>
    %767 = vector.broadcast %732 : vector<2x1xf32> to vector<2x32xf32>
    %768 = arith.mulf %767, %766 : vector<2x32xf32>
    %cst_164 = arith.constant 1.000000e+00 : f32
    %769 = vector.broadcast %cst_164 : f32 to vector<2x1xf32>
    %770 = arith.subf %769, %732 : vector<2x1xf32>
    %771 = vector.broadcast %770 : vector<2x1xf32> to vector<2x32xf32>
    %772 = arith.mulf %771, %728 : vector<2x32xf32>
    %773 = arith.addf %768, %772 : vector<2x32xf32>
    %774 = vector.broadcast %732 : vector<2x1xf32> to vector<2x32xf32>
    %775 = arith.mulf %774, %773 : vector<2x32xf32>
    %c14_165 = arith.constant 14 : index
    %c0_166 = arith.constant 0 : index
    %776 = vector.load %arg13[%c14_165, %c0_166] : memref<16x32xf32, #tpu.memory_space<vmem>>, vector<2x32xf32>
    tpu.vector_store %arg13[%c14_165, %c0_166], %775 {strides = array<i32>} : memref<16x32xf32, #tpu.memory_space<vmem>>, vector<2x32xf32>,
    %c0_167 = arith.constant 0 : index
    %c0_168 = arith.constant 0 : index
    %777 = vector.load %arg13[%c0_167, %c0_168] : memref<16x32xf32, #tpu.memory_space<vmem>>, vector<16x32xf32>
    %c0_169 = arith.constant 0 : index
    %c0_170 = arith.constant 0 : index
    %778 = vector.load %arg9[%c0_169, %c0_170] : memref<32x32xf32, #tpu.memory_space<vmem>>, vector<32x32xf32>
    %cst_171 = arith.constant dense<0.000000e+00> : vector<16x32xf32>
    %779 = tpu.matmul %777, %778, %cst_171 {dimension_numbers = #tpu.dot_dimension_numbers<[1], [0], [0], [1], [0, 0, 1, 1], [], []>} : vector<16x32xf32>, vector<32x32xf32>, vector<16x32xf32> -> vector<16x32xf32>
    %c0_172 = arith.constant 0 : index
    %c0_173 = arith.constant 0 : index
    %780 = vector.load %arg10[%c0_172, %c0_173] : memref<1x32xf32, #tpu.memory_space<vmem>>, vector<1x32xf32>
    %781 = vector.broadcast %780 : vector<1x32xf32> to vector<16x32xf32>
    %782 = arith.addf %779, %781 : vector<16x32xf32>
    %cst_174 = arith.constant 0.000000e+00 : f32
    %783 = vector.broadcast %cst_174 : f32 to vector<16x32xf32>
    %784 = arith.maximumf %782, %783 : vector<16x32xf32>
    %c0_175 = arith.constant 0 : index
    %c0_176 = arith.constant 0 : index
    %785 = vector.load %arg11[%c0_175, %c0_176] : memref<16x32xf32, #tpu.memory_space<vmem>>, vector<16x32xf32>
    tpu.vector_store %arg11[%c0_175, %c0_176], %784 {strides = array<i32>} : memref<16x32xf32, #tpu.memory_space<vmem>>, vector<16x32xf32>,
    %c0_177 = arith.constant 0 : index
    %c0_178 = arith.constant 0 : index
    %786 = vector.load %arg12[%c0_177, %c0_178] : memref<2x32xf32, #tpu.memory_space<vmem>>, vector<2x32xf32>
    tpu.vector_store %arg12[%c0_177, %c0_178], %773 {strides = array<i32>} : memref<2x32xf32, #tpu.memory_space<vmem>>, vector<2x32xf32>,
    return
  }
  func.func @transform_0(%arg0: i32) -> (i32, i32) {
    %c0_i32 = arith.constant 0 : i32
    %c0_i32_0 = arith.constant 0 : i32
    %c0_i32_1 = arith.constant 0 : i32
    return %c0_i32, %c0_i32_0 : i32, i32
  }
  func.func @transform_1(%arg0: i32) -> (i32, i32) {
    %c0_i32 = arith.constant 0 : i32
    %c0_i32_0 = arith.constant 0 : i32
    %c0_i32_1 = arith.constant 0 : i32
    return %c0_i32, %c0_i32_0 : i32, i32
  }
  func.func @transform_2(%arg0: i32) -> (i32, i32, i32) {
    %c0_i32 = arith.constant 0 : i32
    %c0_i32_0 = arith.constant 0 : i32
    %c0_i32_1 = arith.constant 0 : i32
    %c0_i32_2 = arith.constant 0 : i32
    return %c0_i32, %c0_i32_0, %c0_i32_1 : i32, i32, i32
  }
  func.func @transform_3(%arg0: i32) -> (i32, i32, i32) {
    %c0_i32 = arith.constant 0 : i32
    %c0_i32_0 = arith.constant 0 : i32
    %c0_i32_1 = arith.constant 0 : i32
    %c0_i32_2 = arith.constant 0 : i32
    return %c0_i32, %c0_i32_0, %c0_i32_1 : i32, i32, i32
  }
  func.func @transform_4(%arg0: i32) -> (i32, i32, i32) {
    %c0_i32 = arith.constant 0 : i32
    %c0_i32_0 = arith.constant 0 : i32
    %c0_i32_1 = arith.constant 0 : i32
    %c0_i32_2 = arith.constant 0 : i32
    return %c0_i32, %c0_i32_0, %c0_i32_1 : i32, i32, i32
  }
  func.func @transform_5(%arg0: i32) -> (i32, i32, i32) {
    %c0_i32 = arith.constant 0 : i32
    %c0_i32_0 = arith.constant 0 : i32
    %c0_i32_1 = arith.constant 0 : i32
    %c0_i32_2 = arith.constant 0 : i32
    return %c0_i32, %c0_i32_0, %c0_i32_1 : i32, i32, i32
  }
  func.func @transform_6(%arg0: i32) -> (i32, i32, i32) {
    %c0_i32 = arith.constant 0 : i32
    %c0_i32_0 = arith.constant 0 : i32
    %c0_i32_1 = arith.constant 0 : i32
    %c0_i32_2 = arith.constant 0 : i32
    return %c0_i32, %c0_i32_0, %c0_i32_1 : i32, i32, i32
  }
  func.func @transform_7(%arg0: i32) -> (i32, i32, i32) {
    %c0_i32 = arith.constant 0 : i32
    %c0_i32_0 = arith.constant 0 : i32
    %c0_i32_1 = arith.constant 0 : i32
    %c0_i32_2 = arith.constant 0 : i32
    return %c0_i32, %c0_i32_0, %c0_i32_1 : i32, i32, i32
  }
  func.func @transform_8(%arg0: i32) -> (i32, i32) {
    %c0_i32 = arith.constant 0 : i32
    %c0_i32_0 = arith.constant 0 : i32
    %c0_i32_1 = arith.constant 0 : i32
    return %c0_i32, %c0_i32_0 : i32, i32
  }
  func.func @transform_9(%arg0: i32) -> (i32, i32) {
    %c0_i32 = arith.constant 0 : i32
    %c0_i32_0 = arith.constant 0 : i32
    %c0_i32_1 = arith.constant 0 : i32
    return %c0_i32, %c0_i32_0 : i32, i32
  }
  func.func @transform_10(%arg0: i32) -> (i32, i32) {
    %c0_i32 = arith.constant 0 : i32
    %c0_i32_0 = arith.constant 0 : i32
    %c0_i32_1 = arith.constant 0 : i32
    return %c0_i32, %c0_i32_0 : i32, i32
  }
  func.func @transform_11(%arg0: i32) -> (i32, i32) {
    %c0_i32 = arith.constant 0 : i32
    %c0_i32_0 = arith.constant 0 : i32
    %c0_i32_1 = arith.constant 0 : i32
    return %c0_i32, %c0_i32_0 : i32, i32
  }
}

</mosaic_0001>

<bundles_post_ra>
// kernel: encoder_forward.1
= control target key start
LH: loop header
LB: loop body
LE: loop exit
PB: predicated region body
PF: predicated region fallthrough
CT: control target
= control target key end

     0   :  { %17 = vsyncpa [#allocation4], 0  ;;  %s3536_s0 = inlined_call_operand.vmem [shape: f32[16,32], index: 0, kind: input, shape index: {}]   ;;  %s3537_s1 = inlined_call_operand.vmem [shape: f32[16,1], index: 1, kind: input, shape index: {}]   ;;  %s3538_s2 = inlined_call_operand.vmem [shape: f32[3,32,32], index: 2, kind: input, shape index: {}]   ;;  %s3539_s3 = inlined_call_operand.vmem [shape: f32[3,32,32], index: 3, kind: input, shape index: {}]   ;;  %s3540_s4 = inlined_call_operand.vmem [shape: f32[4,1,32], index: 4, kind: input, shape index: {}]   ;;  %s3541_s5 = inlined_call_operand.hbm [shape: f32[3,32,32], index: 5, kind: input, shape index: {}]   ;;  %s3542_s6 = inlined_call_operand.hbm [shape: f32[3,32,32], index: 6, kind: input, shape index: {}]   ;;  %s3543_s7 = inlined_call_operand.vmem [shape: f32[4,1,32], index: 7, kind: input, shape index: {}]   ;;  %s3544_s8 = inlined_call_operand.vmem [shape: f32[32,32], index: 8, kind: input, shape index: {}]   ;;  %s3545_s9 = inlined_call_operand.vmem [shape: f32[1,32], index: 9, kind: input, shape index: {}]   ;;  %s3546_s10 = inlined_call_operand.vmem [shape: f32[16,32], index: 10, kind: output, shape index: {0}]   ;;  %s3547_s11 = inlined_call_operand.hbm [shape: f32[2,32], index: 11, kind: output, shape index: {1}]  }
   0x1   :  { %18 = vsyncpa [#allocation7], 0 }
   0x2   :  { %19 = vsyncpa [#allocation5], 0  ;;  %s34_s19 = sshll.u32 %s3541_s5, 4  ;;  %s2729_s20 = smov [#allocation3]   ;;  %s35_s19 = int_to_ptr.hbm [resolvable:$true] %s34_s19 }
   0x3   :  { %s36_s21 = sshll.u32 %s2729_s20, 4  ;;  %s47_s24 = sshll.u32 %s3542_s6, 4  ;;  %s37_s21 = int_to_ptr.vmem [resolvable:$true] %s36_s21  ;;  %s48_s24 = int_to_ptr.hbm [resolvable:$true] %s47_s24 }
   0x4   :  { %s2730_s25 = smov 128   ;;  %s2731_s26 = smov 8  }
   0x5   :  { %42 = dma.hbm_to_vmem [thread:$0]  %s35_s19, 1536, %s37_s21, [#allocation4], %s2730_s25, %s2730_s25, %s2731_s26  }
   0x6   :  { %s2732_s27 = smov [#allocation6]  }
   0x7   :  { %s49_s28 = sshll.u32 %s2732_s27, 4  ;;  %s50_s28 = int_to_ptr.vmem [resolvable:$true] %s49_s28 }
   0x8   :  { %55 = dma.hbm_to_vmem [thread:$0]  %s48_s24, 1536, %s50_s28, [#allocation7], %s2730_s25, %s2730_s25, %s2731_s26  }
   0x9   :  { %2723 = dma.done.wait [#allocation4], 1536  }
   0xa   :  { %2724 = vsyncadd [#allocation4], 4294965760 }
   0xb   :  { %2725 = dma.done.wait [#allocation7], 1536  }
   0xc   :  { %2726 = vsyncadd [#allocation7], 4294965760  ;;  %v2733_v0 = vmov 0   ;;  %v2805_v1 = vld [vmem:[%s3539_s3 + $0x18] sm:$0xff]  ;;  %v2810_v2 = vld [vmem:[%s3539_s3 + $0x10] sm:$0xff]  ;;  %vm105_vm0 = vcmask 261120  }
   0xd   :  { %2478 = vset.pattern.permute.xlu0 %v2733_v0  ;;  %2479 = vset.pattern.permute.xlu1 %v2733_v0  ;;  %v77_v3 = vld [vmem:[%s3538_s2 + $0x18] sm:$0xff]  ;;  %v76_v4 = vld [vmem:[%s3538_s2 + $0x10] sm:$0xff]  ;;  %v2822_v5 = vld [vmem:[%s3539_s3 + $0x8] sm:$0xff]  ;;  %v2734_v15 = vmov 0.0   ;;  %vm315_vm9 = vcmask 254976   ;;  %s2366_s23 = sshll.u32 %s3547_s11, 4  ;;  %s2367_s23 = int_to_ptr.hbm [resolvable:$true] %s2366_s23 }
   0xe   :  { %202 = vmatpush.msra.mxu3 %v2805_v1  ;;  %124 = vmatpush.msra.mxu0 %v77_v3  ;;  %v75_v6 = vld [vmem:[%s3538_s2 + $0x8] sm:$0xff]  ;;  %v2831_v7 = vld [vmem:[%s3539_s3] sm:$0xff]  ;;  %v2840_v9 = vld [vmem:[%s3539_s3 + $0x38] sm:$0xff]  ;;  %s2735_s24 = smov [#allocation8]  }
   0xf   :  { %2467 = vmatpush.msra.mxu1 %v77_v3  ;;  %v74_v8 = vld [vmem:[%s3538_s2] sm:$0xff]  ;;  %v2845_v10 = vld [vmem:[%s3539_s3 + $0x30] sm:$0xff]  ;;  %v73_v12 = vld [vmem:[%s3536_s0 + $0x8] sm:$0xff]  ;;  %s2364_s25 = sshll.u32 %s2735_s24, 4  ;;  %s2365_s25 = int_to_ptr.vmem [resolvable:$true] %s2364_s25 }
  0x10   :  { %203 = vmatpush.msra.mxu3 %v2810_v2  ;;  %125 = vmatpush.msra.mxu0 %v76_v4  ;;  %v72_v11 = vld [vmem:[%s3536_s0] sm:$0xff]  ;;  %v81_v13 = vld [vmem:[%s3538_s2 + $0x38] sm:$0xff]  ;;  %v2864_v16 = vld [vmem:[%s3539_s3 + $0x28] sm:$0xff] }
  0x11   :  { %2468 = vmatpush.msra.mxu1 %v76_v4  ;;  %v85_v14 = vld [vmem:[%s3538_s2 + $0x58] sm:$0xff]  ;;  %v80_v17 = vld [vmem:[%s3538_s2 + $0x30] sm:$0xff]  ;;  %v83_v20 = vld [vmem:[%s3538_s2 + $0x48] sm:$0xff] }
  0x12   :  { %204 = vmatpush.msra.mxu3 %v2822_v5  ;;  %126 = vmatpush.msra.mxu0 %v75_v6  ;;  %v84_v18 = vld [vmem:[%s3538_s2 + $0x50] sm:$0xff]  ;;  %v2875_v19 = vld [vmem:[%s3539_s3 + $0x58] sm:$0xff]  ;;  %v2891_v22 = vld [vmem:[%s3539_s3 + $0x20] sm:$0xff] }
  0x13   :  { %2469 = vmatpush.msra.mxu1 %v75_v6  ;;  %v2885_v21 = vld [vmem:[%s3539_s3 + $0x50] sm:$0xff]  ;;  %176 = vmatpush.msra.mxu2 %v85_v14  ;;  %v79_v23 = vld [vmem:[%s3538_s2 + $0x28] sm:$0xff]  ;;  %v82_v24 = vld [vmem:[%s3538_s2 + $0x40] sm:$0xff] }
  0x14   :  { %205 = vmatpush.msra.mxu3 %v2831_v7  ;;  %127 = vmatpush.msra.mxu0 %v74_v8  ;;  %v78_v25 = vld [vmem:[%s3538_s2 + $0x20] sm:$0xff]  ;;  %v2910_v26 = vld [vmem:[%s3539_s3 + $0x48] sm:$0xff] }
  0x15   :  { %206 = vmatmul.f32.vlgmr.msra.gmra.mxu3 %v2734_v15  ;;  %2470 = vmatpush.msra.mxu1 %v74_v8  ;;  %v70_v27 = vld [vmem:[%s3537_s1] sm:$0xff] }
  0x16   :  { %222 = vmatpush.msrb.mxu3 %v2840_v9  ;;  %2379 = vmatmul.msk.f32.vlgmr.msra.gmra.mxu0 %vm105_vm0, %v72_v11  ;;  %v2920_v28 = vld [vmem:[%s3539_s3 + $0x40] sm:$0xff]  ;;  %v306_v29 = vsub.f32 1.0, %v70_v27 }
  0x17   :  { %2380 = vmatmul.msk.f32.vlgmr.msra.gmra.mxu1 %vm105_vm0, %v73_v12  ;;  %177 = vmatpush.msra.mxu2 %v84_v18  ;;  %v2480_v30 = vld [vmem:[%s3540_s4] ss:$0 sm:$0xff]  ;;  %v2971_v37 = vld [vmem:[%s3540_s4 + $0x1] ss:$0 sm:$0xff]  ;;  %v2980_v50 = vld [vmem:[%s3540_s4 + $0x3] ss:$0 sm:$0xff] }
  0x18   :  { %223 = vmatpush.msrb.mxu3 %v2845_v10  ;;  %150 = vmatpush.msrb.mxu1 %v81_v13  ;;  %v2985_v56 = vld [vmem:[%s3540_s4 + $0x2] ss:$0 sm:$0xff] }
  0x19   :  { %245 = vmatpush.msrb.mxu0 %v2875_v19  ;;  %178 = vmatpush.msra.mxu2 %v83_v20 }
  0x1a   :  { %224 = vmatpush.msrb.mxu3 %v2864_v16  ;;  %151 = vmatpush.msrb.mxu1 %v80_v17 }
  0x1b   :  { %246 = vmatpush.msrb.mxu0 %v2885_v21  ;;  %179 = vmatpush.msra.mxu2 %v82_v24 }
  0x1c   :  { %225 = vmatpush.msrb.mxu3 %v2891_v22  ;;  %152 = vmatpush.msrb.mxu1 %v79_v23 }
  0x1d   :  { %226 = vmatmul.f32.vlgmr.msrb.gmra.mxu3 %v2734_v15  ;;  %2383 = vmatmul.msk.f32.vlgmr.msra.gmra.mxu2 %vm105_vm0, %v72_v11 }
  0x1e   :  { %153 = vmatpush.msrb.mxu1 %v78_v25  ;;  %247 = vmatpush.msrb.mxu0 %v2910_v26 }
  0x1f   :  { %2381 = vmatmul.msk.f32.vlgmr.msrb.gmra.mxu1 %vm105_vm0, %v72_v11  ;;  %302 = vperm.xlu0 %2478, %v70_v27  }
  0x20   :  { %332 = vmatpush.msra.mxu1 %v2805_v1  ;;  %248 = vmatpush.msrb.mxu0 %v2920_v28 }
  0x21   :  { %352 = vmatpush.msrb.mxu2 %v2840_v9  ;;  %249 = vmatmul.f32.vlgmr.msrb.gmra.mxu0 %v2734_v15 }
  0x22   :  { %333 = vmatpush.msra.mxu1 %v2810_v2  ;;  %372 = vmatpush.msra.mxu3 %v2875_v19 }
  0x23   :  { %353 = vmatpush.msrb.mxu2 %v2845_v10  ;;  %460 = vmatpush.msra.mxu0 %v2805_v1 }
  0x24   :  { %334 = vmatpush.msra.mxu1 %v2822_v5  ;;  %373 = vmatpush.msra.mxu3 %v2885_v21 }
  0x25   :  { %354 = vmatpush.msrb.mxu2 %v2864_v16  ;;  %461 = vmatpush.msra.mxu0 %v2810_v2 }
  0x26   :  { %2384 = vmatmul.msk.f32.gmra.mxu2 %vm105_vm0, %v73_v12  ;;  %335 = vmatpush.msra.mxu1 %v2831_v7 }
  0x27   :  { %2382 = vmatmul.msk.f32.gmra.mxu1 %vm105_vm0, %v73_v12  ;;  %374 = vmatpush.msra.mxu3 %v2910_v26 }
  0x28   :  { %309 = vperm.xlu0 %2478, %v306_v29   ;;  %355 = vmatpush.msrb.mxu2 %v2891_v22 }
  0x29   :  { %375 = vmatpush.msra.mxu3 %v2920_v28  ;;  %480 = vmatpush.msrb.mxu1 %v2840_v9 }
  0x2a   :  { %500 = vmatpush.msra.mxu2 %v2875_v19  ;;  %462 = vmatpush.msra.mxu0 %v2822_v5 }
  0x2b   :  { %481 = vmatpush.msrb.mxu1 %v2845_v10  ;;  %588 = vmatpush.msrb.mxu3 %v2805_v1 }
  0x2c   :  { %501 = vmatpush.msra.mxu2 %v2885_v21  ;;  %463 = vmatpush.msra.mxu0 %v2831_v7 }
  0x2d   :  { %482 = vmatpush.msrb.mxu1 %v2864_v16  ;;  %589 = vmatpush.msrb.mxu3 %v2810_v2 }
  0x2e   :  { %502 = vmatpush.msra.mxu2 %v2910_v26  ;;  %608 = vmatpush.msrb.mxu0 %v2840_v9 }
  0x2f   :  { %483 = vmatpush.msrb.mxu1 %v2891_v22  ;;  %590 = vmatpush.msrb.mxu3 %v2822_v5 }
  0x30   :  { %503 = vmatpush.msra.mxu2 %v2920_v28  ;;  %609 = vmatpush.msrb.mxu0 %v2845_v10 }
  0x31   :  { %591 = vmatpush.msrb.mxu3 %v2831_v7 }
  0x32   :  { %610 = vmatpush.msrb.mxu0 %v2864_v16 }
  0x34   :  { %611 = vmatpush.msrb.mxu0 %v2891_v22 }
  0x91   :  { %v2991_v13 = vpop.permute.xlu0 %302 }
  0x93   :  { %v129_v31 = vpop.f32.mrf.mxu0 }
  0x94   :  { %v132_v32 = vpop.f32.mrf.mxu1  ;;  %v2963_v33 = vadd.f32 %v2480_v30, %v129_v31 }
  0x95   :  { %v2965_v34 = vadd.f32 %v2480_v30, %v132_v32 }
  0x98   :  { %v207_v35 = vpop.f32.mrf.mxu3 }
  0x99   :  { %v253_v36 = vadd.f32 %v207_v35, %v2963_v33 }
  0x9a   :  { %v2994_v30 = vpop.permute.xlu0 %309 }
  0x9b   :  { %v2385_v38 = vmul.f32 -1.442695, %v253_v36  ;;  %v2998_v35 = vmul.f32 0.0, %v2994_v30 }
  0x9c   :  { %v155_v39 = vpop.f32.mrf.mxu1 }
  0x9d   :  { %2489 = vpow2.f32 %v2385_v38  ;;  %v2974_v40 = vadd.f32 %v2971_v37, %v155_v39 }
  0x9e   :  { %v250_v52 = vpop.f32.mrf.mxu0 }
  0x9f   :  { %v251_v58 = vadd.f32 %v2980_v50, %v250_v52 }
  0xa0   :  { %v227_v41 = vpop.f32.mrf.mxu3  ;;  %v181_v57 = vpop.f32.mrf.mxu2 }
  0xa1   :  { %v273_v42 = vadd.f32 %v227_v41, %v2974_v40  ;;  %v2989_v0 = vadd.f32 %v2985_v56, %v181_v57 }
  0xa3   :  { %v2490_v43 = vpop.eup %2489  ;;  %v2386_v44 = vmul.f32 -1.442695, %v273_v42 }
  0xa4   :  { %v257_v45 = vadd.f32 1.0, %v2490_v43  ;;  %v3024_v39 = vpop.f32.mrf.mxu1 }
  0xa5   :  { %2491 = vpow2.f32 %v2386_v44 }
  0xa6   :  { %2493 = vrcp.f32 %v257_v45  ;;  %v269_v53 = vand.u32 2147483648, %v257_v45  ;;  %v267_v55 = vand.u32 2147483647, %v257_v45  ;;  %vm263_vm2 = vweird.f32 %v257_v45 }
  0xa8   :  { %v270_v61 = vor.u32 1.1754944e-38, %v269_v53  ;;  %vm268_vm4 = vcmp.eq.f32.partialorder %v267_v55, 8.507059e+37 }
  0xa9   :  { %v3026_v41 = vpop.f32.mrf.mxu2 }
  0xab   :  { %v2492_v46 = vpop.eup %2491 }
  0xac   :  { %v2494_v47 = vpop.eup %2493  ;;  %v277_v48 = vadd.f32 1.0, %v2492_v46 }
  0xad   :  { %v259_v49 = vmul.f32 %v2494_v47, %v257_v45  ;;  %vm264_vm1 = vweird.f32 %v2494_v47 }
  0xae   :  { %2495 = vrcp.f32 %v277_v48  ;;  %vm265_vm3 = vmor %vm263_vm2, %vm264_vm1  ;;  %v289_v8 = vand.u32 2147483648, %v277_v48  ;;  %v287_v12 = vand.u32 2147483647, %v277_v48  ;;  %vm283_vm6 = vweird.f32 %v277_v48 }
  0xaf   :  { %v260_v51 = vsub.f32 1.0, %v259_v49 }
  0xb0   :  { %v290_v18 = vor.u32 1.1754944e-38, %v289_v8  ;;  %vm288_vm8 = vcmp.eq.f32.partialorder %v287_v12, 8.507059e+37 }
  0xb1   :  { %v261_v54 = vmul.f32 %v2494_v47, %v260_v51 }
  0xb3   :  { %v262_v59 = vadd.f32 %v2494_v47, %v261_v54 }
  0xb4   :  { %v2496_v60 = vpop.eup %2495 }
  0xb5   :  { %v279_v62 = vmul.f32 %v2496_v60, %v277_v48  ;;  %v266_v63 = vsel %vm265_vm3, %v2494_v47, %v262_v59  ;;  %vm284_vm5 = vweird.f32 %v2496_v60  ;;  %vm442_vm3 = vcmask 257026  }
  0xb6   :  { %v271_v3 = vsel %vm268_vm4, %v270_v61, %v266_v63  ;;  %vm285_vm7 = vmor %vm283_vm6, %vm284_vm5 }
  0xb7   :  { %v280_v4 = vsub.f32 1.0, %v279_v62  ;;  %v293_v6 = vmul.f32 %v271_v3, %v251_v58 }
  0xb9   :  { %v281_v11 = vmul.f32 %v2496_v60, %v280_v4  ;;  %v294_v14 = vadd.f32 %v293_v6, %v2989_v0 }
  0xbb   :  { %v282_v17 = vadd.f32 %v2496_v60, %v281_v11  ;;  %2497 = vtanh.f32 %v294_v14 }
  0xbd   :  { %v286_v20 = vsel %vm285_vm7, %v2496_v60, %v282_v17 }
  0xbe   :  { %v291_v23 = vsel %vm288_vm8, %v290_v18, %v286_v20 }
  0xbf   :  { %v296_v24 = vsub.f32 1.0, %v291_v23  ;;  %v298_v27 = vmul.f32 0.0, %v291_v23 }
  0xc1   :  { %v2498_v25 = vpop.eup %2497 }
  0xc2   :  { %v297_v29 = vmul.f32 %v2498_v25, %v296_v24 }
  0xc4   :  { %v299_v31 = vadd.f32 %v298_v27, %v297_v29 }
  0xc6   :  { %v305_v32 = vmul.f32 %v2991_v13, %v299_v31 }
  0xc8   :  { %v3001_v36 = vadd.f32 %v2998_v35, %v305_v32 }
  0xca   :  { %v314_v38 = vmul.f32 %v3001_v36, %v2991_v13  ;;  %2387 = vmatmul.msk.f32.vlgmr.msra.gmra.mxu1 %vm105_vm0, %v3001_v36  ;;  %2388 = vmatmul.msk.f32.vlgmr.msrb.gmra.mxu2 %vm105_vm0, %v3001_v36 }
  0xcb   :  { %2389 = vmatmul.msk.f32.vlgmr.msra.gmra.mxu3 %vm105_vm0, %v3001_v36  ;;  %628 = vmatpush.msra.mxu1 %v2875_v19 }
  0xcc   :  { %316 = vst.msk [vmem:[#allocation2] sm:$0x3] %vm315_vm9, %v314_v38  ;;  %716 = vmatpush.msrb.mxu2 %v2805_v1  ;;  %736 = vmatpush.msra.mxu3 %v2840_v9  ;;  %v434_v38 = vrot.slane %v3001_v36, 6 }
  0xcd   :  { %629 = vmatpush.msra.mxu1 %v2885_v21 }
  0xce   :  { %717 = vmatpush.msrb.mxu2 %v2810_v2  ;;  %737 = vmatpush.msra.mxu3 %v2845_v10 }
  0xcf   :  { %630 = vmatpush.msra.mxu1 %v2910_v26 }
  0xd0   :  { %718 = vmatpush.msrb.mxu2 %v2822_v5  ;;  %738 = vmatpush.msra.mxu3 %v2864_v16 }
  0xd1   :  { %631 = vmatpush.msra.mxu1 %v2920_v28 }
  0xd2   :  { %719 = vmatpush.msrb.mxu2 %v2831_v7  ;;  %739 = vmatpush.msra.mxu3 %v2891_v22 }
 0x147   :  { %v337_v42 = vpop.f32.mrf.mxu1 }
 0x148   :  { %v381_v43 = vrot.slane %v337_v42, 6 }
 0x14a   :  { %v383_v44 = vadd.f32 %v381_v43, %v2963_v33 }
 0x14c   :  { %v2390_v45 = vmul.f32 -1.442695, %v383_v44 }
 0x14d   :  { %v357_v46 = vpop.f32.mrf.mxu2 }
 0x14e   :  { %2499 = vpow2.f32 %v2390_v45  ;;  %v404_v47 = vrot.slane %v357_v46, 6  ;;  %v377_v58 = vpop.f32.mrf.mxu3 }
 0x14f   :  { %v378_v61 = vadd.f32 %v2980_v50, %v377_v58 }
 0x150   :  { %v406_v48 = vadd.f32 %v404_v47, %v2974_v40  ;;  %v439_v47 = vmul.f32 %v434_v38, %v2994_v30 }
 0x151   :  { %v427_v14 = vrot.slane %v378_v61, 6 }
 0x152   :  { %v2391_v49 = vmul.f32 -1.442695, %v406_v48 }
 0x154   :  { %v2500_v51 = vpop.eup %2499  ;;  %2501 = vpow2.f32 %v2391_v49 }
 0x155   :  { %v387_v52 = vadd.f32 1.0, %v2500_v51 }
 0x157   :  { %2503 = vrcp.f32 %v387_v52  ;;  %v399_v60 = vand.u32 2147483648, %v387_v52  ;;  %v397_v63 = vand.u32 2147483647, %v387_v52  ;;  %vm393_vm11 = vweird.f32 %v387_v52 }
 0x159   :  { %v400_v8 = vor.u32 1.1754944e-38, %v399_v60  ;;  %vm398_vm13 = vcmp.eq.f32.partialorder %v397_v63, 8.507059e+37 }
 0x15a   :  { %v2502_v53 = vpop.eup %2501 }
 0x15b   :  { %v410_v54 = vadd.f32 1.0, %v2502_v53 }
 0x15d   :  { %v2504_v55 = vpop.eup %2503  ;;  %2505 = vrcp.f32 %v410_v54  ;;  %v422_v20 = vand.u32 2147483648, %v410_v54  ;;  %v420_v24 = vand.u32 2147483647, %v410_v54  ;;  %vm416_vm15 = vweird.f32 %v410_v54 }
 0x15e   :  { %v389_v57 = vmul.f32 %v2504_v55, %v387_v52  ;;  %vm394_vm10 = vweird.f32 %v2504_v55 }
 0x15f   :  { %vm395_vm12 = vmor %vm393_vm11, %vm394_vm10  ;;  %v423_v29 = vor.u32 1.1754944e-38, %v422_v20  ;;  %vm421_vm2 = vcmp.eq.f32.partialorder %v420_v24, 8.507059e+37 }
 0x160   :  { %v390_v59 = vsub.f32 1.0, %v389_v57 }
 0x162   :  { %v391_v62 = vmul.f32 %v2504_v55, %v390_v59 }
 0x163   :  { %v2506_v3 = vpop.eup %2505 }
 0x164   :  { %v412_v4 = vmul.f32 %v2506_v3, %v410_v54  ;;  %v392_v6 = vadd.f32 %v2504_v55, %v391_v62  ;;  %vm417_vm14 = vweird.f32 %v2506_v3 }
 0x165   :  { %vm418_vm1 = vmor %vm416_vm15, %vm417_vm14 }
 0x166   :  { %v413_v11 = vsub.f32 1.0, %v412_v4  ;;  %v396_v12 = vsel %vm395_vm12, %v2504_v55, %v392_v6 }
 0x167   :  { %v401_v17 = vsel %vm398_vm13, %v400_v8, %v396_v12  ;;  %vm570_vm13 = vcmask 259076  }
 0x168   :  { %v414_v18 = vmul.f32 %v2506_v3, %v413_v11  ;;  %v429_v23 = vmul.f32 %v427_v14, %v401_v17  ;;  %v71_v11 = vld [vmem:[%s3537_s1 + $0x8] sm:$0xff] }
 0x169   :  { %814 = vperm.xlu1 %2479, %v71_v11  }
 0x16a   :  { %v415_v25 = vadd.f32 %v2506_v3, %v414_v18  ;;  %v430_v27 = vadd.f32 %v429_v23, %v2989_v0 }
 0x16c   :  { %v419_v31 = vsel %vm418_vm1, %v2506_v3, %v415_v25  ;;  %2507 = vtanh.f32 %v430_v27 }
 0x16d   :  { %v424_v32 = vsel %vm421_vm2, %v423_v29, %v419_v31  ;;  %v818_v29 = vsub.f32 1.0, %v71_v11 }
 0x16e   :  { %v432_v42 = vsub.f32 1.0, %v424_v32  ;;  %v436_v45 = vmul.f32 %v434_v38, %v424_v32 }
 0x171   :  { %821 = vperm.xlu1 %2479, %v818_v29  }
 0x172   :  { %v2508_v43 = vpop.eup %2507 }
 0x173   :  { %v433_v44 = vmul.f32 %v2508_v43, %v432_v42 }
 0x175   :  { %v437_v46 = vadd.f32 %v436_v45, %v433_v44 }
 0x177   :  { %v438_v48 = vmul.f32 %v437_v46, %v2991_v13 }
 0x179   :  { %v3035_v49 = vadd.f32 %v439_v47, %v438_v48 }
 0x17b   :  { %v441_v51 = vmul.f32 %v3035_v49, %v2991_v13  ;;  %v445_v52 = vrot.slane %v3035_v49, 2 }
 0x17d   :  { %443 = vst.msk [vmem:[#allocation2] sm:$0xc] %vm442_vm3, %v441_v51  ;;  %2392 = vmatmul.msk.f32.vlgmr.msra.gmra.mxu0 %vm105_vm0, %v445_v52  ;;  %2393 = vmatmul.msk.f32.vlgmr.msrb.gmra.mxu1 %vm105_vm0, %v445_v52 }
 0x17e   :  { %2394 = vmatmul.msk.f32.vlgmr.msra.gmra.mxu2 %vm105_vm0, %v445_v52  ;;  %756 = vmatpush.msra.mxu0 %v2875_v19 }
 0x17f   :  { %843 = vmatpush.msrb.mxu1 %v2805_v1  ;;  %863 = vmatpush.msra.mxu2 %v2840_v9 }
 0x180   :  { %757 = vmatpush.msra.mxu0 %v2885_v21 }
 0x181   :  { %844 = vmatpush.msrb.mxu1 %v2810_v2  ;;  %864 = vmatpush.msra.mxu2 %v2845_v10 }
 0x182   :  { %758 = vmatpush.msra.mxu0 %v2910_v26 }
 0x183   :  { %845 = vmatpush.msrb.mxu1 %v2822_v5  ;;  %865 = vmatpush.msra.mxu2 %v2864_v16 }
 0x184   :  { %759 = vmatpush.msra.mxu0 %v2920_v28 }
 0x185   :  { %846 = vmatpush.msrb.mxu1 %v2831_v7  ;;  %866 = vmatpush.msra.mxu2 %v2891_v22 }
 0x1fa   :  { %v465_v36 = vpop.f32.mrf.mxu0  ;;  %v485_v53 = vpop.f32.mrf.mxu1 }
 0x1fb   :  { %v509_v54 = vrot.slane %v465_v36, 4  ;;  %v532_v55 = vrot.slane %v485_v53, 4 }
 0x1fd   :  { %v511_v57 = vadd.f32 %v509_v54, %v2963_v33  ;;  %v534_v58 = vadd.f32 %v532_v55, %v2974_v40  ;;  %v562_v54 = vrot.slane %v3035_v49, 6 }
 0x1ff   :  { %v2395_v59 = vmul.f32 -1.442695, %v511_v57  ;;  %v2396_v60 = vmul.f32 -1.442695, %v534_v58 }
 0x201   :  { %2509 = vpow2.f32 %v2395_v59  ;;  %v505_v14 = vpop.f32.mrf.mxu2 }
 0x202   :  { %2511 = vpow2.f32 %v2396_v60  ;;  %v506_v23 = vadd.f32 %v2980_v50, %v505_v14 }
 0x204   :  { %v555_v42 = vrot.slane %v506_v23, 4 }
 0x207   :  { %v2510_v61 = vpop.eup %2509 }
 0x208   :  { %v2512_v62 = vpop.eup %2511  ;;  %v515_v63 = vadd.f32 1.0, %v2510_v61  ;;  %v567_v61 = vmul.f32 %v562_v54, %v2994_v30 }
 0x209   :  { %v538_v3 = vadd.f32 1.0, %v2512_v62 }
 0x20a   :  { %2513 = vrcp.f32 %v515_v63  ;;  %v527_v20 = vand.u32 2147483648, %v515_v63  ;;  %v525_v25 = vand.u32 2147483647, %v515_v63  ;;  %vm521_vm5 = vweird.f32 %v515_v63 }
 0x20b   :  { %2515 = vrcp.f32 %v538_v3  ;;  %v550_v45 = vand.u32 2147483648, %v538_v3  ;;  %vm544_vm10 = vweird.f32 %v538_v3  ;;  %v548_v47 = vand.u32 2147483647, %v538_v3 }
 0x20c   :  { %v528_v32 = vor.u32 1.1754944e-38, %v527_v20  ;;  %vm526_vm7 = vcmp.eq.f32.partialorder %v525_v25, 8.507059e+37 }
 0x20d   :  { %v551_v52 = vor.u32 1.1754944e-38, %v550_v45  ;;  %vm549_vm12 = vcmp.eq.f32.partialorder %v548_v47, 8.507059e+37 }
 0x210   :  { %v2514_v4 = vpop.eup %2513 }
 0x211   :  { %v2516_v6 = vpop.eup %2515  ;;  %v517_v8 = vmul.f32 %v2514_v4, %v515_v63  ;;  %vm522_vm4 = vweird.f32 %v2514_v4 }
 0x212   :  { %v540_v12 = vmul.f32 %v2516_v6, %v538_v3  ;;  %vm523_vm6 = vmor %vm521_vm5, %vm522_vm4  ;;  %vm545_vm8 = vweird.f32 %v2516_v6 }
 0x213   :  { %v518_v17 = vsub.f32 1.0, %v517_v8  ;;  %vm546_vm11 = vmor %vm544_vm10, %vm545_vm8  ;;  %vm698_vm8 = vcmask 261126  }
 0x214   :  { %v541_v18 = vsub.f32 1.0, %v540_v12 }
 0x215   :  { %v519_v24 = vmul.f32 %v2514_v4, %v518_v17 }
 0x216   :  { %v542_v27 = vmul.f32 %v2516_v6, %v541_v18 }
 0x217   :  { %v520_v31 = vadd.f32 %v2514_v4, %v519_v24 }
 0x218   :  { %v543_v44 = vadd.f32 %v2516_v6, %v542_v27 }
 0x219   :  { %v524_v38 = vsel %vm523_vm6, %v2514_v4, %v520_v31 }
 0x21a   :  { %v529_v43 = vsel %vm526_vm7, %v528_v32, %v524_v38  ;;  %v547_v51 = vsel %vm546_vm11, %v2516_v6, %v543_v44 }
 0x21b   :  { %v557_v46 = vmul.f32 %v555_v42, %v529_v43  ;;  %v552_v36 = vsel %vm549_vm12, %v551_v52, %v547_v51 }
 0x21c   :  { %v560_v53 = vsub.f32 1.0, %v552_v36  ;;  %v564_v58 = vmul.f32 %v562_v54, %v552_v36 }
 0x21d   :  { %v558_v48 = vadd.f32 %v557_v46, %v2989_v0 }
 0x21f   :  { %2517 = vtanh.f32 %v558_v48 }
 0x225   :  { %v2518_v55 = vpop.eup %2517 }
 0x226   :  { %v561_v57 = vmul.f32 %v2518_v55, %v560_v53 }
 0x228   :  { %v565_v59 = vadd.f32 %v564_v58, %v561_v57 }
 0x22a   :  { %v566_v60 = vmul.f32 %v565_v59, %v2991_v13 }
 0x22c   :  { %v3066_v62 = vadd.f32 %v567_v61, %v566_v60 }
 0x22e   :  { %v569_v63 = vmul.f32 %v3066_v62, %v2991_v13  ;;  %v573_v3 = vrot.slane %v3066_v62, 4 }
 0x230   :  { %571 = vst.msk [vmem:[#allocation2] sm:$0x30] %vm570_vm13, %v569_v63  ;;  %2397 = vmatmul.msk.f32.vlgmr.msrb.gmra.mxu3 %vm105_vm0, %v573_v3  ;;  %2398 = vmatmul.msk.f32.vlgmr.msrb.gmra.mxu0 %vm105_vm0, %v573_v3  ;;  %v690_v63 = vrot.slane %v3066_v62, 6 }
 0x231   :  { %2399 = vmatmul.msk.f32.vlgmr.msra.gmra.mxu1 %vm105_vm0, %v573_v3  ;;  %883 = vmatpush.msrb.mxu3 %v2875_v19 }
 0x232   :  { %970 = vmatpush.msrb.mxu0 %v2805_v1  ;;  %990 = vmatpush.msra.mxu1 %v2840_v9 }
 0x233   :  { %884 = vmatpush.msrb.mxu3 %v2885_v21 }
 0x234   :  { %971 = vmatpush.msrb.mxu0 %v2810_v2  ;;  %991 = vmatpush.msra.mxu1 %v2845_v10 }
 0x235   :  { %885 = vmatpush.msrb.mxu3 %v2910_v26 }
 0x236   :  { %972 = vmatpush.msrb.mxu0 %v2822_v5  ;;  %992 = vmatpush.msra.mxu1 %v2864_v16 }
 0x237   :  { %886 = vmatpush.msrb.mxu3 %v2920_v28 }
 0x238   :  { %973 = vmatpush.msrb.mxu0 %v2831_v7  ;;  %993 = vmatpush.msra.mxu1 %v2891_v22 }
 0x2ad   :  { %v613_v49 = vpop.f32.mrf.mxu0 }
 0x2ae   :  { %v660_v4 = vrot.slane %v613_v49, 2 }
 0x2b0   :  { %v662_v6 = vadd.f32 %v660_v4, %v2974_v40  ;;  %v633_v40 = vpop.f32.mrf.mxu1 }
 0x2b1   :  { %v634_v43 = vadd.f32 %v2980_v50, %v633_v40 }
 0x2b2   :  { %v2401_v8 = vmul.f32 -1.442695, %v662_v6 }
 0x2b3   :  { %v593_v11 = vpop.f32.mrf.mxu3  ;;  %v683_v48 = vrot.slane %v634_v43, 2 }
 0x2b4   :  { %2519 = vpow2.f32 %v2401_v8  ;;  %v637_v12 = vrot.slane %v593_v11, 2  ;;  %v695_v11 = vmul.f32 %v690_v63, %v2994_v30 }
 0x2b6   :  { %v639_v14 = vadd.f32 %v637_v12, %v2963_v33 }
 0x2b8   :  { %v2400_v17 = vmul.f32 -1.442695, %v639_v14 }
 0x2ba   :  { %v2520_v18 = vpop.eup %2519  ;;  %2521 = vpow2.f32 %v2400_v17 }
 0x2bb   :  { %v666_v20 = vadd.f32 1.0, %v2520_v18 }
 0x2bd   :  { %2523 = vrcp.f32 %v666_v20  ;;  %v678_v53 = vand.u32 2147483648, %v666_v20  ;;  %vm672_vm5 = vweird.f32 %v666_v20  ;;  %v676_v55 = vand.u32 2147483647, %v666_v20 }
 0x2bf   :  { %v679_v59 = vor.u32 1.1754944e-38, %v678_v53  ;;  %vm677_vm7 = vcmp.eq.f32.partialorder %v676_v55, 8.507059e+37 }
 0x2c0   :  { %v2522_v23 = vpop.eup %2521 }
 0x2c1   :  { %v643_v24 = vadd.f32 1.0, %v2522_v23 }
 0x2c3   :  { %2525 = vrcp.f32 %v643_v24  ;;  %v2524_v25 = vpop.eup %2523  ;;  %v655_v42 = vand.u32 2147483648, %v643_v24  ;;  %v653_v33 = vand.u32 2147483647, %v643_v24  ;;  %vm649_vm15 = vweird.f32 %v643_v24 }
 0x2c4   :  { %v668_v27 = vmul.f32 %v2524_v25, %v666_v20  ;;  %vm673_vm4 = vweird.f32 %v2524_v25 }
 0x2c5   :  { %v656_v47 = vor.u32 1.1754944e-38, %v655_v42  ;;  %vm654_vm2 = vcmp.eq.f32.partialorder %v653_v33, 8.507059e+37  ;;  %vm674_vm6 = vmor %vm672_vm5, %vm673_vm4 }
 0x2c6   :  { %v669_v32 = vsub.f32 1.0, %v668_v27 }
 0x2c8   :  { %v670_v45 = vmul.f32 %v2524_v25, %v669_v32 }
 0x2c9   :  { %v2526_v29 = vpop.eup %2525 }
 0x2ca   :  { %v645_v31 = vmul.f32 %v2526_v29, %v643_v24  ;;  %vm650_vm14 = vweird.f32 %v2526_v29  ;;  %v671_v52 = vadd.f32 %v2524_v25, %v670_v45 }
 0x2cb   :  { %vm651_vm1 = vmor %vm649_vm15, %vm650_vm14 }
 0x2cc   :  { %v646_v38 = vsub.f32 1.0, %v645_v31  ;;  %v675_v58 = vsel %vm674_vm6, %v2524_v25, %v671_v52  ;;  %v3127_v52 = vpop.permute.xlu1 %814 }
 0x2cd   :  { %v680_v60 = vsel %vm677_vm7, %v679_v59, %v675_v58 }
 0x2ce   :  { %v647_v44 = vmul.f32 %v2526_v29, %v646_v38  ;;  %v688_v61 = vsub.f32 1.0, %v680_v60  ;;  %v692_v4 = vmul.f32 %v690_v63, %v680_v60 }
 0x2d0   :  { %v648_v46 = vadd.f32 %v2526_v29, %v647_v44 }
 0x2d2   :  { %v652_v51 = vsel %vm651_vm1, %v2526_v29, %v648_v46  ;;  %v3125_v46 = vadd.f32 %v2985_v56, %v3026_v41 }
 0x2d3   :  { %v657_v36 = vsel %vm654_vm2, %v656_v47, %v652_v51 }
 0x2d4   :  { %v685_v54 = vmul.f32 %v683_v48, %v657_v36  ;;  %v3131_v41 = vpop.permute.xlu1 %821 }
 0x2d6   :  { %v686_v57 = vadd.f32 %v685_v54, %v2989_v0 }
 0x2d8   :  { %2527 = vtanh.f32 %v686_v57 }
 0x2de   :  { %v2528_v3 = vpop.eup %2527 }
 0x2df   :  { %v689_v49 = vmul.f32 %v2528_v3, %v688_v61 }
 0x2e1   :  { %v693_v6 = vadd.f32 %v692_v4, %v689_v49 }
 0x2e3   :  { %v694_v8 = vmul.f32 %v693_v6, %v2991_v13 }
 0x2e5   :  { %v696_v12 = vadd.f32 %v695_v11, %v694_v8 }
 0x2e7   :  { %v697_v0 = vmul.f32 %v696_v12, %v2991_v13  ;;  %v3095_v14 = vrot.slane %v696_v12, 6 }
 0x2e9   :  { %699 = vst.msk [vmem:[#allocation2] sm:$0xc0] %vm698_vm8, %v697_v0  ;;  %2402 = vmatmul.msk.f32.vlgmr.msrb.gmra.mxu2 %vm105_vm0, %v3095_v14  ;;  %2403 = vmatmul.msk.f32.vlgmr.msra.gmra.mxu3 %vm105_vm0, %v3095_v14  ;;  %v824_v63 = vmul.f32 %v3131_v41, %v3095_v14 }
 0x2ea   :  { %2404 = vmatmul.msk.f32.vlgmr.msra.gmra.mxu0 %vm105_vm0, %v3095_v14  ;;  %1010 = vmatpush.msrb.mxu2 %v2875_v19 }
 0x2eb   :  { %1097 = vmatpush.msra.mxu3 %v2805_v1  ;;  %1117 = vmatpush.msra.mxu0 %v2840_v9  ;;  %v3118_v1 = vadd.f32 %v2971_v37, %v3024_v39 }
 0x2ec   :  { %1011 = vmatpush.msrb.mxu2 %v2885_v21 }
 0x2ed   :  { %1098 = vmatpush.msra.mxu3 %v2810_v2  ;;  %1118 = vmatpush.msra.mxu0 %v2845_v10 }
 0x2ee   :  { %1012 = vmatpush.msrb.mxu2 %v2910_v26 }
 0x2ef   :  { %1099 = vmatpush.msra.mxu3 %v2822_v5  ;;  %1119 = vmatpush.msra.mxu0 %v2864_v16 }
 0x2f0   :  { %1013 = vmatpush.msrb.mxu2 %v2920_v28 }
 0x2f1   :  { %1100 = vmatpush.msra.mxu3 %v2831_v7  ;;  %1120 = vmatpush.msra.mxu0 %v2891_v22 }
 0x367   :  { %v761_v32 = vpop.f32.mrf.mxu0 }
 0x368   :  { %v762_v43 = vadd.f32 %v2980_v50, %v761_v32 }
 0x36c   :  { %v721_v9 = vpop.f32.mrf.mxu2  ;;  %v741_v2 = vpop.f32.mrf.mxu3 }
 0x36d   :  { %v764_v10 = vadd.f32 %v721_v9, %v2965_v34  ;;  %v784_v62 = vadd.f32 %v741_v2, %v3118_v1 }
 0x36f   :  { %v2405_v17 = vmul.f32 -1.442695, %v764_v10  ;;  %v2406_v5 = vmul.f32 -1.442695, %v784_v62  ;;  %v1213_v62 = vld [vmem:[#allocation3 + $0x18] sm:$0xff] }
 0x371   :  { %2529 = vpow2.f32 %v2405_v17  ;;  %v1212_v17 = vld [vmem:[#allocation3 + $0x10] sm:$0xff] }
 0x372   :  { %2531 = vpow2.f32 %v2406_v5 }
 0x377   :  { %v2530_v16 = vpop.eup %2529 }
 0x378   :  { %v2532_v18 = vpop.eup %2531  ;;  %v768_v20 = vadd.f32 1.0, %v2530_v16 }
 0x379   :  { %v788_v7 = vadd.f32 1.0, %v2532_v18  ;;  %v1211_v18 = vld [vmem:[#allocation3 + $0x8] sm:$0xff] }
 0x37a   :  { %2533 = vrcp.f32 %v768_v20  ;;  %v780_v25 = vand.u32 2147483648, %v768_v20  ;;  %v778_v31 = vand.u32 2147483647, %v768_v20  ;;  %vm774_vm11 = vweird.f32 %v768_v20 }
 0x37b   :  { %2535 = vrcp.f32 %v788_v7  ;;  %v800_v48 = vand.u32 2147483648, %v788_v7  ;;  %vm794_vm1 = vweird.f32 %v788_v7  ;;  %v798_v51 = vand.u32 2147483647, %v788_v7 }
 0x37c   :  { %v781_v42 = vor.u32 1.1754944e-38, %v780_v25  ;;  %vm779_vm14 = vcmp.eq.f32.partialorder %v778_v31, 8.507059e+37 }
 0x37d   :  { %v801_v54 = vor.u32 1.1754944e-38, %v800_v48  ;;  %vm799_vm4 = vcmp.eq.f32.partialorder %v798_v51, 8.507059e+37 }
 0x380   :  { %v2534_v22 = vpop.eup %2533 }
 0x381   :  { %v2536_v23 = vpop.eup %2535  ;;  %v770_v37 = vmul.f32 %v2534_v22, %v768_v20  ;;  %vm775_vm10 = vweird.f32 %v2534_v22 }
 0x382   :  { %v790_v39 = vmul.f32 %v2536_v23, %v788_v7  ;;  %vm776_vm12 = vmor %vm774_vm11, %vm775_vm10  ;;  %vm795_vm15 = vweird.f32 %v2536_v23 }
 0x383   :  { %v771_v24 = vsub.f32 1.0, %v770_v37  ;;  %vm796_vm2 = vmor %vm794_vm1, %vm795_vm15  ;;  %v1210_v37 = vld [vmem:[#allocation3] sm:$0xff] }
 0x384   :  { %v791_v27 = vsub.f32 1.0, %v790_v39 }
 0x385   :  { %v772_v29 = vmul.f32 %v2534_v22, %v771_v24 }
 0x386   :  { %v792_v40 = vmul.f32 %v2536_v23, %v791_v27 }
 0x387   :  { %v773_v38 = vadd.f32 %v2534_v22, %v772_v29 }
 0x388   :  { %v793_v45 = vadd.f32 %v2536_v23, %v792_v40 }
 0x389   :  { %v777_v44 = vsel %vm776_vm12, %v2534_v22, %v773_v38 }
 0x38a   :  { %v782_v33 = vsel %vm779_vm14, %v781_v42, %v777_v44  ;;  %v797_v53 = vsel %vm796_vm2, %v2536_v23, %v793_v45 }
 0x38b   :  { %v804_v47 = vmul.f32 %v782_v33, %v762_v43  ;;  %v802_v55 = vsel %vm799_vm4, %v801_v54, %v797_v53 }
 0x38c   :  { %v807_v57 = vsub.f32 1.0, %v802_v55  ;;  %v810_v56 = vmul.f32 %v802_v55, %v3095_v14 }
 0x38d   :  { %v805_v36 = vadd.f32 %v804_v47, %v3125_v46 }
 0x38f   :  { %2537 = vtanh.f32 %v805_v36 }
 0x395   :  { %v2538_v58 = vpop.eup %2537 }
 0x396   :  { %v808_v59 = vmul.f32 %v2538_v58, %v807_v57 }
 0x398   :  { %v811_v60 = vadd.f32 %v810_v56, %v808_v59 }
 0x39a   :  { %v817_v61 = vmul.f32 %v3127_v52, %v811_v60 }
 0x39c   :  { %v3136_v3 = vadd.f32 %v824_v63, %v817_v61 }
 0x39e   :  { %v826_v49 = vmul.f32 %v3136_v3, %v3127_v52  ;;  %2407 = vmatmul.msk.f32.vlgmr.msrb.gmra.mxu1 %vm105_vm0, %v3136_v3  ;;  %2408 = vmatmul.msk.f32.vlgmr.msra.gmra.mxu2 %vm105_vm0, %v3136_v3  ;;  %v945_v53 = vrot.slane %v3136_v3, 6 }
 0x39f   :  { %2409 = vmatmul.msk.f32.vlgmr.msrb.gmra.mxu3 %vm105_vm0, %v3136_v3  ;;  %1137 = vmatpush.msrb.mxu1 %v2875_v19  ;;  %v3167_v3 = vld [vmem:[#allocation2] sm:$0xff] }
 0x3a0   :  { %827 = vst.msk [vmem:[#allocation2 + $0x8] sm:$0x3] %vm315_vm9, %v826_v49  ;;  %1259 = vmatpush.msra.mxu2 %v1213_v62  ;;  %v950_v56 = vmul.f32 %v945_v53, %v3131_v41  ;;  %v1217_v62 = vld [vmem:[#allocation3 + $0x38] sm:$0xff] }
 0x3a1   :  { %1138 = vmatpush.msrb.mxu1 %v2885_v21  ;;  %1285 = vmatpush.msrb.mxu3 %v1217_v62 }
 0x3a2   :  { %1260 = vmatpush.msra.mxu2 %v1212_v17  ;;  %v1221_v17 = vld [vmem:[#allocation3 + $0x58] sm:$0xff] }
 0x3a3   :  { %1139 = vmatpush.msrb.mxu1 %v2910_v26 }
 0x3a4   :  { %1261 = vmatpush.msra.mxu2 %v1211_v18 }
 0x3a5   :  { %1140 = vmatpush.msrb.mxu1 %v2920_v28 }
 0x3a6   :  { %1262 = vmatpush.msra.mxu2 %v1210_v37  ;;  %v1215_v37 = vld [vmem:[#allocation3 + $0x28] sm:$0xff] }
 0x41b   :  { %v848_v4 = vpop.f32.mrf.mxu1 }
 0x41c   :  { %v892_v6 = vrot.slane %v848_v4, 6 }
 0x41e   :  { %v894_v8 = vadd.f32 %v892_v6, %v2965_v34 }
 0x420   :  { %v2410_v11 = vmul.f32 -1.442695, %v894_v8 }
 0x421   :  { %v868_v12 = vpop.f32.mrf.mxu2 }
 0x422   :  { %2539 = vpow2.f32 %v2410_v11  ;;  %v915_v0 = vrot.slane %v868_v12, 6  ;;  %v888_v5 = vpop.f32.mrf.mxu3 }
 0x423   :  { %v889_v7 = vadd.f32 %v2980_v50, %v888_v5  ;;  %v3173_v5 = vld [vmem:[#allocation6 + $0x18] sm:$0xff] }
 0x424   :  { %v917_v14 = vadd.f32 %v915_v0, %v3118_v1 }
 0x425   :  { %v938_v32 = vrot.slane %v889_v7, 6  ;;  %v1220_v7 = vld [vmem:[#allocation3 + $0x50] sm:$0xff] }
 0x426   :  { %v2411_v9 = vmul.f32 -1.442695, %v917_v14 }
 0x428   :  { %v2540_v19 = vpop.eup %2539  ;;  %2541 = vpow2.f32 %v2411_v9 }
 0x429   :  { %v898_v2 = vadd.f32 1.0, %v2540_v19 }
 0x42b   :  { %2543 = vrcp.f32 %v898_v2  ;;  %v910_v20 = vand.u32 2147483648, %v898_v2  ;;  %v908_v23 = vand.u32 2147483647, %v898_v2  ;;  %vm904_vm6 = vweird.f32 %v898_v2 }
 0x42d   :  { %v911_v27 = vor.u32 1.1754944e-38, %v910_v20  ;;  %vm909_vm10 = vcmp.eq.f32.partialorder %v908_v23, 8.507059e+37  ;;  %v1216_v20 = vld [vmem:[#allocation3 + $0x30] sm:$0xff] }
 0x42e   :  { %v2542_v21 = vpop.eup %2541  ;;  %v3176_v23 = vld [vmem:[#allocation6 + $0x10] sm:$0xff]  ;;  %1286 = vmatpush.msrb.mxu3 %v1216_v20 }
 0x42f   :  { %v921_v10 = vadd.f32 1.0, %v2542_v21 }
 0x430   :  { %1287 = vmatpush.msrb.mxu3 %v1215_v37 }
 0x431   :  { %v2544_v26 = vpop.eup %2543  ;;  %2545 = vrcp.f32 %v921_v10  ;;  %v933_v42 = vand.u32 2147483648, %v921_v10  ;;  %v931_v44 = vand.u32 2147483647, %v921_v10  ;;  %vm927_vm12 = vweird.f32 %v921_v10 }
 0x432   :  { %v900_v28 = vmul.f32 %v2544_v26, %v898_v2  ;;  %vm905_vm5 = vweird.f32 %v2544_v26 }
 0x433   :  { %vm906_vm7 = vmor %vm904_vm6, %vm905_vm5  ;;  %v934_v47 = vor.u32 1.1754944e-38, %v933_v42  ;;  %vm932_vm15 = vcmp.eq.f32.partialorder %v931_v44, 8.507059e+37 }
 0x434   :  { %v901_v16 = vsub.f32 1.0, %v900_v28 }
 0x436   :  { %v902_v22 = vmul.f32 %v2544_v26, %v901_v16 }
 0x437   :  { %v2546_v39 = vpop.eup %2545 }
 0x438   :  { %v923_v24 = vmul.f32 %v2546_v39, %v921_v10  ;;  %v903_v25 = vadd.f32 %v2544_v26, %v902_v22  ;;  %vm928_vm11 = vweird.f32 %v2546_v39 }
 0x439   :  { %vm929_vm14 = vmor %vm927_vm12, %vm928_vm11 }
 0x43a   :  { %v924_v29 = vsub.f32 1.0, %v923_v24  ;;  %v907_v31 = vsel %vm906_vm7, %v2544_v26, %v903_v25  ;;  %v1219_v25 = vld [vmem:[#allocation3 + $0x48] sm:$0xff] }
 0x43b   :  { %v912_v40 = vsel %vm909_vm10, %v911_v27, %v907_v31  ;;  %v3178_v27 = vld [vmem:[#allocation6 + $0x8] sm:$0xff] }
 0x43c   :  { %v925_v38 = vmul.f32 %v2546_v39, %v924_v29  ;;  %v940_v43 = vmul.f32 %v938_v32, %v912_v40  ;;  %v1214_v40 = vld [vmem:[#allocation3 + $0x20] sm:$0xff] }
 0x43d   :  { %1288 = vmatpush.msrb.mxu3 %v1214_v40  ;;  %v2649_v40 = vld [vmem:[%s3540_s4 + $0x3] ss:$0 sm:$0xff] }
 0x43e   :  { %v926_v33 = vadd.f32 %v2546_v39, %v925_v38  ;;  %v941_v45 = vadd.f32 %v940_v43, %v3125_v46  ;;  %v1218_v38 = vld [vmem:[#allocation3 + $0x40] sm:$0xff] }
 0x43f   :  { %v3182_v43 = vld [vmem:[#allocation6] sm:$0xff] }
 0x440   :  { %v930_v48 = vsel %vm929_vm14, %v2546_v39, %v926_v33  ;;  %2547 = vtanh.f32 %v941_v45 }
 0x441   :  { %v935_v51 = vsel %vm932_vm15, %v934_v47, %v930_v48 }
 0x442   :  { %v943_v36 = vsub.f32 1.0, %v935_v51  ;;  %v947_v57 = vmul.f32 %v945_v53, %v935_v51 }
 0x446   :  { %v2548_v54 = vpop.eup %2547 }
 0x447   :  { %v944_v55 = vmul.f32 %v2548_v54, %v943_v36 }
 0x449   :  { %v948_v58 = vadd.f32 %v947_v57, %v944_v55 }
 0x44b   :  { %v949_v59 = vmul.f32 %v948_v58, %v3127_v52 }
 0x44d   :  { %v3158_v60 = vadd.f32 %v950_v56, %v949_v59 }
 0x44f   :  { %v952_v61 = vmul.f32 %v3158_v60, %v3127_v52  ;;  %v955_v63 = vrot.slane %v3158_v60, 2  ;;  %v1072_v56 = vrot.slane %v3158_v60, 6  ;;  %v3201_v60 = vld [vmem:[#allocation6 + $0x30] sm:$0xff] }
 0x451   :  { %953 = vst.msk [vmem:[#allocation2 + $0x8] sm:$0xc] %vm442_vm3, %v952_v61  ;;  %2412 = vmatmul.msk.f32.vlgmr.msrb.gmra.mxu0 %vm105_vm0, %v955_v63  ;;  %2413 = vmatmul.msk.f32.vlgmr.msra.gmra.mxu1 %vm105_vm0, %v955_v63 }
 0x452   :  { %2414 = vmatmul.msk.f32.vlgmr.msrb.gmra.mxu2 %vm105_vm0, %v955_v63  ;;  %1311 = vmatpush.msrb.mxu0 %v1221_v17 }
 0x453   :  { %1334 = vmatpush.msra.mxu1 %v3173_v5 }
 0x454   :  { %1312 = vmatpush.msrb.mxu0 %v1220_v7 }
 0x455   :  { %1335 = vmatpush.msra.mxu1 %v3176_v23 }
 0x456   :  { %1313 = vmatpush.msrb.mxu0 %v1219_v25 }
 0x457   :  { %1336 = vmatpush.msra.mxu1 %v3178_v27 }
 0x458   :  { %1314 = vmatpush.msrb.mxu0 %v1218_v38 }
 0x459   :  { %1337 = vmatpush.msra.mxu1 %v3182_v43 }
 0x45a   :  { %2422 = vmatmul.msk.f32.vlgmr.msra.gmra.mxu2 %vm105_vm0, %v3167_v3 }
 0x4ce   :  { %v975_v49 = vpop.f32.mrf.mxu0  ;;  %v995_v4 = vpop.f32.mrf.mxu1 }
 0x4cf   :  { %v1019_v6 = vrot.slane %v975_v49, 4  ;;  %v1042_v8 = vrot.slane %v995_v4, 4 }
 0x4d1   :  { %v1021_v11 = vadd.f32 %v1019_v6, %v2965_v34  ;;  %v1044_v12 = vadd.f32 %v1042_v8, %v3118_v1  ;;  %v1077_v8 = vmul.f32 %v1072_v56, %v3131_v41 }
 0x4d3   :  { %v2415_v0 = vmul.f32 -1.442695, %v1021_v11  ;;  %v2416_v14 = vmul.f32 -1.442695, %v1044_v12 }
 0x4d5   :  { %2549 = vpow2.f32 %v2415_v0  ;;  %v1015_v18 = vpop.f32.mrf.mxu2 }
 0x4d6   :  { %2551 = vpow2.f32 %v2416_v14  ;;  %v1016_v29 = vadd.f32 %v2980_v50, %v1015_v18  ;;  %v3195_v14 = vld [vmem:[#allocation6 + $0x38] sm:$0xff] }
 0x4d8   :  { %v1065_v45 = vrot.slane %v1016_v29, 4 }
 0x4db   :  { %v2550_v9 = vpop.eup %2549 }
 0x4dc   :  { %v2552_v19 = vpop.eup %2551  ;;  %v1025_v2 = vadd.f32 1.0, %v2550_v9  ;;  %v3206_v9 = vld [vmem:[#allocation6 + $0x28] sm:$0xff] }
 0x4dd   :  { %v1048_v21 = vadd.f32 1.0, %v2552_v19  ;;  %v3214_v19 = vld [vmem:[#allocation6 + $0x20] sm:$0xff] }
 0x4de   :  { %2553 = vrcp.f32 %v1025_v2  ;;  %v1037_v24 = vand.u32 2147483648, %v1025_v2  ;;  %v1035_v32 = vand.u32 2147483647, %v1025_v2  ;;  %vm1031_vm2 = vweird.f32 %v1025_v2 }
 0x4df   :  { %2555 = vrcp.f32 %v1048_v21  ;;  %v1060_v51 = vand.u32 2147483648, %v1048_v21  ;;  %vm1054_vm7 = vweird.f32 %v1048_v21  ;;  %v1058_v53 = vand.u32 2147483647, %v1048_v21 }
 0x4e0   :  { %v1038_v33 = vor.u32 1.1754944e-38, %v1037_v24  ;;  %vm1036_vm5 = vcmp.eq.f32.partialorder %v1035_v32, 8.507059e+37  ;;  %v3231_v24 = vld [vmem:[#allocation6 + $0x58] sm:$0xff] }
 0x4e1   :  { %v1061_v57 = vor.u32 1.1754944e-38, %v1060_v51  ;;  %vm1059_vm11 = vcmp.eq.f32.partialorder %v1058_v53, 8.507059e+37  ;;  %1377 = vmatpush.msrb.mxu2 %v3231_v24  ;;  %v3244_v51 = vld [vmem:[#allocation6 + $0x48] sm:$0xff] }
 0x4e4   :  { %v2554_v10 = vpop.eup %2553 }
 0x4e5   :  { %v2556_v26 = vpop.eup %2555  ;;  %v1027_v28 = vmul.f32 %v2554_v10, %v1025_v2  ;;  %vm1032_vm1 = vweird.f32 %v2554_v10 }
 0x4e6   :  { %v1050_v16 = vmul.f32 %v2556_v26, %v1048_v21  ;;  %vm1033_vm4 = vmor %vm1031_vm2, %vm1032_vm1  ;;  %vm1055_vm6 = vweird.f32 %v2556_v26 }
 0x4e7   :  { %v1028_v22 = vsub.f32 1.0, %v1027_v28  ;;  %vm1056_vm10 = vmor %vm1054_vm7, %vm1055_vm6 }
 0x4e8   :  { %v1051_v39 = vsub.f32 1.0, %v1050_v16 }
 0x4e9   :  { %v1029_v31 = vmul.f32 %v2554_v10, %v1028_v22 }
 0x4ea   :  { %v1052_v42 = vmul.f32 %v2556_v26, %v1051_v39 }
 0x4eb   :  { %v1030_v44 = vadd.f32 %v2554_v10, %v1029_v31 }
 0x4ec   :  { %v1053_v48 = vadd.f32 %v2556_v26, %v1052_v42 }
 0x4ed   :  { %v1034_v50 = vsel %vm1033_vm4, %v2554_v10, %v1030_v44 }
 0x4ee   :  { %v1039_v47 = vsel %vm1036_vm5, %v1038_v33, %v1034_v50  ;;  %v1057_v55 = vsel %vm1056_vm10, %v2556_v26, %v1053_v48 }
 0x4ef   :  { %v1067_v36 = vmul.f32 %v1065_v45, %v1039_v47  ;;  %v1062_v58 = vsel %vm1059_vm11, %v1061_v57, %v1057_v55 }
 0x4f0   :  { %v1070_v59 = vsub.f32 1.0, %v1062_v58  ;;  %v1074_v49 = vmul.f32 %v1072_v56, %v1062_v58 }
 0x4f1   :  { %v1068_v54 = vadd.f32 %v1067_v36, %v3125_v46  ;;  %v3246_v36 = vld [vmem:[#allocation6 + $0x40] sm:$0xff] }
 0x4f3   :  { %2557 = vtanh.f32 %v1068_v54 }
 0x4f9   :  { %v2558_v61 = vpop.eup %2557 }
 0x4fa   :  { %v1071_v63 = vmul.f32 %v2558_v61, %v1070_v59 }
 0x4fc   :  { %v1075_v4 = vadd.f32 %v1074_v49, %v1071_v63 }
 0x4fe   :  { %v1076_v6 = vmul.f32 %v1075_v4, %v3127_v52 }
 0x500   :  { %v3190_v11 = vadd.f32 %v1077_v8, %v1076_v6 }
 0x502   :  { %v1079_v12 = vmul.f32 %v3190_v11, %v3127_v52  ;;  %v1082_v0 = vrot.slane %v3190_v11, 4 }
 0x504   :  { %1080 = vst.msk [vmem:[#allocation2 + $0x8] sm:$0x30] %vm570_vm13, %v1079_v12  ;;  %2417 = vmatmul.msk.f32.vlgmr.msra.gmra.mxu3 %vm105_vm0, %v1082_v0  ;;  %2418 = vmatmul.msk.f32.vlgmr.msra.gmra.mxu0 %vm105_vm0, %v1082_v0 }
 0x505   :  { %2419 = vmatmul.msk.f32.vlgmr.msrb.gmra.mxu1 %vm105_vm0, %v1082_v0  ;;  %1451 = vmatpush.msra.mxu3 %v3173_v5 }
 0x506   :  { %1354 = vmatpush.msrb.mxu1 %v3195_v14  ;;  %1471 = vmatpush.msra.mxu0 %v3195_v14 }
 0x507   :  { %1452 = vmatpush.msra.mxu3 %v3176_v23 }
 0x508   :  { %1355 = vmatpush.msrb.mxu1 %v3201_v60  ;;  %1472 = vmatpush.msra.mxu0 %v3201_v60 }
 0x509   :  { %1453 = vmatpush.msra.mxu3 %v3178_v27 }
 0x50a   :  { %1356 = vmatpush.msrb.mxu1 %v3206_v9  ;;  %1473 = vmatpush.msra.mxu0 %v3206_v9 }
 0x50b   :  { %1454 = vmatpush.msra.mxu3 %v3182_v43 }
 0x50c   :  { %2424 = vmatmul.msk.f32.vlgmr.msrb.gmra.mxu3 %vm105_vm0, %v3167_v3  ;;  %2426 = vmatmul.msk.f32.vlgmr.msrb.gmra.mxu0 %vm105_vm0, %v3167_v3 }
 0x50d   :  { %1338 = vmatmul.f32.vlgmr.msra.gmra.mxu1 %v2734_v15  ;;  %1474 = vmatpush.msra.mxu0 %v3214_v19 }
 0x50e   :  { %1357 = vmatpush.msrb.mxu1 %v3214_v19  ;;  %1598 = vmatpush.msrb.mxu3 %v3195_v14 }
 0x50f   :  { %1618 = vmatpush.msrb.mxu0 %v3231_v24 }
 0x510   :  { %1599 = vmatpush.msrb.mxu3 %v3201_v60  ;;  %1491 = vmatpush.msra.mxu1 %v3231_v24 }
 0x512   :  { %1600 = vmatpush.msrb.mxu3 %v3206_v9 }
 0x514   :  { %1601 = vmatpush.msrb.mxu3 %v3214_v19 }
 0x515   :  { %1358 = vmatmul.f32.vlgmr.msrb.gmra.mxu1 %v2734_v15 }
 0x581   :  { %v1122_v2 = vpop.f32.mrf.mxu0 }
 0x582   :  { %v1169_v21 = vrot.slane %v1122_v2, 2  ;;  %v1142_v29 = vpop.f32.mrf.mxu1 }
 0x583   :  { %v1143_v38 = vadd.f32 %v2649_v40, %v1142_v29 }
 0x584   :  { %v1171_v3 = vadd.f32 %v1169_v21, %v3118_v1  ;;  %v3233_v1 = vld [vmem:[#allocation6 + $0x50] sm:$0xff] }
 0x585   :  { %1378 = vmatpush.msrb.mxu2 %v3233_v1  ;;  %1492 = vmatpush.msra.mxu1 %v3233_v1  ;;  %v1192_v47 = vrot.slane %v1143_v38, 2 }
 0x586   :  { %v2421_v10 = vmul.f32 -1.442695, %v1171_v3  ;;  %1619 = vmatpush.msrb.mxu0 %v3233_v1 }
 0x587   :  { %v1102_v26 = vpop.f32.mrf.mxu3  ;;  %1379 = vmatpush.msrb.mxu2 %v3244_v51  ;;  %1493 = vmatpush.msra.mxu1 %v3244_v51 }
 0x588   :  { %2559 = vpow2.f32 %v2421_v10  ;;  %v1146_v28 = vrot.slane %v1102_v26, 2  ;;  %1620 = vmatpush.msrb.mxu0 %v3244_v51 }
 0x589   :  { %1380 = vmatpush.msrb.mxu2 %v3246_v36  ;;  %1494 = vmatpush.msra.mxu1 %v3246_v36 }
 0x58a   :  { %v1148_v62 = vadd.f32 %v1146_v28, %v2965_v34  ;;  %1621 = vmatpush.msrb.mxu0 %v3246_v36  ;;  %v1339_v26 = vpop.f32.mrf.mxu1  ;;  %v1264_v28 = vpop.f32.mrf.mxu2 }
 0x58b   :  { %1578 = vmatpush.msra.mxu2 %v3173_v5  ;;  %1705 = vmatpush.msrb.mxu1 %v3173_v5 }
 0x58c   :  { %v2420_v17 = vmul.f32 -1.442695, %v1148_v62 }
 0x58d   :  { %1579 = vmatpush.msra.mxu2 %v3176_v23  ;;  %1706 = vmatpush.msrb.mxu1 %v3176_v23 }
 0x58e   :  { %v2560_v16 = vpop.eup %2559  ;;  %2561 = vpow2.f32 %v2420_v17 }
 0x58f   :  { %v1175_v18 = vadd.f32 1.0, %v2560_v16  ;;  %1580 = vmatpush.msra.mxu2 %v3178_v27  ;;  %1707 = vmatpush.msrb.mxu1 %v3178_v27  ;;  %v1290_v16 = vpop.f32.mrf.mxu3 }
 0x591   :  { %2563 = vrcp.f32 %v1175_v18  ;;  %v1187_v55 = vand.u32 2147483648, %v1175_v18  ;;  %vm1181_vm4 = vweird.f32 %v1175_v18  ;;  %v1185_v58 = vand.u32 2147483647, %v1175_v18  ;;  %1581 = vmatpush.msra.mxu2 %v3182_v43  ;;  %1708 = vmatpush.msrb.mxu1 %v3182_v43 }
 0x593   :  { %v1188_v61 = vor.u32 1.1754944e-38, %v1187_v55  ;;  %vm1186_vm6 = vcmp.eq.f32.partialorder %v1185_v58, 8.507059e+37  ;;  %v3304_v55 = vld [vmem:[%s3543_s7 + $0x2] ss:$0 sm:$0xff]  ;;  %v1316_v58 = vpop.f32.mrf.mxu0 }
 0x594   :  { %v2562_v20 = vpop.eup %2561 }
 0x595   :  { %v1152_v7 = vadd.f32 1.0, %v2562_v20 }
 0x597   :  { %2565 = vrcp.f32 %v1152_v7  ;;  %v2564_v22 = vpop.eup %2563  ;;  %v1164_v32 = vand.u32 2147483648, %v1152_v7  ;;  %v1162_v44 = vand.u32 2147483647, %v1152_v7  ;;  %vm1158_vm14 = vweird.f32 %v1152_v7 }
 0x598   :  { %v1177_v37 = vmul.f32 %v2564_v22, %v1175_v18  ;;  %vm1182_vm2 = vweird.f32 %v2564_v22 }
 0x599   :  { %v1165_v45 = vor.u32 1.1754944e-38, %v1164_v32  ;;  %vm1163_vm1 = vcmp.eq.f32.partialorder %v1162_v44, 8.507059e+37  ;;  %vm1183_vm5 = vmor %vm1181_vm4, %vm1182_vm2 }
 0x59a   :  { %v1178_v34 = vsub.f32 1.0, %v1177_v37 }
 0x59c   :  { %v1179_v33 = vmul.f32 %v2564_v22, %v1178_v34 }
 0x59d   :  { %v2566_v39 = vpop.eup %2565 }
 0x59e   :  { %v1154_v25 = vmul.f32 %v2566_v39, %v1152_v7  ;;  %vm1159_vm12 = vweird.f32 %v2566_v39  ;;  %v1180_v53 = vadd.f32 %v2564_v22, %v1179_v33  ;;  %v1359_v7 = vpop.f32.mrf.mxu1 }
 0x59f   :  { %vm1160_vm15 = vmor %vm1158_vm14, %vm1159_vm12 }
 0x5a0   :  { %v1155_v31 = vsub.f32 1.0, %v1154_v25  ;;  %v1184_v56 = vsel %vm1183_vm5, %v2564_v22, %v1180_v53 }
 0x5a1   :  { %v1189_v63 = vsel %vm1186_vm6, %v1188_v61, %v1184_v56 }
 0x5a2   :  { %v1156_v42 = vmul.f32 %v2566_v39, %v1155_v31  ;;  %v1197_v49 = vsub.f32 1.0, %v1189_v63 }
 0x5a4   :  { %v1157_v50 = vadd.f32 %v2566_v39, %v1156_v42 }
 0x5a6   :  { %v1161_v48 = vsel %vm1160_vm15, %v2566_v39, %v1157_v50 }
 0x5a7   :  { %v1166_v54 = vsel %vm1163_vm1, %v1165_v45, %v1161_v48  ;;  %v3299_v48 = vld [vmem:[%s3543_s7 + $0x3] ss:$0 sm:$0xff] }
 0x5a8   :  { %v1194_v57 = vmul.f32 %v1192_v47, %v1166_v54 }
 0x5aa   :  { %v1195_v59 = vadd.f32 %v1194_v57, %v3125_v46  ;;  %v1199_v46 = vrot.slane %v3190_v11, 6  ;;  %v3279_v11 = vld [vmem:[%s3543_s7] ss:$0 sm:$0xff] }
 0x5ab   :  { %v3282_v62 = vadd.f32 %v3279_v11, %v1264_v28 }
 0x5ac   :  { %2567 = vtanh.f32 %v1195_v59  ;;  %v1201_v6 = vmul.f32 %v1199_v46, %v1189_v63  ;;  %v1204_v0 = vmul.f32 %v1199_v46, %v3131_v41 }
 0x5ad   :  { %v1385_v17 = vadd.f32 %v1339_v26, %v3282_v62 }
 0x5af   :  { %v2428_v20 = vmul.f32 -1.442695, %v1385_v17 }
 0x5b1   :  { %2569 = vpow2.f32 %v2428_v20 }
 0x5b2   :  { %v2568_v4 = vpop.eup %2567 }
 0x5b3   :  { %v1198_v8 = vmul.f32 %v2568_v4, %v1197_v49  ;;  %v3308_v49 = vadd.f32 %v3304_v55, %v1316_v58 }
 0x5b5   :  { %v1202_v12 = vadd.f32 %v1201_v6, %v1198_v8 }
 0x5b7   :  { %v1203_v2 = vmul.f32 %v1202_v12, %v3127_v52  ;;  %v2570_v39 = vpop.eup %2569 }
 0x5b8   :  { %v1389_v25 = vadd.f32 1.0, %v2570_v39 }
 0x5b9   :  { %v1205_v21 = vadd.f32 %v1204_v0, %v1203_v2 }
 0x5ba   :  { %v1401_v47 = vand.u32 2147483648, %v1389_v25  ;;  %vm1395_vm10 = vweird.f32 %v1389_v25  ;;  %v1399_v53 = vand.u32 2147483647, %v1389_v25 }
 0x5bb   :  { %v1206_v3 = vmul.f32 %v1205_v21, %v3127_v52 }
 0x5bc   :  { %v1402_v56 = vor.u32 1.1754944e-38, %v1401_v47  ;;  %vm1400_vm12 = vcmp.eq.f32.partialorder %v1399_v53, 8.507059e+37 }
 0x5bd   :  { %1207 = vst.msk [vmem:[#allocation2 + $0x8] sm:$0xc0] %vm698_vm8, %v1206_v3 }
 0x5c4   :  { %v1209_v10 = vld [vmem:[#allocation2 + $0x8] sm:$0xff] }
 0x5c5   :  { %2423 = vmatmul.msk.f32.gmra.mxu2 %vm105_vm0, %v1209_v10  ;;  %2425 = vmatmul.msk.f32.gmra.mxu3 %vm105_vm0, %v1209_v10 }
 0x5c6   :  { %2427 = vmatmul.msk.f32.gmra.mxu0 %vm105_vm0, %v1209_v10 }
 0x5cd   :  { %1381 = vmatmul.f32.vlgmr.msrb.gmra.mxu2 %v2734_v15  ;;  %v3287_v15 = vld [vmem:[%s3543_s7 + $0x1] ss:$0 sm:$0xff] }
 0x5ce   :  { %1725 = vmatpush.msrb.mxu2 %v3195_v14  ;;  %v3291_v18 = vadd.f32 %v3287_v15, %v1290_v16 }
 0x5d0   :  { %1726 = vmatpush.msrb.mxu2 %v3201_v60  ;;  %v1405_v22 = vadd.f32 %v1359_v7, %v3291_v18 }
 0x5d2   :  { %1727 = vmatpush.msrb.mxu2 %v3206_v9  ;;  %v2429_v37 = vmul.f32 -1.442695, %v1405_v22 }
 0x5d4   :  { %1728 = vmatpush.msrb.mxu2 %v3214_v19  ;;  %2571 = vpow2.f32 %v2429_v37 }
 0x5d5   :  { %2573 = vrcp.f32 %v1389_v25 }
 0x5da   :  { %v2572_v34 = vpop.eup %2571 }
 0x5db   :  { %v1409_v29 = vadd.f32 1.0, %v2572_v34  ;;  %v2574_v31 = vpop.eup %2573 }
 0x5dc   :  { %v1391_v32 = vmul.f32 %v2574_v31, %v1389_v25  ;;  %vm1396_vm7 = vweird.f32 %v2574_v31 }
 0x5dd   :  { %2575 = vrcp.f32 %v1409_v29  ;;  %vm1397_vm11 = vmor %vm1395_vm10, %vm1396_vm7  ;;  %v1421_v4 = vand.u32 2147483648, %v1409_v29  ;;  %vm1415_vm15 = vweird.f32 %v1409_v29  ;;  %v1419_v8 = vand.u32 2147483647, %v1409_v29 }
 0x5de   :  { %v1392_v38 = vsub.f32 1.0, %v1391_v32 }
 0x5df   :  { %v1422_v2 = vor.u32 1.1754944e-38, %v1421_v4  ;;  %vm1420_vm2 = vcmp.eq.f32.partialorder %v1419_v8, 8.507059e+37 }
 0x5e0   :  { %v1393_v44 = vmul.f32 %v2574_v31, %v1392_v38 }
 0x5e2   :  { %v1394_v45 = vadd.f32 %v2574_v31, %v1393_v44 }
 0x5e3   :  { %v2576_v40 = vpop.eup %2575 }
 0x5e4   :  { %v1411_v42 = vmul.f32 %v2576_v40, %v1409_v29  ;;  %v1398_v57 = vsel %vm1397_vm11, %v2574_v31, %v1394_v45  ;;  %vm1416_vm14 = vweird.f32 %v2576_v40 }
 0x5e5   :  { %v1403_v46 = vsel %vm1400_vm12, %v1402_v56, %v1398_v57  ;;  %vm1417_vm1 = vmor %vm1415_vm15, %vm1416_vm14 }
 0x5e6   :  { %v1412_v50 = vsub.f32 1.0, %v1411_v42 }
 0x5e8   :  { %v1413_v54 = vmul.f32 %v2576_v40, %v1412_v50 }
 0x5ea   :  { %v1414_v63 = vadd.f32 %v2576_v40, %v1413_v54 }
 0x5ec   :  { %v1418_v0 = vsel %vm1417_vm1, %v2576_v40, %v1414_v63 }
 0x5ed   :  { %v1423_v21 = vsel %vm1420_vm2, %v1422_v2, %v1418_v0 }
 0x5ee   :  { %v1428_v3 = vsub.f32 1.0, %v1423_v21  ;;  %v1430_v28 = vmul.f32 0.0, %v1423_v21 }
 0x648   :  { %v3294_v33 = vpop.f32.mrf.mxu2  ;;  %v3338_v22 = vpop.f32.mrf.mxu3 }
 0x650   :  { %v1382_v59 = vpop.f32.mrf.mxu2 }
 0x651   :  { %v1383_v61 = vadd.f32 %v3299_v48, %v1382_v59 }
 0x653   :  { %v1425_v6 = vmul.f32 %v1403_v46, %v1383_v61 }
 0x655   :  { %v1426_v12 = vadd.f32 %v1425_v6, %v3308_v49 }
 0x657   :  { %2577 = vtanh.f32 %v1426_v12 }
 0x65d   :  { %v2578_v10 = vpop.eup %2577 }
 0x65e   :  { %v1429_v26 = vmul.f32 %v2578_v10, %v1428_v3 }
 0x660   :  { %v1431_v17 = vadd.f32 %v1430_v28, %v1429_v26 }
 0x662   :  { %v1432_v16 = vmul.f32 %v1431_v17, %v2991_v13 }
 0x664   :  { %v3313_v20 = vadd.f32 %v1432_v16, %v2998_v35  ;;  %v3336_v35 = vpop.f32.mrf.mxu0 }
 0x666   :  { %v1434_v7 = vmul.f32 %v3313_v20, %v2991_v13  ;;  %2430 = vmatmul.msk.f32.vlgmr.msra.gmra.mxu3 %vm105_vm0, %v3313_v20  ;;  %2431 = vmatmul.msk.f32.vlgmr.msra.gmra.mxu0 %vm105_vm0, %v3313_v20 }
 0x667   :  { %2432 = vmatmul.msk.f32.vlgmr.msra.gmra.mxu1 %vm105_vm0, %v3313_v20  ;;  %1745 = vmatpush.msra.mxu3 %v3231_v24 }
 0x668   :  { %1435 = vst.msk [vmem:[#allocation2] sm:$0x3] %vm315_vm9, %v1434_v7  ;;  %1832 = vmatpush.msra.mxu0 %v3173_v5  ;;  %1852 = vmatpush.msra.mxu1 %v3195_v14 }
 0x669   :  { %1746 = vmatpush.msra.mxu3 %v3233_v1 }
 0x66a   :  { %1833 = vmatpush.msra.mxu0 %v3176_v23  ;;  %1853 = vmatpush.msra.mxu1 %v3201_v60 }
 0x66b   :  { %1747 = vmatpush.msra.mxu3 %v3244_v51 }
 0x66c   :  { %1834 = vmatpush.msra.mxu0 %v3178_v27  ;;  %1854 = vmatpush.msra.mxu1 %v3206_v9 }
 0x66d   :  { %1748 = vmatpush.msra.mxu3 %v3246_v36 }
 0x66e   :  { %1835 = vmatpush.msra.mxu0 %v3182_v43  ;;  %1855 = vmatpush.msra.mxu1 %v3214_v19 }
 0x6e3   :  { %v1476_v37 = vpop.f32.mrf.mxu0 }
 0x6e4   :  { %v1523_v39 = vrot.slane %v1476_v37, 6  ;;  %v1496_v58 = vpop.f32.mrf.mxu1 }
 0x6e5   :  { %v1497_v61 = vadd.f32 %v3299_v48, %v1496_v58 }
 0x6e6   :  { %v1525_v25 = vadd.f32 %v1523_v39, %v3291_v18  ;;  %v1553_v39 = vrot.slane %v3313_v20, 6 }
 0x6e7   :  { %v1546_v12 = vrot.slane %v1497_v61, 6 }
 0x6e8   :  { %v2434_v34 = vmul.f32 -1.442695, %v1525_v25 }
 0x6e9   :  { %v1456_v29 = vpop.f32.mrf.mxu3 }
 0x6ea   :  { %2579 = vpow2.f32 %v2434_v34  ;;  %v1500_v31 = vrot.slane %v1456_v29, 6 }
 0x6ec   :  { %v1502_v32 = vadd.f32 %v1500_v31, %v3282_v62 }
 0x6ee   :  { %v2433_v40 = vmul.f32 -1.442695, %v1502_v32 }
 0x6f0   :  { %v2580_v38 = vpop.eup %2579  ;;  %2581 = vpow2.f32 %v2433_v40  ;;  %v1558_v40 = vmul.f32 %v1553_v39, %v2994_v30 }
 0x6f1   :  { %v1529_v42 = vadd.f32 1.0, %v2580_v38 }
 0x6f3   :  { %2583 = vrcp.f32 %v1529_v42  ;;  %v1541_v3 = vand.u32 2147483648, %v1529_v42  ;;  %vm1535_vm11 = vweird.f32 %v1529_v42  ;;  %v1539_v26 = vand.u32 2147483647, %v1529_v42 }
 0x6f5   :  { %v1542_v16 = vor.u32 1.1754944e-38, %v1541_v3  ;;  %vm1540_vm14 = vcmp.eq.f32.partialorder %v1539_v26, 8.507059e+37 }
 0x6f6   :  { %v2582_v44 = vpop.eup %2581 }
 0x6f7   :  { %v1506_v50 = vadd.f32 1.0, %v2582_v44 }
 0x6f9   :  { %2585 = vrcp.f32 %v1506_v50  ;;  %v2584_v45 = vpop.eup %2583  ;;  %v1518_v56 = vand.u32 2147483648, %v1506_v50  ;;  %v1516_v46 = vand.u32 2147483647, %v1506_v50  ;;  %vm1512_vm5 = vweird.f32 %v1506_v50 }
 0x6fa   :  { %v1531_v47 = vmul.f32 %v2584_v45, %v1529_v42  ;;  %vm1536_vm10 = vweird.f32 %v2584_v45 }
 0x6fb   :  { %v1519_v8 = vor.u32 1.1754944e-38, %v1518_v56  ;;  %vm1517_vm7 = vcmp.eq.f32.partialorder %v1516_v46, 8.507059e+37  ;;  %vm1537_vm12 = vmor %vm1535_vm11, %vm1536_vm10 }
 0x6fc   :  { %v1532_v57 = vsub.f32 1.0, %v1531_v47 }
 0x6fe   :  { %v1533_v4 = vmul.f32 %v2584_v45, %v1532_v57 }
 0x6ff   :  { %v2586_v53 = vpop.eup %2585 }
 0x700   :  { %v1508_v54 = vmul.f32 %v2586_v53, %v1506_v50  ;;  %vm1513_vm4 = vweird.f32 %v2586_v53  ;;  %v1534_v2 = vadd.f32 %v2584_v45, %v1533_v4 }
 0x701   :  { %vm1514_vm6 = vmor %vm1512_vm5, %vm1513_vm4 }
 0x702   :  { %v1509_v59 = vsub.f32 1.0, %v1508_v54  ;;  %v1538_v17 = vsel %vm1537_vm12, %v2584_v45, %v1534_v2 }
 0x703   :  { %v1543_v7 = vsel %vm1540_vm14, %v1542_v16, %v1538_v17 }
 0x704   :  { %v1510_v63 = vmul.f32 %v2586_v53, %v1509_v59  ;;  %v1551_v37 = vsub.f32 1.0, %v1543_v7  ;;  %v1555_v29 = vmul.f32 %v1553_v39, %v1543_v7 }
 0x706   :  { %v1511_v6 = vadd.f32 %v2586_v53, %v1510_v63 }
 0x708   :  { %v1515_v0 = vsel %vm1514_vm6, %v2586_v53, %v1511_v6 }
 0x709   :  { %v1520_v21 = vsel %vm1517_vm7, %v1519_v8, %v1515_v0 }
 0x70a   :  { %v1548_v10 = vmul.f32 %v1546_v12, %v1520_v21 }
 0x70c   :  { %v1549_v28 = vadd.f32 %v1548_v10, %v3308_v49 }
 0x70e   :  { %2587 = vtanh.f32 %v1549_v28 }
 0x714   :  { %v2588_v25 = vpop.eup %2587 }
 0x715   :  { %v1552_v34 = vmul.f32 %v2588_v25, %v1551_v37 }
 0x717   :  { %v1556_v31 = vadd.f32 %v1555_v29, %v1552_v34 }
 0x719   :  { %v1557_v32 = vmul.f32 %v1556_v31, %v2991_v13 }
 0x71b   :  { %v3347_v38 = vadd.f32 %v1558_v40, %v1557_v32 }
 0x71d   :  { %v1560_v42 = vmul.f32 %v3347_v38, %v2991_v13  ;;  %v1563_v44 = vrot.slane %v3347_v38, 2 }
 0x71f   :  { %1561 = vst.msk [vmem:[#allocation2] sm:$0xc] %vm442_vm3, %v1560_v42  ;;  %2435 = vmatmul.msk.f32.vlgmr.msra.gmra.mxu2 %vm105_vm0, %v1563_v44  ;;  %2436 = vmatmul.msk.f32.vlgmr.msrb.gmra.mxu3 %vm105_vm0, %v1563_v44 }
 0x720   :  { %2437 = vmatmul.msk.f32.vlgmr.msrb.gmra.mxu0 %vm105_vm0, %v1563_v44  ;;  %1872 = vmatpush.msra.mxu2 %v3231_v24 }
 0x721   :  { %1948 = vmatpush.msrb.mxu3 %v3173_v5  ;;  %1968 = vmatpush.msrb.mxu0 %v3195_v14 }
 0x722   :  { %1873 = vmatpush.msra.mxu2 %v3233_v1 }
 0x723   :  { %1949 = vmatpush.msrb.mxu3 %v3176_v23  ;;  %1969 = vmatpush.msrb.mxu0 %v3201_v60 }
 0x724   :  { %1874 = vmatpush.msra.mxu2 %v3244_v51 }
 0x725   :  { %1950 = vmatpush.msrb.mxu3 %v3178_v27  ;;  %1970 = vmatpush.msrb.mxu0 %v3206_v9 }
 0x726   :  { %1875 = vmatpush.msra.mxu2 %v3246_v36 }
 0x727   :  { %1951 = vmatpush.msrb.mxu3 %v3182_v43  ;;  %1971 = vmatpush.msrb.mxu0 %v3214_v19 }
 0x79d   :  { %v1623_v8 = vpop.f32.mrf.mxu0 }
 0x79e   :  { %v1624_v3 = vadd.f32 %v3299_v48, %v1623_v8 }
 0x7a0   :  { %v1673_v7 = vrot.slane %v1624_v3, 4 }
 0x7a2   :  { %v1583_v20 = vpop.f32.mrf.mxu2  ;;  %v1603_v50 = vpop.f32.mrf.mxu3 }
 0x7a3   :  { %v1627_v45 = vrot.slane %v1583_v20, 4  ;;  %v1650_v47 = vrot.slane %v1603_v50, 4  ;;  %v1680_v50 = vrot.slane %v3347_v38, 6 }
 0x7a5   :  { %v1629_v53 = vadd.f32 %v1627_v45, %v3282_v62  ;;  %v1652_v54 = vadd.f32 %v1650_v47, %v3291_v18 }
 0x7a7   :  { %v2438_v57 = vmul.f32 -1.442695, %v1629_v53  ;;  %v2439_v58 = vmul.f32 -1.442695, %v1652_v54 }
 0x7a9   :  { %2589 = vpow2.f32 %v2438_v57 }
 0x7aa   :  { %2591 = vpow2.f32 %v2439_v58  ;;  %v1685_v58 = vmul.f32 %v1680_v50, %v2994_v30 }
 0x7af   :  { %v2590_v59 = vpop.eup %2589 }
 0x7b0   :  { %v2592_v56 = vpop.eup %2591  ;;  %v1633_v61 = vadd.f32 1.0, %v2590_v59 }
 0x7b1   :  { %v1656_v63 = vadd.f32 1.0, %v2592_v56 }
 0x7b2   :  { %2593 = vrcp.f32 %v1633_v61  ;;  %v1645_v2 = vand.u32 2147483648, %v1633_v61  ;;  %v1643_v26 = vand.u32 2147483647, %v1633_v61  ;;  %vm1639_vm1 = vweird.f32 %v1633_v61 }
 0x7b3   :  { %2595 = vrcp.f32 %v1656_v63  ;;  %v1668_v29 = vand.u32 2147483648, %v1656_v63  ;;  %vm1662_vm6 = vweird.f32 %v1656_v63  ;;  %v1666_v31 = vand.u32 2147483647, %v1656_v63 }
 0x7b4   :  { %v1646_v16 = vor.u32 1.1754944e-38, %v1645_v2  ;;  %vm1644_vm4 = vcmp.eq.f32.partialorder %v1643_v26, 8.507059e+37 }
 0x7b5   :  { %v1669_v42 = vor.u32 1.1754944e-38, %v1668_v29  ;;  %vm1667_vm10 = vcmp.eq.f32.partialorder %v1666_v31, 8.507059e+37 }
 0x7b8   :  { %v2594_v46 = vpop.eup %2593 }
 0x7b9   :  { %v2596_v4 = vpop.eup %2595  ;;  %v1635_v6 = vmul.f32 %v2594_v46, %v1633_v61  ;;  %vm1640_vm15 = vweird.f32 %v2594_v46 }
 0x7ba   :  { %v1658_v12 = vmul.f32 %v2596_v4, %v1656_v63  ;;  %vm1641_vm2 = vmor %vm1639_vm1, %vm1640_vm15  ;;  %vm1663_vm5 = vweird.f32 %v2596_v4 }
 0x7bb   :  { %v1636_v0 = vsub.f32 1.0, %v1635_v6  ;;  %vm1664_vm7 = vmor %vm1662_vm6, %vm1663_vm5 }
 0x7bc   :  { %v1659_v21 = vsub.f32 1.0, %v1658_v12 }
 0x7bd   :  { %v1637_v10 = vmul.f32 %v2594_v46, %v1636_v0 }
 0x7be   :  { %v1660_v28 = vmul.f32 %v2596_v4, %v1659_v21 }
 0x7bf   :  { %v1638_v17 = vadd.f32 %v2594_v46, %v1637_v10 }
 0x7c0   :  { %v1661_v25 = vadd.f32 %v2596_v4, %v1660_v28 }
 0x7c1   :  { %v1642_v37 = vsel %vm1641_vm2, %v2594_v46, %v1638_v17 }
 0x7c2   :  { %v1647_v39 = vsel %vm1644_vm4, %v1646_v16, %v1642_v37  ;;  %v1665_v40 = vsel %vm1664_vm7, %v2596_v4, %v1661_v25 }
 0x7c3   :  { %v1675_v34 = vmul.f32 %v1673_v7, %v1647_v39  ;;  %v1670_v44 = vsel %vm1667_vm10, %v1669_v42, %v1665_v40 }
 0x7c4   :  { %v1678_v20 = vsub.f32 1.0, %v1670_v44  ;;  %v1682_v53 = vmul.f32 %v1680_v50, %v1670_v44 }
 0x7c5   :  { %v1676_v32 = vadd.f32 %v1675_v34, %v3308_v49 }
 0x7c7   :  { %2597 = vtanh.f32 %v1676_v32 }
 0x7cd   :  { %v2598_v45 = vpop.eup %2597 }
 0x7ce   :  { %v1679_v47 = vmul.f32 %v2598_v45, %v1678_v20 }
 0x7d0   :  { %v1683_v54 = vadd.f32 %v1682_v53, %v1679_v47 }
 0x7d2   :  { %v1684_v57 = vmul.f32 %v1683_v54, %v2991_v13 }
 0x7d4   :  { %v3375_v59 = vadd.f32 %v1685_v58, %v1684_v57 }
 0x7d6   :  { %v1687_v56 = vmul.f32 %v3375_v59, %v2991_v13  ;;  %v1690_v61 = vrot.slane %v3375_v59, 4 }
 0x7d8   :  { %1688 = vst.msk [vmem:[#allocation2] sm:$0x30] %vm570_vm13, %v1687_v56  ;;  %2440 = vmatmul.msk.f32.vlgmr.msrb.gmra.mxu1 %vm105_vm0, %v1690_v61  ;;  %2441 = vmatmul.msk.f32.vlgmr.msrb.gmra.mxu2 %vm105_vm0, %v1690_v61 }
 0x7d9   :  { %2442 = vmatmul.msk.f32.vlgmr.msra.gmra.mxu3 %vm105_vm0, %v1690_v61  ;;  %1988 = vmatpush.msrb.mxu1 %v3231_v24  ;;  %v1807_v61 = vrot.slane %v3375_v59, 6 }
 0x7da   :  { %2075 = vmatpush.msrb.mxu2 %v3173_v5  ;;  %2095 = vmatpush.msra.mxu3 %v3195_v14 }
 0x7db   :  { %1989 = vmatpush.msrb.mxu1 %v3233_v1 }
 0x7dc   :  { %2076 = vmatpush.msrb.mxu2 %v3176_v23  ;;  %2096 = vmatpush.msra.mxu3 %v3201_v60 }
 0x7dd   :  { %1990 = vmatpush.msrb.mxu1 %v3244_v51 }
 0x7de   :  { %2077 = vmatpush.msrb.mxu2 %v3178_v27  ;;  %2097 = vmatpush.msra.mxu3 %v3206_v9 }
 0x7df   :  { %1991 = vmatpush.msrb.mxu1 %v3246_v36 }
 0x7e0   :  { %2078 = vmatpush.msrb.mxu2 %v3182_v43  ;;  %2098 = vmatpush.msra.mxu3 %v3214_v19 }
 0x855   :  { %v1710_v38 = vpop.f32.mrf.mxu1 }
 0x856   :  { %v1754_v63 = vrot.slane %v1710_v38, 2 }
 0x858   :  { %v1756_v46 = vadd.f32 %v1754_v63, %v3282_v62 }
 0x85a   :  { %v2443_v4 = vmul.f32 -1.442695, %v1756_v46 }
 0x85b   :  { %v1730_v6 = vpop.f32.mrf.mxu2 }
 0x85c   :  { %2599 = vpow2.f32 %v2443_v4  ;;  %v1777_v8 = vrot.slane %v1730_v6, 2  ;;  %v1750_v17 = vpop.f32.mrf.mxu3 }
 0x85d   :  { %v1751_v62 = vadd.f32 %v3299_v48, %v1750_v17 }
 0x85e   :  { %v1779_v12 = vadd.f32 %v1777_v8, %v3291_v18  ;;  %v1812_v8 = vmul.f32 %v1807_v61, %v2994_v30  ;;  %v3431_v30 = vadd.f32 %v3287_v15, %v3338_v22 }
 0x85f   :  { %v1800_v40 = vrot.slane %v1751_v62, 2 }
 0x860   :  { %v2444_v0 = vmul.f32 -1.442695, %v1779_v12 }
 0x862   :  { %v2600_v2 = vpop.eup %2599  ;;  %2601 = vpow2.f32 %v2444_v0 }
 0x863   :  { %v1760_v21 = vadd.f32 1.0, %v2600_v2 }
 0x865   :  { %2603 = vrcp.f32 %v1760_v21  ;;  %v1772_v7 = vand.u32 2147483648, %v1760_v21  ;;  %v1770_v39 = vand.u32 2147483647, %v1760_v21  ;;  %vm1766_vm12 = vweird.f32 %v1760_v21 }
 0x867   :  { %v1773_v29 = vor.u32 1.1754944e-38, %v1772_v7  ;;  %vm1771_vm15 = vcmp.eq.f32.partialorder %v1770_v39, 8.507059e+37 }
 0x868   :  { %v2602_v3 = vpop.eup %2601 }
 0x869   :  { %v1783_v10 = vadd.f32 1.0, %v2602_v3 }
 0x86b   :  { %v2604_v26 = vpop.eup %2603  ;;  %2605 = vrcp.f32 %v1783_v10  ;;  %v1795_v20 = vand.u32 2147483648, %v1783_v10  ;;  %v1793_v45 = vand.u32 2147483647, %v1783_v10  ;;  %vm1789_vm2 = vweird.f32 %v1783_v10 }
 0x86c   :  { %v1762_v28 = vmul.f32 %v2604_v26, %v1760_v21  ;;  %vm1767_vm11 = vweird.f32 %v2604_v26 }
 0x86d   :  { %vm1768_vm14 = vmor %vm1766_vm12, %vm1767_vm11  ;;  %v1796_v54 = vor.u32 1.1754944e-38, %v1795_v20  ;;  %vm1794_vm5 = vcmp.eq.f32.partialorder %v1793_v45, 8.507059e+37 }
 0x86e   :  { %v1763_v16 = vsub.f32 1.0, %v1762_v28 }
 0x870   :  { %v1764_v37 = vmul.f32 %v2604_v26, %v1763_v16 }
 0x871   :  { %v2606_v25 = vpop.eup %2605 }
 0x872   :  { %v1785_v18 = vmul.f32 %v2606_v25, %v1783_v10  ;;  %v1765_v34 = vadd.f32 %v2604_v26, %v1764_v37  ;;  %vm1790_vm1 = vweird.f32 %v2606_v25 }
 0x873   :  { %vm1791_vm4 = vmor %vm1789_vm2, %vm1790_vm1 }
 0x874   :  { %v1786_v31 = vsub.f32 1.0, %v1785_v18  ;;  %v1769_v32 = vsel %vm1768_vm14, %v2604_v26, %v1765_v34  ;;  %v3438_v34 = vadd.f32 %v3304_v55, %v3336_v35 }
 0x875   :  { %v1774_v42 = vsel %vm1771_vm15, %v1773_v29, %v1769_v32 }
 0x876   :  { %v1787_v44 = vmul.f32 %v2606_v25, %v1786_v31  ;;  %v1802_v50 = vmul.f32 %v1800_v40, %v1774_v42 }
 0x878   :  { %v1788_v47 = vadd.f32 %v2606_v25, %v1787_v44  ;;  %v1803_v53 = vadd.f32 %v1802_v50, %v3308_v49 }
 0x87a   :  { %v1792_v57 = vsel %vm1791_vm4, %v2606_v25, %v1788_v47  ;;  %2607 = vtanh.f32 %v1803_v53 }
 0x87b   :  { %v1797_v58 = vsel %vm1794_vm5, %v1796_v54, %v1792_v57 }
 0x87c   :  { %v1805_v56 = vsub.f32 1.0, %v1797_v58  ;;  %v1809_v46 = vmul.f32 %v1807_v61, %v1797_v58 }
 0x880   :  { %v2608_v38 = vpop.eup %2607 }
 0x881   :  { %v1806_v63 = vmul.f32 %v2608_v38, %v1805_v56 }
 0x883   :  { %v1810_v4 = vadd.f32 %v1809_v46, %v1806_v63 }
 0x885   :  { %v1811_v6 = vmul.f32 %v1810_v4, %v2991_v13 }
 0x887   :  { %v1813_v12 = vadd.f32 %v1812_v8, %v1811_v6 }
 0x889   :  { %v1814_v49 = vmul.f32 %v1813_v12, %v2991_v13  ;;  %v3404_v0 = vrot.slane %v1813_v12, 6  ;;  %v3427_v13 = vadd.f32 %v3279_v11, %v3294_v33 }
 0x88b   :  { %1815 = vst.msk [vmem:[#allocation2] sm:$0xc0] %vm698_vm8, %v1814_v49  ;;  %2445 = vmatmul.msk.f32.vlgmr.msra.gmra.mxu0 %vm105_vm0, %v3404_v0  ;;  %2446 = vmatmul.msk.f32.vlgmr.msra.gmra.mxu1 %vm105_vm0, %v3404_v0  ;;  %v1929_v35 = vmul.f32 %v3404_v0, %v3131_v41 }
 0x88c   :  { %2447 = vmatmul.msk.f32.vlgmr.msra.gmra.mxu2 %vm105_vm0, %v3404_v0  ;;  %2115 = vmatpush.msra.mxu0 %v3231_v24 }
 0x88d   :  { %2202 = vmatpush.msra.mxu1 %v3173_v5  ;;  %2222 = vmatpush.msra.mxu2 %v3195_v14 }
 0x88e   :  { %2116 = vmatpush.msra.mxu0 %v3233_v1 }
 0x88f   :  { %2203 = vmatpush.msra.mxu1 %v3176_v23  ;;  %2223 = vmatpush.msra.mxu2 %v3201_v60 }
 0x890   :  { %2117 = vmatpush.msra.mxu0 %v3244_v51 }
 0x891   :  { %2204 = vmatpush.msra.mxu1 %v3178_v27  ;;  %2224 = vmatpush.msra.mxu2 %v3206_v9 }
 0x892   :  { %2118 = vmatpush.msra.mxu0 %v3246_v36 }
 0x893   :  { %2205 = vmatpush.msra.mxu1 %v3182_v43  ;;  %2225 = vmatpush.msra.mxu2 %v3214_v19 }
 0x908   :  { %v1837_v5 = vpop.f32.mrf.mxu0  ;;  %v1857_v23 = vpop.f32.mrf.mxu1 }
 0x909   :  { %v1880_v27 = vadd.f32 %v1837_v5, %v3427_v13  ;;  %v1900_v14 = vadd.f32 %v1857_v23, %v3431_v30  ;;  %v2318_v23 = vld [vmem:[%s3544_s8 + $0x18] sm:$0xff] }
 0x90b   :  { %v2448_v60 = vmul.f32 -1.442695, %v1880_v27  ;;  %v2449_v9 = vmul.f32 -1.442695, %v1900_v14  ;;  %v2317_v27 = vld [vmem:[%s3544_s8 + $0x10] sm:$0xff] }
 0x90d   :  { %2609 = vpow2.f32 %v2448_v60 }
 0x90e   :  { %2611 = vpow2.f32 %v2449_v9 }
 0x90f   :  { %v1877_v16 = vpop.f32.mrf.mxu2 }
 0x910   :  { %v1878_v37 = vadd.f32 %v3299_v48, %v1877_v16 }
 0x913   :  { %v2610_v43 = vpop.eup %2609 }
 0x914   :  { %v2612_v19 = vpop.eup %2611  ;;  %v1884_v59 = vadd.f32 1.0, %v2610_v43  ;;  %v2316_v43 = vld [vmem:[%s3544_s8 + $0x8] sm:$0xff] }
 0x915   :  { %v1904_v2 = vadd.f32 1.0, %v2612_v19 }
 0x916   :  { %2613 = vrcp.f32 %v1884_v59  ;;  %v1896_v10 = vand.u32 2147483648, %v1884_v59  ;;  %v1894_v28 = vand.u32 2147483647, %v1884_v59  ;;  %vm1890_vm7 = vweird.f32 %v1884_v59 }
 0x917   :  { %2615 = vrcp.f32 %v1904_v2  ;;  %v1916_v29 = vand.u32 2147483648, %v1904_v2  ;;  %vm1910_vm14 = vweird.f32 %v1904_v2  ;;  %v1914_v32 = vand.u32 2147483647, %v1904_v2 }
 0x918   :  { %v1897_v62 = vor.u32 1.1754944e-38, %v1896_v10  ;;  %vm1895_vm11 = vcmp.eq.f32.partialorder %v1894_v28, 8.507059e+37 }
 0x919   :  { %v1917_v44 = vor.u32 1.1754944e-38, %v1916_v29  ;;  %vm1915_vm1 = vcmp.eq.f32.partialorder %v1914_v32, 8.507059e+37 }
 0x91c   :  { %v2614_v11 = vpop.eup %2613 }
 0x91d   :  { %v2616_v33 = vpop.eup %2615  ;;  %v1886_v15 = vmul.f32 %v2614_v11, %v1884_v59  ;;  %vm1891_vm6 = vweird.f32 %v2614_v11 }
 0x91e   :  { %v1906_v22 = vmul.f32 %v2616_v33, %v1904_v2  ;;  %vm1892_vm10 = vmor %vm1890_vm7, %vm1891_vm6  ;;  %vm1911_vm12 = vweird.f32 %v2616_v33 }
 0x91f   :  { %v1887_v21 = vsub.f32 1.0, %v1886_v15  ;;  %vm1912_vm15 = vmor %vm1910_vm14, %vm1911_vm12 }
 0x920   :  { %v1907_v3 = vsub.f32 1.0, %v1906_v22 }
 0x921   :  { %v1888_v26 = vmul.f32 %v2614_v11, %v1887_v21 }
 0x922   :  { %v1908_v17 = vmul.f32 %v2616_v33, %v1907_v3 }
 0x923   :  { %v1889_v7 = vadd.f32 %v2614_v11, %v1888_v26 }
 0x924   :  { %v1909_v25 = vadd.f32 %v2616_v33, %v1908_v17 }
 0x925   :  { %v1893_v39 = vsel %vm1892_vm10, %v2614_v11, %v1889_v7 }
 0x926   :  { %v1898_v18 = vsel %vm1895_vm11, %v1897_v62, %v1893_v39  ;;  %v1913_v42 = vsel %vm1912_vm15, %v2616_v33, %v1909_v25  ;;  %v2315_v33 = vld [vmem:[%s3544_s8] sm:$0xff] }
 0x927   :  { %v1920_v31 = vmul.f32 %v1898_v18, %v1878_v37  ;;  %v1918_v20 = vsel %vm1915_vm1, %v1917_v44, %v1913_v42 }
 0x928   :  { %v1923_v50 = vsub.f32 1.0, %v1918_v20  ;;  %v1926_v53 = vmul.f32 %v1918_v20, %v3404_v0 }
 0x929   :  { %v1921_v40 = vadd.f32 %v1920_v31, %v3438_v34 }
 0x92b   :  { %2617 = vtanh.f32 %v1921_v40 }
 0x931   :  { %v2618_v45 = vpop.eup %2617 }
 0x932   :  { %v1924_v47 = vmul.f32 %v2618_v45, %v1923_v50 }
 0x934   :  { %v1927_v54 = vadd.f32 %v1926_v53, %v1924_v47  ;;  %v2313_v53 = vld [vmem:[#allocation2] sm:$0xff] }
 0x936   :  { %v1928_v55 = vmul.f32 %v1927_v54, %v3127_v52 }
 0x938   :  { %v3445_v57 = vadd.f32 %v1929_v35, %v1928_v55 }
 0x93a   :  { %v1931_v58 = vmul.f32 %v3445_v57, %v3127_v52  ;;  %2450 = vmatmul.msk.f32.vlgmr.msrb.gmra.mxu3 %vm105_vm0, %v3445_v57  ;;  %2451 = vmatmul.msk.f32.vlgmr.msrb.gmra.mxu0 %vm105_vm0, %v3445_v57  ;;  %v2050_v29 = vrot.slane %v3445_v57, 6 }
 0x93b   :  { %2452 = vmatmul.msk.f32.vlgmr.msrb.gmra.mxu1 %vm105_vm0, %v3445_v57  ;;  %2242 = vmatpush.msrb.mxu3 %v3231_v24  ;;  %v3492_v57 = vld [vmem:[%s3545_s9] ss:$0 sm:$0xff] }
 0x93c   :  { %1932 = vst.msk [vmem:[#allocation2 + $0x8] sm:$0x3] %vm315_vm9, %v1931_v58  ;;  %2341 = vmatpush.msrb.mxu0 %v2318_v23  ;;  %v2055_v20 = vmul.f32 %v2050_v29, %v3131_v41 }
 0x93d   :  { %2243 = vmatpush.msrb.mxu3 %v3233_v1 }
 0x93e   :  { %2342 = vmatpush.msrb.mxu0 %v2317_v27 }
 0x93f   :  { %2244 = vmatpush.msrb.mxu3 %v3244_v51 }
 0x940   :  { %2343 = vmatpush.msrb.mxu0 %v2316_v43 }
 0x941   :  { %2245 = vmatpush.msrb.mxu3 %v3246_v36 }
 0x942   :  { %2344 = vmatpush.msrb.mxu0 %v2315_v33 }
 0x9b7   :  { %v1973_v56 = vpop.f32.mrf.mxu0 }
 0x9b8   :  { %v2020_v61 = vrot.slane %v1973_v56, 6  ;;  %v1993_v60 = vpop.f32.mrf.mxu1 }
 0x9b9   :  { %v1994_v59 = vadd.f32 %v3299_v48, %v1993_v60 }
 0x9ba   :  { %v2022_v38 = vadd.f32 %v2020_v61, %v3431_v30 }
 0x9bb   :  { %v2043_v3 = vrot.slane %v1994_v59, 6 }
 0x9bc   :  { %v2454_v63 = vmul.f32 -1.442695, %v2022_v38 }
 0x9bd   :  { %v1953_v46 = vpop.f32.mrf.mxu3 }
 0x9be   :  { %2619 = vpow2.f32 %v2454_v63  ;;  %v1997_v4 = vrot.slane %v1953_v46, 6 }
 0x9c0   :  { %v1999_v6 = vadd.f32 %v1997_v4, %v3427_v13 }
 0x9c2   :  { %v2453_v8 = vmul.f32 -1.442695, %v1999_v6 }
 0x9c4   :  { %v2620_v24 = vpop.eup %2619  ;;  %2621 = vpow2.f32 %v2453_v8 }
 0x9c5   :  { %v2026_v12 = vadd.f32 1.0, %v2620_v24 }
 0x9c7   :  { %2623 = vrcp.f32 %v2026_v12  ;;  %v2038_v17 = vand.u32 2147483648, %v2026_v12  ;;  %vm2032_vm7 = vweird.f32 %v2026_v12  ;;  %v2036_v7 = vand.u32 2147483647, %v2026_v12 }
 0x9c9   :  { %v2039_v39 = vor.u32 1.1754944e-38, %v2038_v17  ;;  %vm2037_vm11 = vcmp.eq.f32.partialorder %v2036_v7, 8.507059e+37 }
 0x9ca   :  { %v2622_v1 = vpop.eup %2621 }
 0x9cb   :  { %v2003_v49 = vadd.f32 1.0, %v2622_v1 }
 0x9cd   :  { %2625 = vrcp.f32 %v2003_v49  ;;  %v2624_v51 = vpop.eup %2623  ;;  %v2015_v19 = vand.u32 2147483648, %v2003_v49  ;;  %v2013_v11 = vand.u32 2147483647, %v2003_v49  ;;  %vm2009_vm2 = vweird.f32 %v2003_v49 }
 0x9ce   :  { %v2028_v36 = vmul.f32 %v2624_v51, %v2026_v12  ;;  %vm2033_vm6 = vweird.f32 %v2624_v51 }
 0x9cf   :  { %v2016_v21 = vor.u32 1.1754944e-38, %v2015_v19  ;;  %vm2014_vm5 = vcmp.eq.f32.partialorder %v2013_v11, 8.507059e+37  ;;  %vm2034_vm10 = vmor %vm2032_vm7, %vm2033_vm6 }
 0x9d0   :  { %v2029_v14 = vsub.f32 1.0, %v2028_v36 }
 0x9d2   :  { %v2030_v15 = vmul.f32 %v2624_v51, %v2029_v14 }
 0x9d3   :  { %v2626_v0 = vpop.eup %2625 }
 0x9d4   :  { %v2005_v5 = vmul.f32 %v2626_v0, %v2003_v49  ;;  %vm2010_vm9 = vweird.f32 %v2626_v0  ;;  %v2031_v26 = vadd.f32 %v2624_v51, %v2030_v15 }
 0x9d5   :  { %vm2011_vm4 = vmor %vm2009_vm2, %vm2010_vm9 }
 0x9d6   :  { %v2006_v9 = vsub.f32 1.0, %v2005_v5  ;;  %v2035_v37 = vsel %vm2034_vm10, %v2624_v51, %v2031_v26 }
 0x9d7   :  { %v2040_v25 = vsel %vm2037_vm11, %v2039_v39, %v2035_v37 }
 0x9d8   :  { %v2007_v2 = vmul.f32 %v2626_v0, %v2006_v9  ;;  %v2048_v18 = vsub.f32 1.0, %v2040_v25  ;;  %v2052_v40 = vmul.f32 %v2050_v29, %v2040_v25 }
 0x9da   :  { %v2008_v22 = vadd.f32 %v2626_v0, %v2007_v2 }
 0x9dc   :  { %v2012_v10 = vsel %vm2011_vm4, %v2626_v0, %v2008_v22 }
 0x9dd   :  { %v2017_v28 = vsel %vm2014_vm5, %v2016_v21, %v2012_v10 }
 0x9de   :  { %v2045_v16 = vmul.f32 %v2043_v3, %v2017_v28 }
 0x9e0   :  { %v2046_v62 = vadd.f32 %v2045_v16, %v3438_v34 }
 0x9e2   :  { %2627 = vtanh.f32 %v2046_v62 }
 0x9e8   :  { %v2628_v31 = vpop.eup %2627 }
 0x9e9   :  { %v2049_v32 = vmul.f32 %v2628_v31, %v2048_v18 }
 0x9eb   :  { %v2053_v42 = vadd.f32 %v2052_v40, %v2049_v32 }
 0x9ed   :  { %v2054_v44 = vmul.f32 %v2053_v42, %v3127_v52 }
 0x9ef   :  { %v3479_v50 = vadd.f32 %v2055_v20, %v2054_v44 }
 0x9f1   :  { %v2057_v45 = vmul.f32 %v3479_v50, %v3127_v52  ;;  %v2060_v47 = vrot.slane %v3479_v50, 2  ;;  %v2177_v7 = vrot.slane %v3479_v50, 6 }
 0x9f3   :  { %2058 = vst.msk [vmem:[#allocation2 + $0x8] sm:$0xc] %vm442_vm3, %v2057_v45  ;;  %2455 = vmatmul.msk.f32.vlgmr.msrb.gmra.mxu2 %vm105_vm0, %v2060_v47  ;;  %2456 = vmatmul.msk.f32.vlgmr.msra.gmra.mxu3 %vm105_vm0, %v2060_v47  ;;  %v2182_v29 = vmul.f32 %v2177_v7, %v3131_v41 }
 0x9f4   :  { %2457 = vmatmul.msk.f32.vlgmr.msra.gmra.mxu0 %vm105_vm0, %v2060_v47 }
 0x9fc   :  { %2465 = vmatmul.msk.f32.vlgmr.msrb.gmra.mxu0 %vm105_vm0, %v2313_v53 }
 0xa71   :  { %v2120_v54 = vpop.f32.mrf.mxu0 }
 0xa72   :  { %v2121_v60 = vadd.f32 %v3299_v48, %v2120_v54 }
 0xa74   :  { %v2170_v11 = vrot.slane %v2121_v60, 4 }
 0xa76   :  { %v2080_v55 = vpop.f32.mrf.mxu2  ;;  %v2100_v35 = vpop.f32.mrf.mxu3 }
 0xa77   :  { %v2124_v58 = vrot.slane %v2080_v55, 4  ;;  %v2147_v56 = vrot.slane %v2100_v35, 4 }
 0xa79   :  { %v2126_v61 = vadd.f32 %v2124_v58, %v3427_v13  ;;  %v2149_v38 = vadd.f32 %v2147_v56, %v3431_v30  ;;  %v2346_v63 = vpop.f32.mrf.mxu0 }
 0xa7a   :  { %v2347_v46 = vadd.f32 %v3492_v57, %v2346_v63 }
 0xa7b   :  { %v2458_v4 = vmul.f32 -1.442695, %v2126_v61  ;;  %v2459_v6 = vmul.f32 -1.442695, %v2149_v38 }
 0xa7c   :  { %v2352_v8 = vmax.f32 %v2347_v46, 0.0 }
 0xa7d   :  { %2629 = vpow2.f32 %v2458_v4 }
 0xa7e   :  { %2631 = vpow2.f32 %v2459_v6  ;;  %2354 = vst.msk [vmem:[%s3546_s10] sm:$0xff] %vm105_vm0, %v2352_v8 }
 0xa83   :  { %v2630_v24 = vpop.eup %2629 }
 0xa84   :  { %v2632_v12 = vpop.eup %2631  ;;  %v2130_v1 = vadd.f32 1.0, %v2630_v24 }
 0xa85   :  { %v2153_v49 = vadd.f32 1.0, %v2632_v12 }
 0xa86   :  { %2633 = vrcp.f32 %v2130_v1  ;;  %v2142_v27 = vand.u32 2147483648, %v2130_v1  ;;  %v2140_v43 = vand.u32 2147483647, %v2130_v1  ;;  %vm2136_vm12 = vweird.f32 %v2130_v1 }
 0xa87   :  { %2635 = vrcp.f32 %v2153_v49  ;;  %v2165_v3 = vand.u32 2147483648, %v2153_v49  ;;  %vm2159_vm9 = vweird.f32 %v2153_v49  ;;  %v2163_v10 = vand.u32 2147483647, %v2153_v49 }
 0xa88   :  { %v2143_v2 = vor.u32 1.1754944e-38, %v2142_v27  ;;  %vm2141_vm15 = vcmp.eq.f32.partialorder %v2140_v43, 8.507059e+37 }
 0xa89   :  { %v2166_v28 = vor.u32 1.1754944e-38, %v2165_v3  ;;  %vm2164_vm4 = vcmp.eq.f32.partialorder %v2163_v10, 8.507059e+37 }
 0xa8c   :  { %v2634_v51 = vpop.eup %2633 }
 0xa8d   :  { %v2636_v36 = vpop.eup %2635  ;;  %v2132_v0 = vmul.f32 %v2634_v51, %v2130_v1  ;;  %vm2137_vm3 = vweird.f32 %v2634_v51 }
 0xa8e   :  { %v2155_v5 = vmul.f32 %v2636_v36, %v2153_v49  ;;  %vm2138_vm14 = vmor %vm2136_vm12, %vm2137_vm3  ;;  %vm2160_vm1 = vweird.f32 %v2636_v36 }
 0xa8f   :  { %v2133_v23 = vsub.f32 1.0, %v2132_v0  ;;  %vm2161_vm2 = vmor %vm2159_vm9, %vm2160_vm1 }
 0xa90   :  { %v2156_v14 = vsub.f32 1.0, %v2155_v5 }
 0xa91   :  { %v2134_v9 = vmul.f32 %v2634_v51, %v2133_v23 }
 0xa92   :  { %v2157_v19 = vmul.f32 %v2636_v36, %v2156_v14 }
 0xa93   :  { %v2135_v59 = vadd.f32 %v2634_v51, %v2134_v9 }
 0xa94   :  { %v2158_v22 = vadd.f32 %v2636_v36, %v2157_v19 }
 0xa95   :  { %v2139_v33 = vsel %vm2138_vm14, %v2634_v51, %v2135_v59 }
 0xa96   :  { %v2144_v15 = vsel %vm2141_vm15, %v2143_v2, %v2139_v33  ;;  %v2162_v26 = vsel %vm2161_vm2, %v2636_v36, %v2158_v22 }
 0xa97   :  { %v2172_v21 = vmul.f32 %v2170_v11, %v2144_v15  ;;  %v2167_v17 = vsel %vm2164_vm4, %v2166_v28, %v2162_v26 }
 0xa98   :  { %v2175_v16 = vsub.f32 1.0, %v2167_v17  ;;  %v2179_v39 = vmul.f32 %v2177_v7, %v2167_v17 }
 0xa99   :  { %v2173_v48 = vadd.f32 %v2172_v21, %v3438_v34 }
 0xa9b   :  { %2637 = vtanh.f32 %v2173_v48 }
 0xaa1   :  { %v2638_v62 = vpop.eup %2637 }
 0xaa2   :  { %v2176_v37 = vmul.f32 %v2638_v62, %v2175_v16 }
 0xaa4   :  { %v2180_v25 = vadd.f32 %v2179_v39, %v2176_v37 }
 0xaa6   :  { %v2181_v18 = vmul.f32 %v2180_v25, %v3127_v52 }
 0xaa8   :  { %v3506_v31 = vadd.f32 %v2182_v29, %v2181_v18 }
 0xaaa   :  { %v2184_v32 = vmul.f32 %v3506_v31, %v3127_v52  ;;  %v2187_v40 = vrot.slane %v3506_v31, 4  ;;  %v2304_v33 = vrot.slane %v3506_v31, 6 }
 0xaac   :  { %2185 = vst.msk [vmem:[#allocation2 + $0x8] sm:$0x30] %vm570_vm13, %v2184_v32  ;;  %2460 = vmatmul.msk.f32.vlgmr.msra.gmra.mxu1 %vm105_vm0, %v2187_v40  ;;  %2461 = vmatmul.msk.f32.vlgmr.msra.gmra.mxu2 %vm105_vm0, %v2187_v40  ;;  %v2309_v48 = vmul.f32 %v2304_v33, %v3131_v41 }
 0xaad   :  { %2462 = vmatmul.msk.f32.vlgmr.msrb.gmra.mxu3 %vm105_vm0, %v2187_v40 }
 0xb29   :  { %v2207_v42 = vpop.f32.mrf.mxu1 }
 0xb2a   :  { %v2251_v44 = vrot.slane %v2207_v42, 2 }
 0xb2c   :  { %v2253_v20 = vadd.f32 %v2251_v44, %v3427_v13  ;;  %v2650_v13 = vld [vmem:[%s3543_s7 + $0x3] ss:$0 sm:$0xff] }
 0xb2e   :  { %v2463_v50 = vmul.f32 -1.442695, %v2253_v20 }
 0xb2f   :  { %v2227_v45 = vpop.f32.mrf.mxu2 }
 0xb30   :  { %2639 = vpow2.f32 %v2463_v50  ;;  %v2274_v47 = vrot.slane %v2227_v45, 2  ;;  %v2247_v63 = vpop.f32.mrf.mxu3 }
 0xb31   :  { %v2248_v6 = vadd.f32 %v2650_v13, %v2247_v63 }
 0xb32   :  { %v2276_v53 = vadd.f32 %v2274_v47, %v3431_v30 }
 0xb33   :  { %v2297_v0 = vrot.slane %v2248_v6, 2 }
 0xb34   :  { %v2464_v54 = vmul.f32 -1.442695, %v2276_v53 }
 0xb36   :  { %v2640_v55 = vpop.eup %2639  ;;  %2641 = vpow2.f32 %v2464_v54 }
 0xb37   :  { %v2257_v35 = vadd.f32 1.0, %v2640_v55 }
 0xb39   :  { %2643 = vrcp.f32 %v2257_v35  ;;  %v2269_v4 = vand.u32 2147483648, %v2257_v35  ;;  %v2267_v30 = vand.u32 2147483647, %v2257_v35  ;;  %vm2263_vm5 = vweird.f32 %v2257_v35 }
 0xb3b   :  { %v2270_v49 = vor.u32 1.1754944e-38, %v2269_v4  ;;  %vm2268_vm7 = vcmp.eq.f32.partialorder %v2267_v30, 8.507059e+37 }
 0xb3c   :  { %v2642_v58 = vpop.eup %2641 }
 0xb3d   :  { %v2280_v56 = vadd.f32 1.0, %v2642_v58 }
 0xb3f   :  { %v2644_v61 = vpop.eup %2643  ;;  %2645 = vrcp.f32 %v2280_v56  ;;  %v2292_v27 = vand.u32 2147483648, %v2280_v56  ;;  %v2290_v60 = vand.u32 2147483647, %v2280_v56  ;;  %vm2286_vm11 = vweird.f32 %v2280_v56 }
 0xb40   :  { %v2259_v38 = vmul.f32 %v2644_v61, %v2257_v35  ;;  %vm2264_vm13 = vweird.f32 %v2644_v61 }
 0xb41   :  { %vm2265_vm6 = vmor %vm2263_vm5, %vm2264_vm13  ;;  %v2293_v19 = vor.u32 1.1754944e-38, %v2292_v27  ;;  %vm2291_vm12 = vcmp.eq.f32.partialorder %v2290_v60, 8.507059e+37 }
 0xb42   :  { %v2260_v46 = vsub.f32 1.0, %v2259_v38 }
 0xb44   :  { %v2261_v8 = vmul.f32 %v2644_v61, %v2260_v46 }
 0xb45   :  { %v2646_v24 = vpop.eup %2645 }
 0xb46   :  { %v2282_v12 = vmul.f32 %v2646_v24, %v2280_v56  ;;  %v2262_v1 = vadd.f32 %v2644_v61, %v2261_v8  ;;  %vm2287_vm10 = vweird.f32 %v2646_v24 }
 0xb47   :  { %vm2288_vm3 = vmor %vm2286_vm11, %vm2287_vm10 }
 0xb48   :  { %v2283_v51 = vsub.f32 1.0, %v2282_v12  ;;  %v2266_v36 = vsel %vm2265_vm6, %v2644_v61, %v2262_v1 }
 0xb49   :  { %v2271_v5 = vsel %vm2268_vm7, %v2270_v49, %v2266_v36 }
 0xb4a   :  { %v2284_v23 = vmul.f32 %v2646_v24, %v2283_v51  ;;  %v2299_v14 = vmul.f32 %v2297_v0, %v2271_v5 }
 0xb4c   :  { %v2285_v9 = vadd.f32 %v2646_v24, %v2284_v23  ;;  %v2300_v43 = vadd.f32 %v2299_v14, %v3438_v34 }
 0xb4e   :  { %v2289_v59 = vsel %vm2288_vm3, %v2646_v24, %v2285_v9  ;;  %2647 = vtanh.f32 %v2300_v43 }
 0xb4f   :  { %v2294_v2 = vsel %vm2291_vm12, %v2293_v19, %v2289_v59 }
 0xb50   :  { %v2302_v11 = vsub.f32 1.0, %v2294_v2  ;;  %v2306_v21 = vmul.f32 %v2304_v33, %v2294_v2 }
 0xb54   :  { %v2648_v15 = vpop.eup %2647 }
 0xb55   :  { %v2303_v22 = vmul.f32 %v2648_v15, %v2302_v11 }
 0xb57   :  { %v2307_v3 = vadd.f32 %v2306_v21, %v2303_v22 }
 0xb59   :  { %v2308_v10 = vmul.f32 %v2307_v3, %v3127_v52 }
 0xb5b   :  { %v2310_v26 = vadd.f32 %v2309_v48, %v2308_v10 }
 0xb5d   :  { %v2311_v34 = vmul.f32 %v2310_v26, %v3127_v52  ;;  %2356 = vst.msk [vmem:[#allocation8 - $0x6] sm:$0xc0] %vm698_vm8, %v2310_v26 }
 0xb5e   :  { %2369 = dma.vmem_to_hbm [thread:$0]  %s2365_s25, 32, %s2367_s23, [#allocation5]  }
 0xb5f   :  { %2312 = vst.msk [vmem:[#allocation2 + $0x8] sm:$0xc0] %vm698_vm8, %v2311_v34 }
 0xb66   :  { %v2314_v28 = vld [vmem:[#allocation2 + $0x8] sm:$0xff] }
 0xb67   :  { %2466 = vmatmul.msk.f32.gmra.mxu0 %vm105_vm0, %v2314_v28 }
 0xbe4   :  { %v2349_v41 = vpop.f32.mrf.mxu0 }
 0xbe5   :  { %v2350_v17 = vadd.f32 %v3492_v57, %v2349_v41 }
 0xbe7   :  { %v2353_v52 = vmax.f32 %v2350_v17, 0.0 }
 0xbe9   :  { %2355 = vst.msk [vmem:[%s3546_s10 + $0x8] sm:$0xff] %vm105_vm0, %v2353_v52 }
 0xbea   :  { %2727 = dma.done.wait [#allocation5], 32  }
 0xbeb   :  { %2728 = vsyncadd [#allocation5], 4294967264 }
 0xbec   :  { %2376 = vsyncpa [#allocation4], 1 }
 0xbed   :  { %2377 = vsyncpa [#allocation7], 1 }
 0xbee   :  { %2378 = vsyncpa [#allocation5], 1 }

</bundles_post_ra>
